<compile_context>
chip_gen: v7x
topology: tpu7x:2x2x1
jax: 0.10.0
libtpu: 0.0.40
codegen_flags: <defaults>
</compile_context>

<pallas_src>
import functools

import jax
import jax.numpy as jnp
from jax.experimental import pallas as pl
from jax.experimental.pallas import tpu as pltpu


def _round_up(x, m):
    return (x + m - 1) // m * m


# ----------------------------- Pallas kernels --------------------------------

def _matmul_bias_kernel(a_ref, w_ref, b_ref, o_ref, *, relu):
    # a: (bm, K) bf16, w: (K, N) bf16, b: (1, N) f32 -> o: (bm, N)
    acc = jnp.dot(a_ref[...], w_ref[...], preferred_element_type=jnp.float32)
    acc = acc + b_ref[...]
    if relu:
        acc = jnp.maximum(acc, 0.0)
    o_ref[...] = acc.astype(o_ref.dtype)


def matmul_bias(a, w, b, *, relu, out_dtype=jnp.bfloat16):
    """relu?(a @ w + b). a: [M, K] bf16, w: [K, N] bf16, b: [1, N] f32."""
    M, K = a.shape
    K2, N = w.shape
    assert K == K2, (K, K2)
    if M <= 8:
        bm = _round_up(M, 8)                       # tiny M: single full block
    else:
        # >=2 grid steps so A-block DMAs overlap compute; cap at 128 rows.
        bm = min(128, _round_up(-(-M // 2), 16))
    M_pad = _round_up(M, bm)
    if M_pad != M:
        a = jnp.pad(a, ((0, M_pad - M), (0, 0)))

    kernel = functools.partial(_matmul_bias_kernel, relu=relu)
    out = pl.pallas_call(
        kernel,
        out_shape=jax.ShapeDtypeStruct((M_pad, N), out_dtype),
        grid_spec=pltpu.PrefetchScalarGridSpec(
            num_scalar_prefetch=0,
            grid=(M_pad // bm,),
            in_specs=[
                pl.BlockSpec((bm, K), lambda i: (i, 0)),
                pl.BlockSpec((K, N), lambda i: (0, 0)),
                pl.BlockSpec((1, N), lambda i: (0, 0)),
            ],
            out_specs=pl.BlockSpec((bm, N), lambda i: (i, 0)),
        ),
        compiler_params=pltpu.CompilerParams(
            dimension_semantics=("parallel",)),
    )(a, w, b)
    return out[:M]


def _fc_head_kernel(a_ref, w4_ref, b4_ref, w5_ref, b5_ref, q_ref, acc_ref):
    # Grid walks the Linear1 output columns in lane-dense 128-wide blocks.
    j = pl.program_id(0)

    @pl.when(j == 0)
    def _():
        acc_ref[...] = jnp.zeros_like(acc_ref)

    h = jnp.dot(a_ref[...], w4_ref[...], preferred_element_type=jnp.float32)
    h = jnp.maximum(h + b4_ref[...], 0.0)                       # ReLU(Linear1) chunk
    acc_ref[...] += jnp.dot(h.astype(jnp.bfloat16), w5_ref[...],
                            preferred_element_type=jnp.float32)  # partial Linear2

    @pl.when(j == pl.num_programs(0) - 1)
    def _():
        q_ref[...] = acc_ref[...] + b5_ref[...]


def fc_head(flat, w4, b4, w5, b5, *, block_n=128):
    """q = relu(flat @ w4 + b4) @ w5 + b5, fused into one pallas_call."""
    M, K = flat.shape
    K2, H = w4.shape
    H2, A = w5.shape
    assert K == K2 and H == H2 and H % block_n == 0
    M_pad = _round_up(M, 8)                        # pad only to sublane granule
    if M_pad != M:
        flat = jnp.pad(flat, ((0, M_pad - M), (0, 0)))

    q = pl.pallas_call(
        _fc_head_kernel,
        out_shape=jax.ShapeDtypeStruct((M_pad, A), jnp.float32),
        grid_spec=pltpu.PrefetchScalarGridSpec(
            num_scalar_prefetch=0,
            grid=(H // block_n,),
            in_specs=[
                pl.BlockSpec((M_pad, K), lambda j: (0, 0)),       # activations (resident)
                pl.BlockSpec((K, block_n), lambda j: (0, j)),     # w4 column block (pipelined)
                pl.BlockSpec((1, block_n), lambda j: (0, j)),     # b4 chunk
                pl.BlockSpec((block_n, A), lambda j: (j, 0)),     # w5 row block
                pl.BlockSpec((1, A), lambda j: (0, 0)),           # b5
            ],
            out_specs=pl.BlockSpec((M_pad, A), lambda j: (0, 0)),
            scratch_shapes=[pltpu.VMEM((M_pad, A), jnp.float32)],
        ),
        compiler_params=pltpu.CompilerParams(
            dimension_semantics=("arbitrary",)),
    )(flat, w4, b4, w5, b5)
    return q[:M]


# ------------------------------- conv glue -----------------------------------

def extract_patches(x, kh, kw, stride):
    """x: [N, H, W, C] -> ([N*OH*OW, C*kh*kw], OH, OW).

    Single XLA op.  Per-patch feature order is (C, kh, kw)
    (conv_general_dilated_patches orders output channels as
    c*kh*kw + flat_filter_index), matching the flattened torch Conv2d weight
    [C_out, C_in, kh, kw].
    """
    N, H, W, C = x.shape
    OH = (H - kh) // stride + 1
    OW = (W - kw) // stride + 1
    p = jax.lax.conv_general_dilated_patches(
        x, (kh, kw), (stride, stride), "VALID",
        dimension_numbers=("NHWC", "HWIO", "NHWC"))
    return p.reshape(N * OH * OW, C * kh * kw).astype(jnp.bfloat16), OH, OW


def conv2d_relu(x, wm, b, kh, kw, stride):
    """x: [N,H,W,Cin] bf16, wm: [Cin*kh*kw, Cout] bf16, b: [1,Cout] f32 -> NHWC bf16."""
    N = x.shape[0]
    C_out = wm.shape[1]
    a, OH, OW = extract_patches(x, kh, kw, stride)
    y = matmul_bias(a, wm, b, relu=True, out_dtype=jnp.bfloat16)
    return y.reshape(N, OH, OW, C_out)


# ------------------------------- DQN model -----------------------------------

def init_dqn_params(key, in_channels, n_actions):
    """Deterministic init; shapes follow the PyTorch module (torch layout)."""
    ks = jax.random.split(key, 10)

    def uinit(k, shape, fan_in):
        bound = 1.0 / jnp.sqrt(jnp.float32(fan_in))
        return jax.random.uniform(k, shape, jnp.float32, -bound, bound)

    return {
        "w1": uinit(ks[0], (32, in_channels, 8, 8), in_channels * 8 * 8),
        "b1": uinit(ks[1], (32,), in_channels * 8 * 8),
        "w2": uinit(ks[2], (64, 32, 4, 4), 32 * 4 * 4),
        "b2": uinit(ks[3], (64,), 32 * 4 * 4),
        "w3": uinit(ks[4], (64, 64, 3, 3), 64 * 3 * 3),
        "b3": uinit(ks[5], (64,), 64 * 3 * 3),
        "w4": uinit(ks[6], (512, 2304), 2304),   # torch Linear: [out, in]
        "b4": uinit(ks[7], (512,), 2304),
        "w5": uinit(ks[8], (n_actions, 512), 512),
        "b5": uinit(ks[9], (n_actions,), 512),
    }


def prepare_params(p):
    """One-time conversion of torch-layout params to kernel layout.

    * Conv weights -> [C_in*kh*kw, C_out] bf16 (matches patch feature order).
    * w4's input dim is permuted from torch's NCHW-flatten order (c, h, w) to
      the NHWC-flatten order (h, w, c) used here, so no activation transpose
      is needed before the Linear layers.
    * MXU operands bf16; biases stay f32 (f32 epilogue inside the kernels).
    """
    bf16 = jnp.bfloat16
    w4_hwc = (p["w4"].reshape(512, 64, 6, 6)      # (out, c, h, w)
                     .transpose(0, 2, 3, 1)       # (out, h, w, c)
                     .reshape(512, 2304))
    return {
        "w1m": p["w1"].reshape(32, -1).T.astype(bf16),
        "w2m": p["w2"].reshape(64, -1).T.astype(bf16),
        "w3m": p["w3"].reshape(64, -1).T.astype(bf16),
        "w4m": w4_hwc.T.astype(bf16),             # (2304, 512)
        "w5m": p["w5"].T.astype(bf16),            # (512, n_actions)
        "b1": p["b1"].reshape(1, -1).astype(jnp.float32),
        "b2": p["b2"].reshape(1, -1).astype(jnp.float32),
        "b3": p["b3"].reshape(1, -1).astype(jnp.float32),
        "b4": p["b4"].reshape(1, -1).astype(jnp.float32),
        "b5": p["b5"].reshape(1, -1).astype(jnp.float32),
    }


def dqn_forward(kp, x):
    """x: [N, C, H, W] float32 (NCHW, like PyTorch) -> [N, n_actions] float32."""
    x = jnp.transpose(x, (0, 2, 3, 1)).astype(jnp.bfloat16)   # single NHWC cast
    y = conv2d_relu(x, kp["w1m"], kp["b1"], 8, 8, 4)
    y = conv2d_relu(y, kp["w2m"], kp["b2"], 4, 4, 2)
    y = conv2d_relu(y, kp["w3m"], kp["b3"], 3, 3, 1)
    n = y.shape[0]
    flat = y.reshape(n, -1)     # NHWC flatten; w4m already permuted to match torch
    return fc_head(flat, kp["w4m"], kp["b4"], kp["w5m"], kp["b5"])


# --------------------------------- main ---------------------------------------

if __name__ == "__main__":
    # Pong: 4 stacked 80x80 frames (80 -> 19 -> 8 -> 6 spatial, 64*6*6 = 2304,
    # which is what makes Linear(2304, 512) exact), 6 discrete actions.
    batch, in_channels, hw = 2, 4, 80
    n_actions = 6

    key = jax.random.PRNGKey(0)
    pkey, xkey = jax.random.split(key)
    torch_params = init_dqn_params(pkey, in_channels, n_actions)
    kparams = prepare_params(torch_params)
    x = jax.random.normal(xkey, (batch, in_channels, hw, hw), jnp.float32)

    q = jax.jit(dqn_forward)(kparams, x)
    q = jax.block_until_ready(q)
    assert q.shape == (batch, n_actions), q.shape
    assert q.dtype == jnp.float32
    print("KERNEL_OK")
</pallas_src>

<mosaic_0001>
module attributes {stable_mosaic.version = 11 : i64} {
  func.func @_matmul_bias_kernel(%arg0: i32, %arg1: memref<128x256xbf16, #tpu.memory_space<vmem>>, %arg2: memref<256x32xbf16, #tpu.memory_space<vmem>>, %arg3: memref<1x32xf32, #tpu.memory_space<vmem>>, %arg4: memref<128x32xbf16, #tpu.memory_space<vmem>>) attributes {dimension_semantics = [#tpu.dimension_semantics<parallel>], iteration_bounds = array<i64: 6>, scalar_prefetch = 0 : i64, scratch_operands = 0 : i64, tpu.core_type = #tpu.core_type<tc>, window_params = [{transform_indices = @transform_0, window_bounds = array<i64: 128, 256>}, {pipeline_mode = #tpu.pipeline_mode<synchronous>, transform_indices = @transform_1, window_bounds = array<i64: 256, 32>}, {pipeline_mode = #tpu.pipeline_mode<synchronous>, transform_indices = @transform_2, window_bounds = array<i64: 1, 32>}, {transform_indices = @transform_3, window_bounds = array<i64: 128, 32>}]} {
    %c0 = arith.constant 0 : index
    %c0_0 = arith.constant 0 : index
    %0 = vector.load %arg1[%c0, %c0_0] : memref<128x256xbf16, #tpu.memory_space<vmem>>, vector<128x256xbf16>
    %c0_1 = arith.constant 0 : index
    %c0_2 = arith.constant 0 : index
    %1 = vector.load %arg2[%c0_1, %c0_2] : memref<256x32xbf16, #tpu.memory_space<vmem>>, vector<256x32xbf16>
    %cst = arith.constant dense<0.000000e+00> : vector<128x32xf32>
    %2 = tpu.matmul %0, %1, %cst {dimension_numbers = #tpu.dot_dimension_numbers<[1], [0], [0], [1], [0, 0, 1, 1], [], []>} : vector<128x256xbf16>, vector<256x32xbf16>, vector<128x32xf32> -> vector<128x32xf32>
    %c0_3 = arith.constant 0 : index
    %c0_4 = arith.constant 0 : index
    %3 = vector.load %arg3[%c0_3, %c0_4] : memref<1x32xf32, #tpu.memory_space<vmem>>, vector<1x32xf32>
    %4 = vector.broadcast %3 : vector<1x32xf32> to vector<128x32xf32>
    %5 = arith.addf %2, %4 : vector<128x32xf32>
    %cst_5 = arith.constant 0.000000e+00 : f32
    %6 = vector.broadcast %cst_5 : f32 to vector<128x32xf32>
    %7 = arith.maximumf %5, %6 : vector<128x32xf32>
    %8 = arith.truncf %7 : vector<128x32xf32> to vector<128x32xbf16>
    %c0_6 = arith.constant 0 : index
    %c0_7 = arith.constant 0 : index
    %9 = vector.load %arg4[%c0_6, %c0_7] : memref<128x32xbf16, #tpu.memory_space<vmem>>, vector<128x32xbf16>
    tpu.vector_store %arg4[%c0_6, %c0_7], %8 {strides = array<i32>} : memref<128x32xbf16, #tpu.memory_space<vmem>>, vector<128x32xbf16>,
    return
  }
  func.func @transform_0(%arg0: i32) -> (i32, i32) {
    %c0_i32 = arith.constant 0 : i32
    %c0_i32_0 = arith.constant 0 : i32
    return %arg0, %c0_i32 : i32, i32
  }
  func.func @transform_1(%arg0: i32) -> (i32, i32) {
    %c0_i32 = arith.constant 0 : i32
    %c0_i32_0 = arith.constant 0 : i32
    %c0_i32_1 = arith.constant 0 : i32
    return %c0_i32, %c0_i32_0 : i32, i32
  }
  func.func @transform_2(%arg0: i32) -> (i32, i32) {
    %c0_i32 = arith.constant 0 : i32
    %c0_i32_0 = arith.constant 0 : i32
    %c0_i32_1 = arith.constant 0 : i32
    return %c0_i32, %c0_i32_0 : i32, i32
  }
  func.func @transform_3(%arg0: i32) -> (i32, i32) {
    %c0_i32 = arith.constant 0 : i32
    %c0_i32_0 = arith.constant 0 : i32
    return %arg0, %c0_i32 : i32, i32
  }
}

module attributes {stable_mosaic.version = 11 : i64} {
  func.func @_matmul_bias_kernel(%arg0: i32, %arg1: memref<64x512xbf16, #tpu.memory_space<vmem>>, %arg2: memref<512x64xbf16, #tpu.memory_space<vmem>>, %arg3: memref<1x64xf32, #tpu.memory_space<vmem>>, %arg4: memref<64x64xbf16, #tpu.memory_space<vmem>>) attributes {dimension_semantics = [#tpu.dimension_semantics<parallel>], iteration_bounds = array<i64: 2>, scalar_prefetch = 0 : i64, scratch_operands = 0 : i64, tpu.core_type = #tpu.core_type<tc>, window_params = [{transform_indices = @transform_0, window_bounds = array<i64: 64, 512>}, {pipeline_mode = #tpu.pipeline_mode<synchronous>, transform_indices = @transform_1, window_bounds = array<i64: 512, 64>}, {pipeline_mode = #tpu.pipeline_mode<synchronous>, transform_indices = @transform_2, window_bounds = array<i64: 1, 64>}, {transform_indices = @transform_3, window_bounds = array<i64: 64, 64>}]} {
    %c0 = arith.constant 0 : index
    %c0_0 = arith.constant 0 : index
    %0 = vector.load %arg1[%c0, %c0_0] : memref<64x512xbf16, #tpu.memory_space<vmem>>, vector<64x512xbf16>
    %c0_1 = arith.constant 0 : index
    %c0_2 = arith.constant 0 : index
    %1 = vector.load %arg2[%c0_1, %c0_2] : memref<512x64xbf16, #tpu.memory_space<vmem>>, vector<512x64xbf16>
    %cst = arith.constant dense<0.000000e+00> : vector<64x64xf32>
    %2 = tpu.matmul %0, %1, %cst {dimension_numbers = #tpu.dot_dimension_numbers<[1], [0], [0], [1], [0, 0, 1, 1], [], []>} : vector<64x512xbf16>, vector<512x64xbf16>, vector<64x64xf32> -> vector<64x64xf32>
    %c0_3 = arith.constant 0 : index
    %c0_4 = arith.constant 0 : index
    %3 = vector.load %arg3[%c0_3, %c0_4] : memref<1x64xf32, #tpu.memory_space<vmem>>, vector<1x64xf32>
    %4 = vector.broadcast %3 : vector<1x64xf32> to vector<64x64xf32>
    %5 = arith.addf %2, %4 : vector<64x64xf32>
    %cst_5 = arith.constant 0.000000e+00 : f32
    %6 = vector.broadcast %cst_5 : f32 to vector<64x64xf32>
    %7 = arith.maximumf %5, %6 : vector<64x64xf32>
    %8 = arith.truncf %7 : vector<64x64xf32> to vector<64x64xbf16>
    %c0_6 = arith.constant 0 : index
    %c0_7 = arith.constant 0 : index
    %9 = vector.load %arg4[%c0_6, %c0_7] : memref<64x64xbf16, #tpu.memory_space<vmem>>, vector<64x64xbf16>
    tpu.vector_store %arg4[%c0_6, %c0_7], %8 {strides = array<i32>} : memref<64x64xbf16, #tpu.memory_space<vmem>>, vector<64x64xbf16>,
    return
  }
  func.func @transform_0(%arg0: i32) -> (i32, i32) {
    %c0_i32 = arith.constant 0 : i32
    %c0_i32_0 = arith.constant 0 : i32
    return %arg0, %c0_i32 : i32, i32
  }
  func.func @transform_1(%arg0: i32) -> (i32, i32) {
    %c0_i32 = arith.constant 0 : i32
    %c0_i32_0 = arith.constant 0 : i32
    %c0_i32_1 = arith.constant 0 : i32
    return %c0_i32, %c0_i32_0 : i32, i32
  }
  func.func @transform_2(%arg0: i32) -> (i32, i32) {
    %c0_i32 = arith.constant 0 : i32
    %c0_i32_0 = arith.constant 0 : i32
    %c0_i32_1 = arith.constant 0 : i32
    return %c0_i32, %c0_i32_0 : i32, i32
  }
  func.func @transform_3(%arg0: i32) -> (i32, i32) {
    %c0_i32 = arith.constant 0 : i32
    %c0_i32_0 = arith.constant 0 : i32
    return %arg0, %c0_i32 : i32, i32
  }
}

module attributes {stable_mosaic.version = 11 : i64} {
  func.func @_matmul_bias_kernel(%arg0: i32, %arg1: memref<48x576xbf16, #tpu.memory_space<vmem>>, %arg2: memref<576x64xbf16, #tpu.memory_space<vmem>>, %arg3: memref<1x64xf32, #tpu.memory_space<vmem>>, %arg4: memref<48x64xbf16, #tpu.memory_space<vmem>>) attributes {dimension_semantics = [#tpu.dimension_semantics<parallel>], iteration_bounds = array<i64: 2>, scalar_prefetch = 0 : i64, scratch_operands = 0 : i64, tpu.core_type = #tpu.core_type<tc>, window_params = [{transform_indices = @transform_0, window_bounds = array<i64: 48, 576>}, {pipeline_mode = #tpu.pipeline_mode<synchronous>, transform_indices = @transform_1, window_bounds = array<i64: 576, 64>}, {pipeline_mode = #tpu.pipeline_mode<synchronous>, transform_indices = @transform_2, window_bounds = array<i64: 1, 64>}, {transform_indices = @transform_3, window_bounds = array<i64: 48, 64>}]} {
    %c0 = arith.constant 0 : index
    %c0_0 = arith.constant 0 : index
    %0 = vector.load %arg1[%c0, %c0_0] : memref<48x576xbf16, #tpu.memory_space<vmem>>, vector<48x576xbf16>
    %c0_1 = arith.constant 0 : index
    %c0_2 = arith.constant 0 : index
    %1 = vector.load %arg2[%c0_1, %c0_2] : memref<576x64xbf16, #tpu.memory_space<vmem>>, vector<576x64xbf16>
    %cst = arith.constant dense<0.000000e+00> : vector<48x64xf32>
    %2 = tpu.matmul %0, %1, %cst {dimension_numbers = #tpu.dot_dimension_numbers<[1], [0], [0], [1], [0, 0, 1, 1], [], []>} : vector<48x576xbf16>, vector<576x64xbf16>, vector<48x64xf32> -> vector<48x64xf32>
    %c0_3 = arith.constant 0 : index
    %c0_4 = arith.constant 0 : index
    %3 = vector.load %arg3[%c0_3, %c0_4] : memref<1x64xf32, #tpu.memory_space<vmem>>, vector<1x64xf32>
    %4 = vector.broadcast %3 : vector<1x64xf32> to vector<48x64xf32>
    %5 = arith.addf %2, %4 : vector<48x64xf32>
    %cst_5 = arith.constant 0.000000e+00 : f32
    %6 = vector.broadcast %cst_5 : f32 to vector<48x64xf32>
    %7 = arith.maximumf %5, %6 : vector<48x64xf32>
    %8 = arith.truncf %7 : vector<48x64xf32> to vector<48x64xbf16>
    %c0_6 = arith.constant 0 : index
    %c0_7 = arith.constant 0 : index
    %9 = vector.load %arg4[%c0_6, %c0_7] : memref<48x64xbf16, #tpu.memory_space<vmem>>, vector<48x64xbf16>
    tpu.vector_store %arg4[%c0_6, %c0_7], %8 {strides = array<i32>} : memref<48x64xbf16, #tpu.memory_space<vmem>>, vector<48x64xbf16>,
    return
  }
  func.func @transform_0(%arg0: i32) -> (i32, i32) {
    %c0_i32 = arith.constant 0 : i32
    %c0_i32_0 = arith.constant 0 : i32
    return %arg0, %c0_i32 : i32, i32
  }
  func.func @transform_1(%arg0: i32) -> (i32, i32) {
    %c0_i32 = arith.constant 0 : i32
    %c0_i32_0 = arith.constant 0 : i32
    %c0_i32_1 = arith.constant 0 : i32
    return %c0_i32, %c0_i32_0 : i32, i32
  }
  func.func @transform_2(%arg0: i32) -> (i32, i32) {
    %c0_i32 = arith.constant 0 : i32
    %c0_i32_0 = arith.constant 0 : i32
    %c0_i32_1 = arith.constant 0 : i32
    return %c0_i32, %c0_i32_0 : i32, i32
  }
  func.func @transform_3(%arg0: i32) -> (i32, i32) {
    %c0_i32 = arith.constant 0 : i32
    %c0_i32_0 = arith.constant 0 : i32
    return %arg0, %c0_i32 : i32, i32
  }
}

module attributes {stable_mosaic.version = 11 : i64} {
  func.func @_fc_head_kernel(%arg0: i32, %arg1: memref<8x2304xbf16, #tpu.memory_space<vmem>>, %arg2: memref<2304x128xbf16, #tpu.memory_space<vmem>>, %arg3: memref<1x128xf32, #tpu.memory_space<vmem>>, %arg4: memref<128x6xbf16, #tpu.memory_space<vmem>>, %arg5: memref<1x6xf32, #tpu.memory_space<vmem>>, %arg6: memref<8x6xf32, #tpu.memory_space<vmem>>, %arg7: memref<8x6xf32, #tpu.memory_space<vmem>>) attributes {dimension_semantics = [#tpu.dimension_semantics<arbitrary>], iteration_bounds = array<i64: 4>, scalar_prefetch = 0 : i64, scratch_operands = 1 : i64, tpu.core_type = #tpu.core_type<tc>, window_params = [{pipeline_mode = #tpu.pipeline_mode<synchronous>, transform_indices = @transform_0, window_bounds = array<i64: 8, 2304>}, {transform_indices = @transform_1, window_bounds = array<i64: 2304, 128>}, {transform_indices = @transform_2, window_bounds = array<i64: 1, 128>}, {transform_indices = @transform_3, window_bounds = array<i64: 128, 6>}, {pipeline_mode = #tpu.pipeline_mode<synchronous>, transform_indices = @transform_4, window_bounds = array<i64: 1, 6>}, {pipeline_mode = #tpu.pipeline_mode<synchronous>, transform_indices = @transform_5, window_bounds = array<i64: 8, 6>}]} {
    %c0_i32 = arith.constant 0 : i32
    %0 = arith.cmpi eq, %arg0, %c0_i32 : i32
    %1 = arith.extui %0 : i1 to i32
    %c0_i32_0 = arith.constant 0 : i32
    %2 = arith.cmpi ne, %1, %c0_i32_0 : i32
    scf.if %2 {
      %cst_15 = arith.constant 0.000000e+00 : f32
      %20 = vector.broadcast %cst_15 : f32 to vector<8x6xf32>
      %c0_16 = arith.constant 0 : index
      %c0_17 = arith.constant 0 : index
      %21 = vector.load %arg7[%c0_16, %c0_17] : memref<8x6xf32, #tpu.memory_space<vmem>>, vector<8x6xf32>
      tpu.vector_store %arg7[%c0_16, %c0_17], %20 {strides = array<i32>} : memref<8x6xf32, #tpu.memory_space<vmem>>, vector<8x6xf32>,
    } else {
    }
    %c0 = arith.constant 0 : index
    %c0_1 = arith.constant 0 : index
    %3 = vector.load %arg1[%c0, %c0_1] : memref<8x2304xbf16, #tpu.memory_space<vmem>>, vector<8x2304xbf16>
    %c0_2 = arith.constant 0 : index
    %c0_3 = arith.constant 0 : index
    %4 = vector.load %arg2[%c0_2, %c0_3] : memref<2304x128xbf16, #tpu.memory_space<vmem>>, vector<2304x128xbf16>
    %cst = arith.constant dense<0.000000e+00> : vector<8x128xf32>
    %5 = tpu.matmul %3, %4, %cst {dimension_numbers = #tpu.dot_dimension_numbers<[1], [0], [0], [1], [0, 0, 1, 1], [], []>} : vector<8x2304xbf16>, vector<2304x128xbf16>, vector<8x128xf32> -> vector<8x128xf32>
    %c0_4 = arith.constant 0 : index
    %c0_5 = arith.constant 0 : index
    %6 = vector.load %arg3[%c0_4, %c0_5] : memref<1x128xf32, #tpu.memory_space<vmem>>, vector<1x128xf32>
    %7 = vector.broadcast %6 : vector<1x128xf32> to vector<8x128xf32>
    %8 = arith.addf %5, %7 : vector<8x128xf32>
    %cst_6 = arith.constant 0.000000e+00 : f32
    %9 = vector.broadcast %cst_6 : f32 to vector<8x128xf32>
    %10 = arith.maximumf %8, %9 : vector<8x128xf32>
    %c0_7 = arith.constant 0 : index
    %c0_8 = arith.constant 0 : index
    %11 = vector.load %arg7[%c0_7, %c0_8] : memref<8x6xf32, #tpu.memory_space<vmem>>, vector<8x6xf32>
    %12 = arith.truncf %10 : vector<8x128xf32> to vector<8x128xbf16>
    %c0_9 = arith.constant 0 : index
    %c0_10 = arith.constant 0 : index
    %13 = vector.load %arg4[%c0_9, %c0_10] : memref<128x6xbf16, #tpu.memory_space<vmem>>, vector<128x6xbf16>
    %cst_11 = arith.constant dense<0.000000e+00> : vector<8x6xf32>
    %14 = tpu.matmul %12, %13, %cst_11 {dimension_numbers = #tpu.dot_dimension_numbers<[1], [0], [0], [1], [0, 0, 1, 1], [], []>} : vector<8x128xbf16>, vector<128x6xbf16>, vector<8x6xf32> -> vector<8x6xf32>
    %15 = arith.addf %11, %14 : vector<8x6xf32>
    %c0_12 = arith.constant 0 : index
    %c0_13 = arith.constant 0 : index
    %16 = vector.load %arg7[%c0_12, %c0_13] : memref<8x6xf32, #tpu.memory_space<vmem>>, vector<8x6xf32>
    tpu.vector_store %arg7[%c0_12, %c0_13], %15 {strides = array<i32>} : memref<8x6xf32, #tpu.memory_space<vmem>>, vector<8x6xf32>,
    %c3_i32 = arith.constant 3 : i32
    %17 = arith.cmpi eq, %arg0, %c3_i32 : i32
    %18 = arith.extui %17 : i1 to i32
    %c0_i32_14 = arith.constant 0 : i32
    %19 = arith.cmpi ne, %18, %c0_i32_14 : i32
    scf.if %19 {
      %c0_15 = arith.constant 0 : index
      %c0_16 = arith.constant 0 : index
      %20 = vector.load %arg7[%c0_15, %c0_16] : memref<8x6xf32, #tpu.memory_space<vmem>>, vector<8x6xf32>
      %c0_17 = arith.constant 0 : index
      %c0_18 = arith.constant 0 : index
      %21 = vector.load %arg5[%c0_17, %c0_18] : memref<1x6xf32, #tpu.memory_space<vmem>>, vector<1x6xf32>
      %22 = vector.broadcast %21 : vector<1x6xf32> to vector<8x6xf32>
      %23 = arith.addf %20, %22 : vector<8x6xf32>
      %c0_19 = arith.constant 0 : index
      %c0_20 = arith.constant 0 : index
      %24 = vector.load %arg6[%c0_19, %c0_20] : memref<8x6xf32, #tpu.memory_space<vmem>>, vector<8x6xf32>
      tpu.vector_store %arg6[%c0_19, %c0_20], %23 {strides = array<i32>} : memref<8x6xf32, #tpu.memory_space<vmem>>, vector<8x6xf32>,
    } else {
    }
    return
  }
  func.func @transform_0(%arg0: i32) -> (i32, i32) {
    %c0_i32 = arith.constant 0 : i32
    %c0_i32_0 = arith.constant 0 : i32
    %c0_i32_1 = arith.constant 0 : i32
    return %c0_i32, %c0_i32_0 : i32, i32
  }
  func.func @transform_1(%arg0: i32) -> (i32, i32) {
    %c0_i32 = arith.constant 0 : i32
    %c0_i32_0 = arith.constant 0 : i32
    return %c0_i32, %arg0 : i32, i32
  }
  func.func @transform_2(%arg0: i32) -> (i32, i32) {
    %c0_i32 = arith.constant 0 : i32
    %c0_i32_0 = arith.constant 0 : i32
    return %c0_i32, %arg0 : i32, i32
  }
  func.func @transform_3(%arg0: i32) -> (i32, i32) {
    %c0_i32 = arith.constant 0 : i32
    %c0_i32_0 = arith.constant 0 : i32
    return %arg0, %c0_i32 : i32, i32
  }
  func.func @transform_4(%arg0: i32) -> (i32, i32) {
    %c0_i32 = arith.constant 0 : i32
    %c0_i32_0 = arith.constant 0 : i32
    %c0_i32_1 = arith.constant 0 : i32
    return %c0_i32, %c0_i32_0 : i32, i32
  }
  func.func @transform_5(%arg0: i32) -> (i32, i32) {
    %c0_i32 = arith.constant 0 : i32
    %c0_i32_0 = arith.constant 0 : i32
    %c0_i32_1 = arith.constant 0 : i32
    return %c0_i32, %c0_i32_0 : i32, i32
  }
}

</mosaic_0001>

<bundles_post_ra>
// kernel: dqn_forward.4
= control target key start
LH: loop header
LB: loop body
LE: loop exit
PB: predicated region body
PF: predicated region fallthrough
CT: control target
= control target key end

     0   :  { %s893_s12 = smov 0   ;;  %s1035_s0 = inlined_call_operand.vmem [shape: bf16[768,256], index: 0, kind: input, shape index: {}]   ;;  %s1036_s1 = inlined_call_operand.vmem [shape: bf16[256,32], index: 1, kind: input, shape index: {}]   ;;  %s1037_s2 = inlined_call_operand.vmem [shape: f32[1,32], index: 2, kind: input, shape index: {}]   ;;  %s1038_s3 = inlined_call_operand.vmem [shape: bf16[768,32], index: 3, kind: output, shape index: {}]  }
   0x1 LB: > { %s659_s13 = sadd.s32 4294967295, %s871_s12   ;;  %p663_p0 = scmp.ge.s32.totalorder %s871_s12, 1  ;;  %s871_s12 = sphi %s893_s12, %s13_s12  }
   0x2   : > { %p139_p1 = scmp.lt.s32.totalorder %s871_s12, 7 }
   0x4   : > { %p140_p2 = pnand %p663_p0, %p139_p1 }
   0x5   : > { %v825_v0 = vld [vmem:[%s1036_s1 + $0x40] sm:$0xff] (!%p140_p2)   ;;  %s664_s16 = sshll.u32 (!%p140_p2), %s659_s13, 4  ;;  %v827_v2 = vld [vmem:[%s1036_s1 + $0x48] sm:$0xff] (!%p140_p2)   ;;  %v829_v4 = vld [vmem:[%s1036_s1 + $0x50] sm:$0xff] (!%p140_p2)   ;;  %vm586_vm0 = vcmask (!%p140_p2), 257024  }
   0x6   : > { %143 = sbr.rel (%p140_p2) target bundleno = 286 (0x11e), region = 32  ;;  %v826_v1 = vld [vmem:[%s1036_s1] sm:$0xff] (!%p140_p2)   ;;  %737 = vmatprep.subr.bf16.mxu0 (!%p140_p2), %v825_v0  ;;  %801 = vmatprep.subr.bf16.mxu1 (!%p140_p2), %v825_v0  ;;  %v828_v3 = vld [vmem:[%s1036_s1 + $0x8] sm:$0xff] (!%p140_p2)   ;;  %p165_p3 = scmp.lt.s32.totalorder (!%p140_p2), %s664_s16, 95  ;;  %v830_v5 = vld [vmem:[%s1036_s1 + $0x10] sm:$0xff] (!%p140_p2)  }
   0x7   : > { %738 = vmatpush3.bf16.msra.mxu0 (!%p140_p2), %v826_v1  ;;  %809 = vmatpush3.bf16.msra.mxu1 (!%p140_p2), %v826_v1  ;;  %v831_v6 = vld [vmem:[%s1036_s1 + $0x58] sm:$0xff] (!%p140_p2)   ;;  %v833_v8 = vld [vmem:[%s1036_s1 + $0x60] sm:$0xff] (!%p140_p2)   ;;  %v835_v10 = vld [vmem:[%s1036_s1 + $0x68] sm:$0xff] (!%p140_p2)  }
   0x8   : > { %739 = vmatprep.subr.bf16.mxu0 (!%p140_p2), %v827_v2  ;;  %802 = vmatprep.subr.bf16.mxu1 (!%p140_p2), %v827_v2  ;;  %v832_v7 = vld [vmem:[%s1036_s1 + $0x18] sm:$0xff] (!%p140_p2)   ;;  %v834_v9 = vld [vmem:[%s1036_s1 + $0x20] sm:$0xff] (!%p140_p2)   ;;  %v836_v13 = vld [vmem:[%s1036_s1 + $0x28] sm:$0xff] (!%p140_p2)  }
   0x9   : > { %v837_v14 = vld [vmem:[%s1036_s1 + $0x70] sm:$0xff] (!%p140_p2)   ;;  %v839_v16 = vld [vmem:[%s1036_s1 + $0x78] sm:$0xff] (!%p140_p2)   ;;  %v976_v34 = vld [vmem:[%s1037_s2] ss:$0 sm:$0xff] (!%p140_p2) }
   0xa   : > { %v838_v15 = vld [vmem:[%s1036_s1 + $0x30] sm:$0xff] (!%p140_p2)   ;;  %v840_v17 = vld [vmem:[%s1036_s1 + $0x38] sm:$0xff] (!%p140_p2)  }
   0xb   : > { %740 = vmatpush3.bf16.msra.mxu0 (!%p140_p2), %v828_v3  ;;  %810 = vmatpush3.bf16.msra.mxu1 (!%p140_p2), %v828_v3 }
   0xc   : > { %741 = vmatprep.subr.bf16.mxu0 (!%p140_p2), %v829_v4  ;;  %803 = vmatprep.subr.bf16.mxu1 (!%p140_p2), %v829_v4 }
   0xd   : > { %s1040_s16 = smov (!%p165_p3, %s664_s16), 95 }
   0xe   : > { %s720_s4 = sshll.u32 %s1040_s16, 3  ;;  %s668_s28 = sshll.u32 %s1040_s16, 2 }
   0xf   : > { %742 = vmatpush3.bf16.msra.mxu0 %v830_v5  ;;  %811 = vmatpush3.bf16.msra.mxu1 %v830_v5  ;;  %s934_s9 = scalar_lea.vmem %s1035_s0, %s720_s4  ;;  %s986_s4 = scalar_lea.vmem %s1038_s3, %s668_s28 }
  0x10   : > { %743 = vmatprep.subr.bf16.mxu0 %v831_v6  ;;  %804 = vmatprep.subr.bf16.mxu1 %v831_v6  ;;  %v843_v11 = vld [vmem:[%s934_s9 + $0x4] ss:$8 sps:$4 sm:$0xff]   ;;  %v841_v18 = vld [vmem:[%s934_s9] ss:$8 sps:$4 sm:$0xff]   ;;  %v847_v20 = vld [vmem:[%s934_s9 + $0x14] ss:$8 sps:$4 sm:$0xff]  }
  0x11   : > { %v846_v12 = vld [vmem:[%s934_s9 + $0x44] ss:$8 sps:$4 sm:$0xff]   ;;  %441 = vmatprep.mubr.bf16.mxu0 %v843_v11  ;;  %v844_v19 = vld [vmem:[%s934_s9 + $0x40] ss:$8 sps:$4 sm:$0xff]   ;;  %v849_v21 = vld [vmem:[%s934_s9 + $0x54] ss:$8 sps:$4 sm:$0xff]  }
  0x12   : > { %473 = vmatprep.mubr.bf16.mxu1 %v846_v12  ;;  %v851_v22 = vld [vmem:[%s934_s9 + $0x10] ss:$8 sps:$4 sm:$0xff]   ;;  %v853_v24 = vld [vmem:[%s934_s9 + $0x24] ss:$8 sps:$4 sm:$0xff]   ;;  %v857_v26 = vld [vmem:[%s934_s9 + $0x20] ss:$8 sps:$4 sm:$0xff]  }
  0x13   : > { %744 = vmatpush3.bf16.msra.mxu0 %v832_v7  ;;  %812 = vmatpush3.bf16.msra.mxu1 %v832_v7  ;;  %v852_v23 = vld [vmem:[%s934_s9 + $0x50] ss:$8 sps:$4 sm:$0xff]   ;;  %v855_v25 = vld [vmem:[%s934_s9 + $0x64] ss:$8 sps:$4 sm:$0xff]   ;;  %v858_v27 = vld [vmem:[%s934_s9 + $0x60] ss:$8 sps:$4 sm:$0xff]  }
  0x14   : > { %745 = vmatprep.subr.bf16.mxu0 %v833_v8  ;;  %805 = vmatprep.subr.bf16.mxu1 %v833_v8  ;;  %v859_v28 = vld [vmem:[%s934_s9 + $0x34] ss:$8 sps:$4 sm:$0xff]   ;;  %v863_v30 = vld [vmem:[%s934_s9 + $0x30] ss:$8 sps:$4 sm:$0xff]  }
  0x15   : > { %v861_v29 = vld [vmem:[%s934_s9 + $0x74] ss:$8 sps:$4 sm:$0xff]   ;;  %v864_v31 = vld [vmem:[%s934_s9 + $0x70] ss:$8 sps:$4 sm:$0xff]  }
  0x17   : > { %746 = vmatpush3.bf16.msra.mxu0 %v834_v9  ;;  %813 = vmatpush3.bf16.msra.mxu1 %v834_v9 }
  0x18   : > { %747 = vmatprep.subr.bf16.mxu0 %v835_v10  ;;  %806 = vmatprep.subr.bf16.mxu1 %v835_v10 }
  0x1b   : > { %748 = vmatpush3.bf16.msra.mxu0 %v836_v13  ;;  %814 = vmatpush3.bf16.msra.mxu1 %v836_v13 }
  0x1c   : > { %749 = vmatprep.subr.bf16.mxu0 %v837_v14  ;;  %807 = vmatprep.subr.bf16.mxu1 %v837_v14 }
  0x1f   : > { %750 = vmatpush3.bf16.msra.mxu0 %v838_v15  ;;  %815 = vmatpush3.bf16.msra.mxu1 %v838_v15 }
  0x20   : > { %751 = vmatprep.subr.bf16.mxu0 %v839_v16  ;;  %808 = vmatprep.subr.bf16.mxu1 %v839_v16 }
  0x23   : > { %752 = vmatpush3.bf16.msra.mxu0 %v840_v17  ;;  %816 = vmatpush3.bf16.msra.mxu1 %v840_v17 }
  0x26   : > { %442 = vmatmul.mubr.bf16.vlgmr.msra.gmra.mrb[0].mxu0 %v841_v18  ;;  %474 = vmatmul.mubr.bf16.vlgmr.msra.gmra.mrb[0].mxu1 %v844_v19 }
  0x27   : > { %449 = vmatprep.mubr.bf16.mxu0 %v847_v20  ;;  %481 = vmatprep.mubr.bf16.mxu1 %v849_v21 }
  0x2e   : > { %450 = vmatmul.mubr.bf16.gmra.mrb[4].mxu0 %v851_v22  ;;  %482 = vmatmul.mubr.bf16.gmra.mrb[4].mxu1 %v852_v23 }
  0x2f   : > { %457 = vmatprep.mubr.bf16.mxu0 %v853_v24  ;;  %489 = vmatprep.mubr.bf16.mxu1 %v855_v25 }
  0x36   : > { %458 = vmatmul.mubr.bf16.gmra.mrb[8].mxu0 %v857_v26  ;;  %490 = vmatmul.mubr.bf16.gmra.mrb[8].mxu1 %v858_v27 }
  0x37   : > { %465 = vmatprep.mubr.bf16.mxu0 %v859_v28  ;;  %497 = vmatprep.mubr.bf16.mxu1 %v861_v29 }
  0x3e   : > { %466 = vmatmul.mubr.bf16.gmra.mrb[12].mxu0 %v863_v30  ;;  %498 = vmatmul.mubr.bf16.gmra.mrb[12].mxu1 %v864_v31 }
  0xf9   : > { %v753_v32 = vpop.f32.mrb[0].mxu0  ;;  %v777_v33 = vpop.f32.mrb[0].mxu1 }
  0xfa   : > { %v754_v35 = vpop.f32.mrb[1].mxu0  ;;  %v778_v36 = vpop.f32.mrb[1].mxu1 }
  0xfb   : > { %v755_v37 = vadd.f32 %v754_v35, %v753_v32  ;;  %v779_v38 = vadd.f32 %v778_v36, %v777_v33  ;;  %v756_v39 = vpop.f32.mrb[2].mxu0  ;;  %v780_v40 = vpop.f32.mrb[2].mxu1 }
  0xfc   : > { %v757_v41 = vpop.f32.mrb[3].mxu0  ;;  %v781_v42 = vpop.f32.mrb[3].mxu1 }
  0xfd   : > { %v444_v43 = vadd.f32 %v755_v37, %v976_v34  ;;  %v476_v44 = vadd.f32 %v779_v38, %v976_v34  ;;  %v758_v45 = vadd.f32 %v757_v41, %v756_v39  ;;  %v782_v46 = vadd.f32 %v781_v42, %v780_v40 }
  0xff   : > { %v506_v47 = vmax.f32 %v444_v43, 0.0  ;;  %v514_v48 = vmax.f32 %v476_v44, 0.0  ;;  %v447_v49 = vadd.f32 %v758_v45, %v976_v34  ;;  %v479_v50 = vadd.f32 %v782_v46, %v976_v34 }
 0x101   : > { %v721_v51 = vpack.c.bf16 %v506_v47, %v506_v47  ;;  %v729_v52 = vpack.c.bf16 %v514_v48, %v514_v48  ;;  %v507_v53 = vmax.f32 %v447_v49, 0.0  ;;  %v515_v54 = vmax.f32 %v479_v50, 0.0  ;;  %v759_v55 = vpop.f32.mrb[4].mxu0  ;;  %v783_v56 = vpop.f32.mrb[4].mxu1 }
 0x102   : > { %v760_v57 = vpop.f32.mrb[5].mxu0  ;;  %v784_v58 = vpop.f32.mrb[5].mxu1 }
 0x103   : > { %587 = vst.msk [vmem:[%s986_s4] sm:$0xf] %vm586_vm0, %v721_v51  ;;  %595 = vst.msk [vmem:[%s986_s4 + $0x20] sm:$0xf] %vm586_vm0, %v729_v52  ;;  %v722_v59 = vpack.c.bf16 %v507_v53, %v507_v53  ;;  %v730_v60 = vpack.c.bf16 %v515_v54, %v515_v54  ;;  %v761_v61 = vadd.f32 %v760_v57, %v759_v55  ;;  %v762_v63 = vpop.f32.mrb[6].mxu0  ;;  %v786_v0 = vpop.f32.mrb[6].mxu1 }
 0x104   : > { %v785_v62 = vadd.f32 %v784_v58, %v783_v56  ;;  %v763_v1 = vpop.f32.mrb[7].mxu0  ;;  %v787_v2 = vpop.f32.mrb[7].mxu1 }
 0x105   : > { %588 = vst.msk [vmem:[%s986_s4 + $0x4] sm:$0xf] %vm586_vm0, %v722_v59  ;;  %596 = vst.msk [vmem:[%s986_s4 + $0x24] sm:$0xf] %vm586_vm0, %v730_v60  ;;  %v452_v3 = vadd.f32 %v761_v61, %v976_v34  ;;  %v764_v5 = vadd.f32 %v763_v1, %v762_v63  ;;  %v788_v6 = vadd.f32 %v787_v2, %v786_v0 }
 0x106   : > { %v484_v4 = vadd.f32 %v785_v62, %v976_v34 }
 0x107   : > { %v508_v7 = vmax.f32 %v452_v3, 0.0  ;;  %v455_v9 = vadd.f32 %v764_v5, %v976_v34  ;;  %v487_v10 = vadd.f32 %v788_v6, %v976_v34 }
 0x108   : > { %v516_v8 = vmax.f32 %v484_v4, 0.0 }
 0x109   : > { %v723_v11 = vpack.c.bf16 %v508_v7, %v508_v7  ;;  %v509_v13 = vmax.f32 %v455_v9, 0.0  ;;  %v517_v14 = vmax.f32 %v487_v10, 0.0  ;;  %v765_v15 = vpop.f32.mrb[8].mxu0  ;;  %v789_v16 = vpop.f32.mrb[8].mxu1 }
 0x10a   : > { %v731_v12 = vpack.c.bf16 %v516_v8, %v516_v8  ;;  %v766_v17 = vpop.f32.mrb[9].mxu0  ;;  %v790_v18 = vpop.f32.mrb[9].mxu1 }
 0x10b   : > { %589 = vst.msk [vmem:[%s986_s4 + $0x8] sm:$0xf] %vm586_vm0, %v723_v11  ;;  %v724_v19 = vpack.c.bf16 %v509_v13, %v509_v13  ;;  %v732_v20 = vpack.c.bf16 %v517_v14, %v517_v14  ;;  %v767_v21 = vadd.f32 %v766_v17, %v765_v15  ;;  %v791_v22 = vadd.f32 %v790_v18, %v789_v16  ;;  %v768_v23 = vpop.f32.mrb[10].mxu0  ;;  %v792_v24 = vpop.f32.mrb[10].mxu1 }
 0x10c   : > { %597 = vst.msk [vmem:[%s986_s4 + $0x28] sm:$0xf] %vm586_vm0, %v731_v12  ;;  %v769_v25 = vpop.f32.mrb[11].mxu0  ;;  %v793_v26 = vpop.f32.mrb[11].mxu1 }
 0x10d   : > { %590 = vst.msk [vmem:[%s986_s4 + $0xc] sm:$0xf] %vm586_vm0, %v724_v19  ;;  %598 = vst.msk [vmem:[%s986_s4 + $0x2c] sm:$0xf] %vm586_vm0, %v732_v20  ;;  %v460_v27 = vadd.f32 %v767_v21, %v976_v34  ;;  %v492_v28 = vadd.f32 %v791_v22, %v976_v34  ;;  %v770_v29 = vadd.f32 %v769_v25, %v768_v23 }
 0x10e   : > { %v794_v30 = vadd.f32 %v793_v26, %v792_v24 }
 0x10f   : > { %v510_v31 = vmax.f32 %v460_v27, 0.0  ;;  %v518_v32 = vmax.f32 %v492_v28, 0.0  ;;  %v463_v33 = vadd.f32 %v770_v29, %v976_v34 }
 0x110   : > { %v495_v35 = vadd.f32 %v794_v30, %v976_v34 }
 0x111   : > { %v725_v36 = vpack.c.bf16 %v510_v31, %v510_v31  ;;  %v733_v37 = vpack.c.bf16 %v518_v32, %v518_v32  ;;  %v511_v38 = vmax.f32 %v463_v33, 0.0  ;;  %v771_v40 = vpop.f32.mrb[12].mxu0  ;;  %v795_v41 = vpop.f32.mrb[12].mxu1 }
 0x112   : > { %v519_v39 = vmax.f32 %v495_v35, 0.0  ;;  %v772_v42 = vpop.f32.mrb[13].mxu0  ;;  %v796_v43 = vpop.f32.mrb[13].mxu1 }
 0x113   : > { %591 = vst.msk [vmem:[%s986_s4 + $0x10] sm:$0xf] %vm586_vm0, %v725_v36  ;;  %599 = vst.msk [vmem:[%s986_s4 + $0x30] sm:$0xf] %vm586_vm0, %v733_v37  ;;  %v726_v44 = vpack.c.bf16 %v511_v38, %v511_v38  ;;  %v773_v46 = vadd.f32 %v772_v42, %v771_v40  ;;  %v797_v47 = vadd.f32 %v796_v43, %v795_v41  ;;  %v774_v48 = vpop.f32.mrb[14].mxu0  ;;  %v798_v49 = vpop.f32.mrb[14].mxu1 }
 0x114   : > { %v734_v45 = vpack.c.bf16 %v519_v39, %v519_v39  ;;  %v775_v50 = vpop.f32.mrb[15].mxu0  ;;  %v799_v51 = vpop.f32.mrb[15].mxu1 }
 0x115   : > { %592 = vst.msk [vmem:[%s986_s4 + $0x14] sm:$0xf] %vm586_vm0, %v726_v44  ;;  %v468_v52 = vadd.f32 %v773_v46, %v976_v34  ;;  %v500_v53 = vadd.f32 %v797_v47, %v976_v34  ;;  %v776_v54 = vadd.f32 %v775_v50, %v774_v48  ;;  %v800_v55 = vadd.f32 %v799_v51, %v798_v49 }
 0x116   : > { %600 = vst.msk [vmem:[%s986_s4 + $0x34] sm:$0xf] %vm586_vm0, %v734_v45 }
 0x117   : > { %v512_v56 = vmax.f32 %v468_v52, 0.0  ;;  %v520_v57 = vmax.f32 %v500_v53, 0.0  ;;  %v471_v58 = vadd.f32 %v776_v54, %v976_v34  ;;  %v503_v59 = vadd.f32 %v800_v55, %v976_v34 }
 0x119   : > { %v727_v60 = vpack.c.bf16 %v512_v56, %v512_v56  ;;  %v735_v61 = vpack.c.bf16 %v520_v57, %v520_v57  ;;  %v513_v62 = vmax.f32 %v471_v58, 0.0  ;;  %v521_v63 = vmax.f32 %v503_v59, 0.0 }
 0x11b   : > { %593 = vst.msk [vmem:[%s986_s4 + $0x18] sm:$0xf] %vm586_vm0, %v727_v60  ;;  %601 = vst.msk [vmem:[%s986_s4 + $0x38] sm:$0xf] %vm586_vm0, %v735_v61  ;;  %v728_v0 = vpack.c.bf16 %v513_v62, %v513_v62  ;;  %v736_v1 = vpack.c.bf16 %v521_v63, %v521_v63 }
 0x11d   : > { %594 = vst.msk [vmem:[%s986_s4 + $0x1c] sm:$0xf] %vm586_vm0, %v728_v0  ;;  %602 = vst.msk [vmem:[%s986_s4 + $0x3c] sm:$0xf] %vm586_vm0, %v736_v1 }
 0x11e PF: > { %s13_s12 = sadd.s32 1, %s871_s12  }
 0x11f   : > { %p10_p4 = scmp.ge.s32.totalorder %s13_s12, 8  }
 0x121   :  { %12 = sbr.rel (!%p10_p4) target bundleno = 1 (0x1), region = 62 }

// kernel: dqn_forward.5
= control target key start
LH: loop header
LB: loop body
LE: loop exit
PB: predicated region body
PF: predicated region fallthrough
CT: control target
= control target key end

     0   :  { %s1022_s12 = smov 0   ;;  %s1190_s0 = inlined_call_operand.vmem [shape: bf16[128,512], index: 0, kind: input, shape index: {}]   ;;  %s1191_s1 = inlined_call_operand.vmem [shape: bf16[512,64], index: 1, kind: input, shape index: {}]   ;;  %s1192_s2 = inlined_call_operand.vmem [shape: f32[1,64], index: 2, kind: input, shape index: {}]   ;;  %s1193_s3 = inlined_call_operand.vmem [shape: bf16[128,64], index: 3, kind: output, shape index: {}]  }
   0x1 LB: > { %s772_s13 = sadd.s32 4294967295, %s1000_s12   ;;  %p776_p0 = scmp.ge.s32.totalorder %s1000_s12, 1  ;;  %s1000_s12 = sphi %s1022_s12, %s13_s12  }
   0x2   : > { %p139_p1 = scmp.lt.s32.totalorder %s1000_s12, 3 }
   0x4   : > { %p140_p2 = pnand %p776_p0, %p139_p1 }
   0x5   : > { %v938_v0 = vld [vmem:[%s1191_s1 + $0x40] sm:$0xff] (!%p140_p2)   ;;  %v942_v4 = vld [vmem:[%s1191_s1 + $0x48] sm:$0xff] (!%p140_p2)   ;;  %v946_v8 = vld [vmem:[%s1191_s1 + $0x50] sm:$0xff] (!%p140_p2)   ;;  %s777_s21 = sshll.u32 (!%p140_p2), %s772_s13, 3  ;;  %vm707_vm0 = vcmask (!%p140_p2), 519168  }
   0x6   : > { %143 = sbr.rel (%p140_p2) target bundleno = 289 (0x121), region = 32  ;;  %v939_v1 = vld [vmem:[%s1191_s1 + $0xc0] sm:$0xff] (!%p140_p2)   ;;  %850 = vmatprep.subr.bf16.mxu0 (!%p140_p2), %v938_v0  ;;  %v943_v5 = vld [vmem:[%s1191_s1 + $0xc8] sm:$0xff] (!%p140_p2)   ;;  %v947_v9 = vld [vmem:[%s1191_s1 + $0xd0] sm:$0xff] (!%p140_p2)   ;;  %p165_p3 = scmp.lt.s32.totalorder (!%p140_p2), %s777_s21, 15 }
   0x7   : > { %v940_v2 = vld [vmem:[%s1191_s1] sm:$0xff] (!%p140_p2)   ;;  %890 = vmatprep.subr.bf16.mxu1 (!%p140_p2), %v939_v1  ;;  %v944_v6 = vld [vmem:[%s1191_s1 + $0x8] sm:$0xff] (!%p140_p2)   ;;  %v948_v10 = vld [vmem:[%s1191_s1 + $0x10] sm:$0xff] (!%p140_p2)  }
   0x8   : > { %v941_v3 = vld [vmem:[%s1191_s1 + $0x80] sm:$0xff] (!%p140_p2)   ;;  %851 = vmatpush3.bf16.msra.mxu0 (!%p140_p2), %v940_v2  ;;  %v945_v7 = vld [vmem:[%s1191_s1 + $0x88] sm:$0xff] (!%p140_p2)   ;;  %v949_v11 = vld [vmem:[%s1191_s1 + $0x90] sm:$0xff] (!%p140_p2)  }
   0x9   : > { %891 = vmatpush3.bf16.msra.mxu1 (!%p140_p2), %v941_v3  ;;  %852 = vmatprep.subr.bf16.mxu0 (!%p140_p2), %v942_v4  ;;  %v950_v12 = vld [vmem:[%s1191_s1 + $0x58] sm:$0xff] (!%p140_p2)   ;;  %v954_v16 = vld [vmem:[%s1191_s1 + $0x60] sm:$0xff] (!%p140_p2)   ;;  %v958_v20 = vld [vmem:[%s1191_s1 + $0x68] sm:$0xff] (!%p140_p2)  }
   0xa   : > { %892 = vmatprep.subr.bf16.mxu1 (!%p140_p2), %v943_v5  ;;  %v951_v13 = vld [vmem:[%s1191_s1 + $0xd8] sm:$0xff] (!%p140_p2)   ;;  %v955_v17 = vld [vmem:[%s1191_s1 + $0xe0] sm:$0xff] (!%p140_p2)   ;;  %v959_v21 = vld [vmem:[%s1191_s1 + $0xe8] sm:$0xff] (!%p140_p2)  }
   0xb   : > { %v952_v14 = vld [vmem:[%s1191_s1 + $0x18] sm:$0xff] (!%p140_p2)   ;;  %v956_v18 = vld [vmem:[%s1191_s1 + $0x20] sm:$0xff] (!%p140_p2)   ;;  %v960_v22 = vld [vmem:[%s1191_s1 + $0x28] sm:$0xff] (!%p140_p2)  }
   0xc   : > { %853 = vmatpush3.bf16.msra.mxu0 (!%p140_p2), %v944_v6  ;;  %v953_v15 = vld [vmem:[%s1191_s1 + $0x98] sm:$0xff] (!%p140_p2)   ;;  %v957_v19 = vld [vmem:[%s1191_s1 + $0xa0] sm:$0xff] (!%p140_p2)   ;;  %v961_v23 = vld [vmem:[%s1191_s1 + $0xa8] sm:$0xff] (!%p140_p2)  }
   0xd   : > { %893 = vmatpush3.bf16.msra.mxu1 %v945_v7  ;;  %854 = vmatprep.subr.bf16.mxu0 %v946_v8  ;;  %s1195_s21 = smov (!%p165_p3, %s777_s21), 15  ;;  %v962_v24 = vld [vmem:[%s1191_s1 + $0x70] sm:$0xff]   ;;  %v966_v28 = vld [vmem:[%s1191_s1 + $0x78] sm:$0xff]   ;;  %v1155_v50 = vld [vmem:[%s1192_s2] ss:$0 sm:$0xff] }
   0xe   : > { %894 = vmatprep.subr.bf16.mxu1 %v947_v9  ;;  %v963_v25 = vld [vmem:[%s1191_s1 + $0xf0] sm:$0xff]   ;;  %s841_s18 = sshll.u32 %s1195_s21, 4  ;;  %v967_v29 = vld [vmem:[%s1191_s1 + $0xf8] sm:$0xff]   ;;  %s781_s7 = sshll.u32 %s1195_s21, 2 }
   0xf   : > { %v964_v26 = vld [vmem:[%s1191_s1 + $0x30] sm:$0xff]   ;;  %s1128_s28 = scalar_lea.vmem %s1190_s0, %s841_s18  ;;  %v968_v30 = vld [vmem:[%s1191_s1 + $0x38] sm:$0xff]   ;;  %s1163_s10 = scalar_lea.vmem %s1193_s3, %s781_s7 }
  0x10   : > { %855 = vmatpush3.bf16.msra.mxu0 %v948_v10  ;;  %v965_v27 = vld [vmem:[%s1191_s1 + $0xb0] sm:$0xff]   ;;  %v969_v31 = vld [vmem:[%s1191_s1 + $0xb8] sm:$0xff]  }
  0x11   : > { %895 = vmatpush3.bf16.msra.mxu1 %v949_v11  ;;  %856 = vmatprep.subr.bf16.mxu0 %v950_v12  ;;  %v970_v32 = vld [vmem:[%s1128_s28] ss:$16 sps:$4 sm:$0xff]   ;;  %v972_v33 = vld [vmem:[%s1128_s28 + $0x4] ss:$16 sps:$4 sm:$0xff]   ;;  %v973_v34 = vld [vmem:[%s1128_s28 + $0x8] ss:$16 sps:$4 sm:$0xff]  }
  0x12   : > { %896 = vmatprep.subr.bf16.mxu1 %v951_v13  ;;  %v975_v35 = vld [vmem:[%s1128_s28 + $0xc] ss:$16 sps:$4 sm:$0xff]   ;;  %569 = vmatprep.mubr.bf16.mxu0 %v972_v33  ;;  %v976_v36 = vld [vmem:[%s1128_s28 + $0x24] ss:$16 sps:$4 sm:$0xff]   ;;  %v980_v38 = vld [vmem:[%s1128_s28 + $0x20] ss:$16 sps:$4 sm:$0xff]  }
  0x13   : > { %634 = vmatprep.mubr.bf16.mxu1 %v975_v35  ;;  %v978_v37 = vld [vmem:[%s1128_s28 + $0x2c] ss:$16 sps:$4 sm:$0xff]   ;;  %v981_v39 = vld [vmem:[%s1128_s28 + $0x28] ss:$16 sps:$4 sm:$0xff]   ;;  %v982_v40 = vld [vmem:[%s1128_s28 + $0x44] ss:$16 sps:$4 sm:$0xff]  }
  0x14   : > { %857 = vmatpush3.bf16.msra.mxu0 %v952_v14  ;;  %v984_v41 = vld [vmem:[%s1128_s28 + $0x4c] ss:$16 sps:$4 sm:$0xff]   ;;  %v986_v42 = vld [vmem:[%s1128_s28 + $0x40] ss:$16 sps:$4 sm:$0xff]   ;;  %v987_v43 = vld [vmem:[%s1128_s28 + $0x48] ss:$16 sps:$4 sm:$0xff]  }
  0x15   : > { %897 = vmatpush3.bf16.msra.mxu1 %v953_v15  ;;  %858 = vmatprep.subr.bf16.mxu0 %v954_v16  ;;  %v988_v44 = vld [vmem:[%s1128_s28 + $0x64] ss:$16 sps:$4 sm:$0xff]   ;;  %v990_v45 = vld [vmem:[%s1128_s28 + $0x6c] ss:$16 sps:$4 sm:$0xff]   ;;  %v992_v46 = vld [vmem:[%s1128_s28 + $0x60] ss:$16 sps:$4 sm:$0xff]  }
  0x16   : > { %898 = vmatprep.subr.bf16.mxu1 %v955_v17  ;;  %v993_v47 = vld [vmem:[%s1128_s28 + $0x68] ss:$16 sps:$4 sm:$0xff]  }
  0x18   : > { %859 = vmatpush3.bf16.msra.mxu0 %v956_v18 }
  0x19   : > { %899 = vmatpush3.bf16.msra.mxu1 %v957_v19  ;;  %860 = vmatprep.subr.bf16.mxu0 %v958_v20 }
  0x1a   : > { %900 = vmatprep.subr.bf16.mxu1 %v959_v21 }
  0x1c   : > { %861 = vmatpush3.bf16.msra.mxu0 %v960_v22 }
  0x1d   : > { %901 = vmatpush3.bf16.msra.mxu1 %v961_v23  ;;  %862 = vmatprep.subr.bf16.mxu0 %v962_v24 }
  0x1e   : > { %902 = vmatprep.subr.bf16.mxu1 %v963_v25 }
  0x20   : > { %863 = vmatpush3.bf16.msra.mxu0 %v964_v26 }
  0x21   : > { %903 = vmatpush3.bf16.msra.mxu1 %v965_v27  ;;  %864 = vmatprep.subr.bf16.mxu0 %v966_v28 }
  0x22   : > { %904 = vmatprep.subr.bf16.mxu1 %v967_v29 }
  0x24   : > { %865 = vmatpush3.bf16.msra.mxu0 %v968_v30 }
  0x25   : > { %905 = vmatpush3.bf16.msra.mxu1 %v969_v31 }
  0x27   : > { %570 = vmatmul.mubr.bf16.vlgmr.msra.gmra.mrb[0].mxu0 %v970_v32 }
  0x28   : > { %635 = vmatmul.mubr.bf16.vlgmr.msra.gmra.mrb[0].mxu1 %v973_v34  ;;  %577 = vmatprep.mubr.bf16.mxu0 %v976_v36 }
  0x29   : > { %642 = vmatprep.mubr.bf16.mxu1 %v978_v37 }
  0x2f   : > { %578 = vmatmul.mubr.bf16.gmra.mrb[4].mxu0 %v980_v38 }
  0x30   : > { %643 = vmatmul.mubr.bf16.gmra.mrb[4].mxu1 %v981_v39  ;;  %585 = vmatprep.mubr.bf16.mxu0 %v982_v40 }
  0x31   : > { %650 = vmatprep.mubr.bf16.mxu1 %v984_v41 }
  0x37   : > { %586 = vmatmul.mubr.bf16.gmra.mrb[8].mxu0 %v986_v42 }
  0x38   : > { %651 = vmatmul.mubr.bf16.gmra.mrb[8].mxu1 %v987_v43  ;;  %593 = vmatprep.mubr.bf16.mxu0 %v988_v44 }
  0x39   : > { %658 = vmatprep.mubr.bf16.mxu1 %v990_v45 }
  0x3f   : > { %594 = vmatmul.mubr.bf16.gmra.mrb[12].mxu0 %v992_v46 }
  0x40   : > { %659 = vmatmul.mubr.bf16.gmra.mrb[12].mxu1 %v993_v47 }
  0xfa   : > { %v866_v48 = vpop.f32.mrb[0].mxu0 }
  0xfb   : > { %v906_v49 = vpop.f32.mrb[0].mxu1  ;;  %v867_v51 = vpop.f32.mrb[1].mxu0 }
  0xfc   : > { %v868_v52 = vadd.f32 %v867_v51, %v866_v48  ;;  %v907_v53 = vpop.f32.mrb[1].mxu1  ;;  %v869_v54 = vpop.f32.mrb[2].mxu0 }
  0xfd   : > { %v908_v55 = vadd.f32 %v907_v53, %v906_v49  ;;  %v909_v56 = vpop.f32.mrb[2].mxu1  ;;  %v870_v57 = vpop.f32.mrb[3].mxu0 }
  0xfe   : > { %v572_v58 = vadd.f32 %v868_v52, %v1155_v50  ;;  %v871_v59 = vadd.f32 %v870_v57, %v869_v54  ;;  %v910_v60 = vpop.f32.mrb[3].mxu1 }
  0xff   : > { %v911_v61 = vadd.f32 %v910_v60, %v909_v56 }
 0x100   : > { %v637_v62 = vadd.f32 %v908_v55, %v572_v58  ;;  %v575_v63 = vadd.f32 %v871_v59, %v1155_v50 }
 0x102   : > { %v667_v0 = vmax.f32 %v637_v62, 0.0  ;;  %v640_v1 = vadd.f32 %v911_v61, %v575_v63  ;;  %v872_v2 = vpop.f32.mrb[4].mxu0 }
 0x103   : > { %v912_v3 = vpop.f32.mrb[4].mxu1  ;;  %v873_v4 = vpop.f32.mrb[5].mxu0 }
 0x104   : > { %v842_v5 = vpack.c.bf16 %v667_v0, %v667_v0  ;;  %v668_v6 = vmax.f32 %v640_v1, 0.0  ;;  %v874_v7 = vadd.f32 %v873_v4, %v872_v2  ;;  %v913_v8 = vpop.f32.mrb[5].mxu1  ;;  %v875_v9 = vpop.f32.mrb[6].mxu0 }
 0x105   : > { %v914_v10 = vadd.f32 %v913_v8, %v912_v3  ;;  %v915_v11 = vpop.f32.mrb[6].mxu1  ;;  %v876_v12 = vpop.f32.mrb[7].mxu0 }
 0x106   : > { %708 = vst.msk [vmem:[%s1163_s10] sm:$0xf] %vm707_vm0, %v842_v5  ;;  %v843_v13 = vpack.c.bf16 %v668_v6, %v668_v6  ;;  %v580_v14 = vadd.f32 %v874_v7, %v1155_v50  ;;  %v877_v15 = vadd.f32 %v876_v12, %v875_v9  ;;  %v916_v16 = vpop.f32.mrb[7].mxu1 }
 0x107   : > { %v917_v17 = vadd.f32 %v916_v16, %v915_v11 }
 0x108   : > { %709 = vst.msk [vmem:[%s1163_s10 + $0x4] sm:$0xf] %vm707_vm0, %v843_v13  ;;  %v645_v18 = vadd.f32 %v914_v10, %v580_v14  ;;  %v583_v19 = vadd.f32 %v877_v15, %v1155_v50 }
 0x10a   : > { %v669_v20 = vmax.f32 %v645_v18, 0.0  ;;  %v648_v21 = vadd.f32 %v917_v17, %v583_v19  ;;  %v878_v22 = vpop.f32.mrb[8].mxu0 }
 0x10b   : > { %v918_v23 = vpop.f32.mrb[8].mxu1  ;;  %v879_v24 = vpop.f32.mrb[9].mxu0 }
 0x10c   : > { %v844_v25 = vpack.c.bf16 %v669_v20, %v669_v20  ;;  %v670_v26 = vmax.f32 %v648_v21, 0.0  ;;  %v880_v27 = vadd.f32 %v879_v24, %v878_v22  ;;  %v919_v28 = vpop.f32.mrb[9].mxu1  ;;  %v881_v29 = vpop.f32.mrb[10].mxu0 }
 0x10d   : > { %v920_v30 = vadd.f32 %v919_v28, %v918_v23  ;;  %v921_v31 = vpop.f32.mrb[10].mxu1  ;;  %v882_v32 = vpop.f32.mrb[11].mxu0 }
 0x10e   : > { %710 = vst.msk [vmem:[%s1163_s10 + $0x8] sm:$0xf] %vm707_vm0, %v844_v25  ;;  %v845_v33 = vpack.c.bf16 %v670_v26, %v670_v26  ;;  %v588_v34 = vadd.f32 %v880_v27, %v1155_v50  ;;  %v883_v35 = vadd.f32 %v882_v32, %v881_v29  ;;  %v922_v36 = vpop.f32.mrb[11].mxu1 }
 0x10f   : > { %v923_v37 = vadd.f32 %v922_v36, %v921_v31 }
 0x110   : > { %711 = vst.msk [vmem:[%s1163_s10 + $0xc] sm:$0xf] %vm707_vm0, %v845_v33  ;;  %v653_v38 = vadd.f32 %v920_v30, %v588_v34  ;;  %v591_v39 = vadd.f32 %v883_v35, %v1155_v50 }
 0x112   : > { %v671_v40 = vmax.f32 %v653_v38, 0.0  ;;  %v656_v41 = vadd.f32 %v923_v37, %v591_v39  ;;  %v884_v42 = vpop.f32.mrb[12].mxu0 }
 0x113   : > { %v924_v43 = vpop.f32.mrb[12].mxu1  ;;  %v885_v44 = vpop.f32.mrb[13].mxu0 }
 0x114   : > { %v846_v45 = vpack.c.bf16 %v671_v40, %v671_v40  ;;  %v672_v46 = vmax.f32 %v656_v41, 0.0  ;;  %v886_v47 = vadd.f32 %v885_v44, %v884_v42  ;;  %v925_v48 = vpop.f32.mrb[13].mxu1  ;;  %v887_v49 = vpop.f32.mrb[14].mxu0 }
 0x115   : > { %v926_v51 = vadd.f32 %v925_v48, %v924_v43  ;;  %v927_v52 = vpop.f32.mrb[14].mxu1  ;;  %v888_v53 = vpop.f32.mrb[15].mxu0 }
 0x116   : > { %712 = vst.msk [vmem:[%s1163_s10 + $0x10] sm:$0xf] %vm707_vm0, %v846_v45  ;;  %v847_v54 = vpack.c.bf16 %v672_v46, %v672_v46  ;;  %v596_v55 = vadd.f32 %v886_v47, %v1155_v50  ;;  %v889_v56 = vadd.f32 %v888_v53, %v887_v49  ;;  %v928_v57 = vpop.f32.mrb[15].mxu1 }
 0x117   : > { %v929_v58 = vadd.f32 %v928_v57, %v927_v52 }
 0x118   : > { %713 = vst.msk [vmem:[%s1163_s10 + $0x14] sm:$0xf] %vm707_vm0, %v847_v54  ;;  %v661_v59 = vadd.f32 %v926_v51, %v596_v55  ;;  %v599_v60 = vadd.f32 %v889_v56, %v1155_v50 }
 0x11a   : > { %v673_v61 = vmax.f32 %v661_v59, 0.0  ;;  %v664_v62 = vadd.f32 %v929_v58, %v599_v60 }
 0x11c   : > { %v848_v63 = vpack.c.bf16 %v673_v61, %v673_v61  ;;  %v674_v0 = vmax.f32 %v664_v62, 0.0 }
 0x11e   : > { %714 = vst.msk [vmem:[%s1163_s10 + $0x18] sm:$0xf] %vm707_vm0, %v848_v63  ;;  %v849_v1 = vpack.c.bf16 %v674_v0, %v674_v0 }
 0x120   : > { %715 = vst.msk [vmem:[%s1163_s10 + $0x1c] sm:$0xf] %vm707_vm0, %v849_v1 }
 0x121 PF: > { %s13_s12 = sadd.s32 1, %s1000_s12  }
 0x122   : > { %p10_p4 = scmp.ge.s32.totalorder %s13_s12, 4  }
 0x124   :  { %12 = sbr.rel (!%p10_p4) target bundleno = 1 (0x1), region = 62 }

// kernel: dqn_forward.6
= control target key start
LH: loop header
LB: loop body
LE: loop exit
PB: predicated region body
PF: predicated region fallthrough
CT: control target
= control target key end

     0   :  { %s1117_s12 = smov 0   ;;  %s1274_s0 = inlined_call_operand.vmem [shape: bf16[96,576], index: 0, kind: input, shape index: {}]   ;;  %s1275_s1 = inlined_call_operand.vmem [shape: bf16[576,64], index: 1, kind: input, shape index: {}]   ;;  %s1276_s2 = inlined_call_operand.vmem [shape: f32[1,64], index: 2, kind: input, shape index: {}]   ;;  %s1277_s3 = inlined_call_operand.vmem [shape: bf16[96,64], index: 3, kind: output, shape index: {}]  }
   0x1 LB: > { %s840_s13 = sadd.s32 4294967295, %s1093_s12   ;;  %p844_p0 = scmp.ge.s32.totalorder %s1093_s12, 1  ;;  %s1093_s12 = sphi %s1117_s12, %s13_s12  }
   0x2   : > { %p139_p1 = scmp.lt.s32.totalorder %s1093_s12, 3 }
   0x4   : > { %p140_p2 = pnand %p844_p0, %p139_p1 }
   0x5   : > { %v1030_v0 = vld [vmem:[%s1275_s1 + $0x40] sm:$0xff] (!%p140_p2)   ;;  %v1034_v4 = vld [vmem:[%s1275_s1 + $0x48] sm:$0xff] (!%p140_p2)   ;;  %v1038_v8 = vld [vmem:[%s1275_s1 + $0x50] sm:$0xff] (!%p140_p2)   ;;  %s164_s17 = smul.u32 (!%p140_p2), 6, %s840_s13  ;;  %v1095_v34 = vmov (!%p140_p2), 0.0   ;;  %vm1096_vm0 = vmmov (!%p140_p2), 0  }
   0x6   : > { %143 = sbr.rel (%p140_p2) target bundleno = 293 (0x125), region = 32  ;;  %v1031_v1 = vld [vmem:[%s1275_s1 + $0xc0] sm:$0xff] (!%p140_p2)   ;;  %916 = vmatprep.subr.bf16.mxu0 (!%p140_p2), %v1030_v0  ;;  %v1035_v5 = vld [vmem:[%s1275_s1 + $0xc8] sm:$0xff] (!%p140_p2)   ;;  %v1039_v9 = vld [vmem:[%s1275_s1 + $0xd0] sm:$0xff] (!%p140_p2)   ;;  %vm566_vm1 = vcmask (!%p140_p2), 523264   ;;  %vm777_vm2 = vcmask (!%p140_p2), 519168  }
   0x7   : > { %v1032_v2 = vld [vmem:[%s1275_s1] sm:$0xff] (!%p140_p2)   ;;  %950 = vmatprep.subr.bf16.mxu1 (!%p140_p2), %v1031_v1  ;;  %v1036_v6 = vld [vmem:[%s1275_s1 + $0x8] sm:$0xff] (!%p140_p2)   ;;  %v1040_v10 = vld [vmem:[%s1275_s1 + $0x10] sm:$0xff] (!%p140_p2)   ;;  %p165_p3 = scmp.lt.s32.totalorder (!%p140_p2), %s164_s17, 11 }
   0x8   : > { %v1033_v3 = vld [vmem:[%s1275_s1 + $0x80] sm:$0xff] (!%p140_p2)   ;;  %917 = vmatpush3.bf16.msra.mxu0 (!%p140_p2), %v1032_v2  ;;  %v1037_v7 = vld [vmem:[%s1275_s1 + $0x88] sm:$0xff] (!%p140_p2)   ;;  %v1041_v11 = vld [vmem:[%s1275_s1 + $0x90] sm:$0xff] (!%p140_p2)  }
   0x9   : > { %951 = vmatpush3.bf16.msra.mxu1 (!%p140_p2), %v1033_v3  ;;  %918 = vmatprep.subr.bf16.mxu0 (!%p140_p2), %v1034_v4  ;;  %v1042_v12 = vld [vmem:[%s1275_s1 + $0x58] sm:$0xff] (!%p140_p2)   ;;  %v1046_v16 = vld [vmem:[%s1275_s1 + $0x60] sm:$0xff] (!%p140_p2)   ;;  %v1050_v20 = vld [vmem:[%s1275_s1 + $0x68] sm:$0xff] (!%p140_p2)  }
   0xa   : > { %952 = vmatprep.subr.bf16.mxu1 (!%p140_p2), %v1035_v5  ;;  %v1043_v13 = vld [vmem:[%s1275_s1 + $0xd8] sm:$0xff] (!%p140_p2)   ;;  %v1047_v17 = vld [vmem:[%s1275_s1 + $0xe0] sm:$0xff] (!%p140_p2)   ;;  %v1051_v21 = vld [vmem:[%s1275_s1 + $0xe8] sm:$0xff] (!%p140_p2)  }
   0xb   : > { %v1044_v14 = vld [vmem:[%s1275_s1 + $0x18] sm:$0xff] (!%p140_p2)   ;;  %v1048_v18 = vld [vmem:[%s1275_s1 + $0x20] sm:$0xff] (!%p140_p2)   ;;  %v1052_v22 = vld [vmem:[%s1275_s1 + $0x28] sm:$0xff] (!%p140_p2)  }
   0xc   : > { %919 = vmatpush3.bf16.msra.mxu0 (!%p140_p2), %v1036_v6  ;;  %v1045_v15 = vld [vmem:[%s1275_s1 + $0x98] sm:$0xff] (!%p140_p2)   ;;  %v1049_v19 = vld [vmem:[%s1275_s1 + $0xa0] sm:$0xff] (!%p140_p2)   ;;  %v1053_v23 = vld [vmem:[%s1275_s1 + $0xa8] sm:$0xff] (!%p140_p2)  }
   0xd   : > { %953 = vmatpush3.bf16.msra.mxu1 %v1037_v7  ;;  %920 = vmatprep.subr.bf16.mxu0 %v1038_v8  ;;  %s1279_s17 = smov (!%p165_p3, %s164_s17), 11  ;;  %v1054_v24 = vld [vmem:[%s1275_s1 + $0x70] sm:$0xff]   ;;  %v1058_v28 = vld [vmem:[%s1275_s1 + $0x78] sm:$0xff]   ;;  %v1068_v37 = vld [vmem:[%s1275_s1 + $0x100] sm:$0xff]  }
   0xe   : > { %954 = vmatprep.subr.bf16.mxu1 %v1039_v9  ;;  %v1055_v25 = vld [vmem:[%s1275_s1 + $0xf0] sm:$0xff]   ;;  %s1019_s16 = smul.u32 20, %s1279_s17  ;;  %v1059_v29 = vld [vmem:[%s1275_s1 + $0xf8] sm:$0xff]   ;;  %v1073_v40 = vld [vmem:[%s1275_s1 + $0x108] sm:$0xff]   ;;  %s846_s18 = sshll.u32 %s1279_s17, 2 }
   0xf   : > { %v1056_v26 = vld [vmem:[%s1275_s1 + $0x30] sm:$0xff]   ;;  %v1060_v30 = vld [vmem:[%s1275_s1 + $0x38] sm:$0xff]   ;;  %v847_v54 = vld [vmem:[%s1276_s2] ss:$0 sm:$0xff]  ;;  %s175_s21 = scalar_lea.vmem %s1277_s3, %s846_s18 }
  0x10   : > { %921 = vmatpush3.bf16.msra.mxu0 %v1040_v10  ;;  %v1057_v27 = vld [vmem:[%s1275_s1 + $0xb0] sm:$0xff]   ;;  %s1223_s27 = scalar_lea.vmem %s1274_s0, %s1019_s16  ;;  %v1061_v31 = vld [vmem:[%s1275_s1 + $0xb8] sm:$0xff]  }
  0x11   : > { %955 = vmatpush3.bf16.msra.mxu1 %v1041_v11  ;;  %922 = vmatprep.subr.bf16.mxu0 %v1042_v12  ;;  %v1062_v32 = vld [vmem:[%s1223_s27] ss:$20 sps:$4 sm:$0xff]   ;;  %v1064_v33 = vld [vmem:[%s1223_s27 + $0x4] ss:$20 sps:$4 sm:$0xff]   ;;  %v1065_v35 = vld [vmem:[%s1223_s27 + $0x8] ss:$20 sps:$4 sm:$0xff]  }
  0x12   : > { %956 = vmatprep.subr.bf16.mxu1 %v1043_v13  ;;  %v1067_v36 = vld [vmem:[%s1223_s27 + $0xc] ss:$20 sps:$4 sm:$0xff]   ;;  %608 = vmatprep.mubr.bf16.mxu0 %v1064_v33  ;;  %v1071_v39 = vld [vmem:[%s1223_s27 + $0x34] ss:$20 sps:$4 sm:$0xff]   ;;  %v1075_v42 = vld [vmem:[%s1223_s27 + $0x30] ss:$20 sps:$4 sm:$0xff]  }
  0x13   : > { %665 = vmatprep.mubr.bf16.mxu1 %v1067_v36  ;;  %v1069_v38 = vld [vmem:[%s1223_s27 + $0x2c] ss:$20 sps:$4 sm:$0xff]   ;;  %v1074_v41 = vld [vmem:[%s1223_s27 + $0x28] ss:$20 sps:$4 sm:$0xff]   ;;  %v1076_v44 = vld [vmem:[%s1275_s1 + $0x110] sm:$0xff]  }
  0x14   : > { %923 = vmatpush3.bf16.msra.mxu0 %v1044_v14  ;;  %v1077_v43 = vld [vmem:[%s1223_s27 + $0x54] ss:$20 sps:$4 sm:$0xff]   ;;  %v1079_v45 = vld [vmem:[%s1223_s27 + $0x5c] ss:$20 sps:$4 sm:$0xff]   ;;  %v1082_v48 = vld [vmem:[%s1223_s27 + $0x58] ss:$20 sps:$4 sm:$0xff]  }
  0x15   : > { %957 = vmatpush3.bf16.msra.mxu1 %v1045_v15  ;;  %924 = vmatprep.subr.bf16.mxu0 %v1046_v16  ;;  %v1083_v46 = vld [vmem:[%s1275_s1 + $0x118] sm:$0xff]   ;;  %v1081_v47 = vld [vmem:[%s1223_s27 + $0x50] ss:$20 sps:$4 sm:$0xff]   ;;  %v1086_v51 = vld [vmem:[%s1223_s27 + $0x60] ss:$20 sps:$4 sm:$0xff]  }
  0x16   : > { %958 = vmatprep.subr.bf16.mxu1 %v1047_v17  ;;  %v1084_v49 = vld [vmem:[%s1223_s27 + $0x10] ss:$20 sps:$4 sm:$0xff]   ;;  %v1085_v50 = vld [vmem:[%s1223_s27 + $0x38] ss:$20 sps:$4 sm:$0xff]  }
  0x18   : > { %925 = vmatpush3.bf16.msra.mxu0 %v1048_v18 }
  0x19   : > { %959 = vmatpush3.bf16.msra.mxu1 %v1049_v19  ;;  %926 = vmatprep.subr.bf16.mxu0 %v1050_v20 }
  0x1a   : > { %960 = vmatprep.subr.bf16.mxu1 %v1051_v21 }
  0x1c   : > { %927 = vmatpush3.bf16.msra.mxu0 %v1052_v22 }
  0x1d   : > { %961 = vmatpush3.bf16.msra.mxu1 %v1053_v23  ;;  %928 = vmatprep.subr.bf16.mxu0 %v1054_v24 }
  0x1e   : > { %962 = vmatprep.subr.bf16.mxu1 %v1055_v25 }
  0x20   : > { %929 = vmatpush3.bf16.msra.mxu0 %v1056_v26 }
  0x21   : > { %963 = vmatpush3.bf16.msra.mxu1 %v1057_v27  ;;  %930 = vmatprep.subr.bf16.mxu0 %v1058_v28 }
  0x22   : > { %964 = vmatprep.subr.bf16.mxu1 %v1059_v29 }
  0x24   : > { %931 = vmatpush3.bf16.msra.mxu0 %v1060_v30 }
  0x25   : > { %965 = vmatpush3.bf16.msra.mxu1 %v1061_v31  ;;  %991 = vmatprep.subr.bf16.mxu0 %v1095_v34 }
  0x26   : > { %1011 = vmatprep.subr.bf16.mxu1 %v1095_v34 }
  0x27   : > { %609 = vmatmul.mubr.bf16.vlgmr.msra.gmra.mrb[0].mxu0 %v1062_v32 }
  0x28   : > { %666 = vmatmul.mubr.bf16.vlgmr.msra.gmra.mrb[0].mxu1 %v1065_v35  ;;  %992 = vmatpush3.bf16.msra.mxu0 %v1068_v37 }
  0x29   : > { %1015 = vmatpush3.bf16.msra.mxu1 %v1068_v37  ;;  %616 = vmatprep.mubr.bf16.mxu0 %v1069_v38 }
  0x2a   : > { %1012 = vmatprep.subr.bf16.mxu1 %v1095_v34  ;;  %673 = vmatprep.mubr.bf16.mxu1 %v1071_v39 }
  0x2b   : > { %993 = vmatprep.subr.bf16.mxu0 %v1095_v34 }
  0x2c   : > { %994 = vmatpush3.bf16.msra.mxu0 %v1073_v40 }
  0x2d   : > { %1016 = vmatpush3.bf16.msra.mxu1 %v1073_v40  ;;  %995 = vmatprep.subr.bf16.mxu0 %v1095_v34 }
  0x2e   : > { %1013 = vmatprep.subr.bf16.mxu1 %v1095_v34 }
  0x2f   : > { %617 = vmatmul.mubr.bf16.gmra.mrb[4].mxu0 %v1074_v41 }
  0x30   : > { %674 = vmatmul.mubr.bf16.gmra.mrb[4].mxu1 %v1075_v42  ;;  %624 = vmatprep.mubr.bf16.mxu0 %v1077_v43 }
  0x31   : > { %1017 = vmatpush3.bf16.msra.mxu1 %v1076_v44  ;;  %681 = vmatprep.mubr.bf16.mxu1 %v1079_v45 }
  0x32   : > { %996 = vmatpush3.bf16.msra.mxu0 %v1076_v44  ;;  %1014 = vmatprep.subr.bf16.mxu1 %v1095_v34 }
  0x33   : > { %997 = vmatprep.subr.bf16.mxu0 %v1095_v34 }
  0x35   : > { %1018 = vmatpush3.bf16.msra.mxu1 %v1083_v46 }
  0x36   : > { %998 = vmatpush3.bf16.msra.mxu0 %v1083_v46 }
  0x37   : > { %625 = vmatmul.mubr.bf16.gmra.mrb[8].mxu0 %v1081_v47 }
  0x38   : > { %682 = vmatmul.mubr.bf16.gmra.mrb[8].mxu1 %v1082_v48  ;;  %999 = vmatprep.mubr.msk.bf16.mxu0 %vm1096_vm0, %v1095_v34 }
  0x39   : > { %1003 = vmatprep.mubr.msk.bf16.mxu1 %vm1096_vm0, %v1095_v34 }
  0x3f   : > { %1000 = vmatmul.mubr.msk.bf16.vlgmr.msra.gmra.mrb[12].mxu0 %vm566_vm1, %v1084_v49 }
  0x40   : > { %1004 = vmatmul.mubr.msk.bf16.vlgmr.msra.gmra.mrb[12].mxu1 %vm566_vm1, %v1085_v50 }
  0x41   : > { %1007 = vmatprep.mubr.msk.bf16.mxu1 %vm1096_vm0, %v1095_v34 }
  0x48   : > { %1008 = vmatmul.mubr.msk.bf16.gmra.mrb[16].mxu1 %vm566_vm1, %v1086_v51 }
  0xfa   : > { %v932_v52 = vpop.f32.mrb[0].mxu0 }
  0xfb   : > { %v966_v53 = vpop.f32.mrb[0].mxu1  ;;  %v933_v55 = vpop.f32.mrb[1].mxu0 }
  0xfc   : > { %v934_v56 = vadd.f32 %v933_v55, %v932_v52  ;;  %v967_v57 = vpop.f32.mrb[1].mxu1  ;;  %v935_v58 = vpop.f32.mrb[2].mxu0 }
  0xfd   : > { %v968_v59 = vadd.f32 %v967_v57, %v966_v53  ;;  %v969_v60 = vpop.f32.mrb[2].mxu1  ;;  %v936_v61 = vpop.f32.mrb[3].mxu0 }
  0xfe   : > { %v611_v62 = vadd.f32 %v934_v56, %v847_v54  ;;  %v937_v63 = vadd.f32 %v936_v61, %v935_v58  ;;  %v970_v0 = vpop.f32.mrb[3].mxu1 }
  0xff   : > { %v971_v1 = vadd.f32 %v970_v0, %v969_v60 }
 0x100   : > { %v614_v2 = vadd.f32 %v937_v63, %v847_v54  ;;  %v668_v3 = vadd.f32 %v968_v59, %v611_v62 }
 0x102   : > { %v938_v4 = vpop.f32.mrb[4].mxu0  ;;  %v671_v5 = vadd.f32 %v971_v1, %v614_v2 }
 0x103   : > { %v972_v6 = vpop.f32.mrb[4].mxu1  ;;  %v939_v7 = vpop.f32.mrb[5].mxu0 }
 0x104   : > { %v940_v8 = vadd.f32 %v939_v7, %v938_v4  ;;  %v973_v9 = vpop.f32.mrb[5].mxu1  ;;  %v941_v10 = vpop.f32.mrb[6].mxu0 }
 0x105   : > { %v974_v11 = vadd.f32 %v973_v9, %v972_v6  ;;  %v975_v12 = vpop.f32.mrb[6].mxu1  ;;  %v942_v13 = vpop.f32.mrb[7].mxu0 }
 0x106   : > { %v619_v14 = vadd.f32 %v940_v8, %v847_v54  ;;  %v943_v15 = vadd.f32 %v942_v13, %v941_v10  ;;  %v976_v16 = vpop.f32.mrb[7].mxu1 }
 0x107   : > { %v977_v17 = vadd.f32 %v976_v16, %v975_v12 }
 0x108   : > { %v622_v18 = vadd.f32 %v943_v15, %v847_v54  ;;  %v676_v19 = vadd.f32 %v974_v11, %v619_v14 }
 0x10a   : > { %v944_v20 = vpop.f32.mrb[8].mxu0  ;;  %v679_v21 = vadd.f32 %v977_v17, %v622_v18 }
 0x10b   : > { %v978_v22 = vpop.f32.mrb[8].mxu1  ;;  %v945_v23 = vpop.f32.mrb[9].mxu0 }
 0x10c   : > { %v946_v24 = vadd.f32 %v945_v23, %v944_v20  ;;  %v979_v25 = vpop.f32.mrb[9].mxu1  ;;  %v947_v26 = vpop.f32.mrb[10].mxu0 }
 0x10d   : > { %v980_v27 = vadd.f32 %v979_v25, %v978_v22  ;;  %v981_v28 = vpop.f32.mrb[10].mxu1  ;;  %v948_v29 = vpop.f32.mrb[11].mxu0 }
 0x10e   : > { %v627_v30 = vadd.f32 %v946_v24, %v847_v54  ;;  %v949_v31 = vadd.f32 %v948_v29, %v947_v26  ;;  %v982_v32 = vpop.f32.mrb[11].mxu1 }
 0x10f   : > { %v983_v33 = vadd.f32 %v982_v32, %v981_v28 }
 0x110   : > { %v630_v34 = vadd.f32 %v949_v31, %v847_v54  ;;  %v684_v35 = vadd.f32 %v980_v27, %v627_v30 }
 0x112   : > { %v724_v36 = vpop.f32.mrb[12].mxu0  ;;  %v687_v37 = vadd.f32 %v983_v33, %v630_v34 }
 0x113   : > { %v725_v38 = vadd.f32 %v724_v36, %v668_v3  ;;  %v732_v39 = vpop.f32.mrb[12].mxu1  ;;  %v1001_v40 = vpop.f32.mrb[13].mxu0 }
 0x114   : > { %v733_v41 = vadd.f32 %v732_v39, %v676_v19  ;;  %v1005_v42 = vpop.f32.mrb[13].mxu1  ;;  %v727_v43 = vpop.f32.mrb[14].mxu0 }
 0x115   : > { %v747_v44 = vmax.f32 %v725_v38, 0.0  ;;  %v728_v45 = vadd.f32 %v727_v43, %v671_v5  ;;  %v735_v46 = vpop.f32.mrb[14].mxu1  ;;  %v1002_v47 = vpop.f32.mrb[15].mxu0 }
 0x116   : > { %v749_v48 = vmax.f32 %v733_v41, 0.0  ;;  %v736_v49 = vadd.f32 %v735_v46, %v679_v21  ;;  %v1006_v50 = vpop.f32.mrb[15].mxu1 }
 0x117   : > { %v910_v51 = vpack.c.bf16 %v747_v44, %v747_v44  ;;  %v748_v52 = vmax.f32 %v728_v45, 0.0 }
 0x118   : > { %v912_v53 = vpack.c.bf16 %v749_v48, %v749_v48  ;;  %v750_v54 = vmax.f32 %v736_v49, 0.0 }
 0x119   : > { %778 = vst.msk [vmem:[%s175_s21] sm:$0xf] %vm777_vm2, %v910_v51  ;;  %v911_v55 = vpack.c.bf16 %v748_v52, %v748_v52 }
 0x11a   : > { %780 = vst.msk [vmem:[%s175_s21 + $0x8] sm:$0xf] %vm777_vm2, %v912_v53  ;;  %v913_v56 = vpack.c.bf16 %v750_v54, %v750_v54 }
 0x11b   : > { %779 = vst.msk [vmem:[%s175_s21 + $0x4] sm:$0xf] %vm777_vm2, %v911_v55  ;;  %v740_v57 = vpop.f32.mrb[16].mxu1 }
 0x11c   : > { %781 = vst.msk [vmem:[%s175_s21 + $0xc] sm:$0xf] %vm777_vm2, %v913_v56  ;;  %v741_v58 = vadd.f32 %v740_v57, %v684_v35  ;;  %v1009_v59 = vpop.f32.mrb[17].mxu1 }
 0x11d   : > { %v743_v60 = vpop.f32.mrb[18].mxu1 }
 0x11e   : > { %v751_v61 = vmax.f32 %v741_v58, 0.0  ;;  %v744_v62 = vadd.f32 %v743_v60, %v687_v37  ;;  %v1010_v63 = vpop.f32.mrb[19].mxu1 }
 0x120   : > { %v914_v0 = vpack.c.bf16 %v751_v61, %v751_v61  ;;  %v752_v1 = vmax.f32 %v744_v62, 0.0 }
 0x122   : > { %782 = vst.msk [vmem:[%s175_s21 + $0x10] sm:$0xf] %vm777_vm2, %v914_v0  ;;  %v915_v2 = vpack.c.bf16 %v752_v1, %v752_v1 }
 0x124   : > { %783 = vst.msk [vmem:[%s175_s21 + $0x14] sm:$0xf] %vm777_vm2, %v915_v2 }
 0x125 PF: > { %s13_s12 = sadd.s32 1, %s1093_s12  }
 0x126   : > { %p10_p4 = scmp.ge.s32.totalorder %s13_s12, 4  }
 0x128   :  { %12 = sbr.rel (!%p10_p4) target bundleno = 1 (0x1), region = 62 }

// kernel: dqn_forward.7
= control target key start
LH: loop header
LB: loop body
LE: loop exit
PB: predicated region body
PF: predicated region fallthrough
CT: control target
= control target key end

     0   :  { %s3878_s18 = smov 0   ;;  %s3880_s19 = smov 0   ;;  %s4715_s0 = inlined_call_operand.vmem [shape: bf16[8,2304], index: 0, kind: input, shape index: {}]   ;;  %s4716_s1 = inlined_call_operand.vmem [shape: bf16[2304,512], index: 1, kind: input, shape index: {}]   ;;  %s4717_s2 = inlined_call_operand.vmem [shape: f32[1,512], index: 2, kind: input, shape index: {}]   ;;  %s4718_s3 = inlined_call_operand.vmem [shape: bf16[512,6], index: 3, kind: input, shape index: {}]   ;;  %s4719_s4 = inlined_call_operand.vmem [shape: f32[1,6], index: 4, kind: input, shape index: {}]   ;;  %s4720_s5 = inlined_call_operand.vmem [shape: f32[8,6], index: 5, kind: output, shape index: {}]  }
   0x1   :  { %s3882_s20 = smov 0  }
   0x2 LB: > { %s3894_s21 = sadd.s32 4294967295, %s3843_s20   ;;  %s3897_s22 = sadd.s32 1, %s3843_s20   ;;  %s3843_s20 = sphi %s3882_s20, %s4723_s20   ;;  %s3839_s19 = sphi %s3880_s19, %s4722_s19   ;;  %s3835_s18 = sphi %s3878_s18, %s4721_s18  }
   0x3   : > { %s40_s23 = ssub.s32 %s3843_s20, %s3897_s22  ;;  %s43_s24 = sadd.s32 1, %s3839_s19 }
   0x4   : > { %p41_p0 = scmp.eq.s32.totalorder %s40_s23, 0  ;;  %p50_p1 = scmp.ne.s32.totalorder %s3839_s19, %s3835_s18 }
   0x5   : > { %p51_p2 = scmp.eq.s32.totalorder %s3843_s20, 0  ;;  %p3214_p4 = scmp.ge.s32.totalorder %s3843_s20, 4 }
   0x6   : > { %s3906_s25 = scalar_select %p41_p0, %s3839_s19, %s43_s24  }
   0x7   : > { %p52_p3 = por %p51_p2, %p50_p1  ;;  %176 = sbr.rel (%p3214_p4) target bundleno = 210 (0xd2), region = 24 }
   0xe   : > { %179 = sbr.rel (!%p52_p3) target bundleno = 210 (0xd2), region = 28  ;;  %s181_s26 = sand.u32 (%p52_p3), 1, %s3839_s19  }
   0xf   : > { %s3215_s27 = sshll.u32 (%p52_p3), %s3843_s20, 2  ;;  %s3622_s28 = smul.u32 (%p52_p3), 1152, %s181_s26 }
  0x10   : > { %s3914_s6 = scalar_lea.vmem (%p52_p3), %s4716_s1, %s3215_s27 }
  0x11   : > { %v201_v0 = vld [vmem:[%s3914_s6] sm:$0xf] (%p52_p3)  ;;  %v203_v1 = vld [vmem:[%s3914_s6 + $0x10] sm:$0xf] (%p52_p3)  ;;  %s3921_s7 = scalar_lea.vmem (%p52_p3), [#allocation3], %s3622_s28 }
  0x12   : > { %v205_v2 = vld [vmem:[%s3914_s6 + $0x20] sm:$0xf] (%p52_p3)  ;;  %v207_v3 = vld [vmem:[%s3914_s6 + $0x30] sm:$0xf] (%p52_p3)  ;;  %202 = vst [vmem:[%s3921_s7] sm:$0xf] (%p52_p3), %v201_v0 }
  0x13   : > { %v209_v4 = vld [vmem:[%s3914_s6 + $0x40] sm:$0xf] (%p52_p3)  ;;  %204 = vst [vmem:[%s3921_s7 + $0x4] sm:$0xf] (%p52_p3), %v203_v1  ;;  %206 = vst [vmem:[%s3921_s7 + $0x8] sm:$0xf] (%p52_p3), %v205_v2 }
  0x14   : > { %208 = vst [vmem:[%s3921_s7 + $0xc] sm:$0xf] (%p52_p3), %v207_v3  ;;  %210 = vst [vmem:[%s3921_s7 + $0x10] sm:$0xf] (%p52_p3), %v209_v4  ;;  %v211_v5 = vld [vmem:[%s3914_s6 + $0x50] sm:$0xf] (%p52_p3) }
  0x15   : > { %v213_v6 = vld [vmem:[%s3914_s6 + $0x60] sm:$0xf]  ;;  %v215_v7 = vld [vmem:[%s3914_s6 + $0x70] sm:$0xf]  ;;  %212 = vst [vmem:[%s3921_s7 + $0x14] sm:$0xf] %v211_v5 }
  0x16   : > { %214 = vst [vmem:[%s3921_s7 + $0x18] sm:$0xf] %v213_v6  ;;  %216 = vst [vmem:[%s3921_s7 + $0x1c] sm:$0xf] %v215_v7  ;;  %v217_v8 = vld [vmem:[%s3914_s6 + $0x80] sm:$0xf] }
  0x17   : > { %v219_v9 = vld [vmem:[%s3914_s6 + $0x90] sm:$0xf]  ;;  %v221_v10 = vld [vmem:[%s3914_s6 + $0xa0] sm:$0xf]  ;;  %218 = vst [vmem:[%s3921_s7 + $0x20] sm:$0xf] %v217_v8 }
  0x18   : > { %220 = vst [vmem:[%s3921_s7 + $0x24] sm:$0xf] %v219_v9  ;;  %222 = vst [vmem:[%s3921_s7 + $0x28] sm:$0xf] %v221_v10  ;;  %v223_v11 = vld [vmem:[%s3914_s6 + $0xb0] sm:$0xf] }
  0x19   : > { %v225_v12 = vld [vmem:[%s3914_s6 + $0xc0] sm:$0xf]  ;;  %v227_v13 = vld [vmem:[%s3914_s6 + $0xd0] sm:$0xf]  ;;  %224 = vst [vmem:[%s3921_s7 + $0x2c] sm:$0xf] %v223_v11 }
  0x1a   : > { %226 = vst [vmem:[%s3921_s7 + $0x30] sm:$0xf] %v225_v12  ;;  %228 = vst [vmem:[%s3921_s7 + $0x34] sm:$0xf] %v227_v13  ;;  %v229_v14 = vld [vmem:[%s3914_s6 + $0xe0] sm:$0xf] }
  0x1b   : > { %v231_v15 = vld [vmem:[%s3914_s6 + $0xf0] sm:$0xf]  ;;  %v233_v16 = vld [vmem:[%s3914_s6 + $0x100] sm:$0xf]  ;;  %230 = vst [vmem:[%s3921_s7 + $0x38] sm:$0xf] %v229_v14 }
  0x1c   : > { %232 = vst [vmem:[%s3921_s7 + $0x3c] sm:$0xf] %v231_v15  ;;  %234 = vst [vmem:[%s3921_s7 + $0x40] sm:$0xf] %v233_v16  ;;  %v235_v17 = vld [vmem:[%s3914_s6 + $0x110] sm:$0xf] }
  0x1d   : > { %v237_v18 = vld [vmem:[%s3914_s6 + $0x120] sm:$0xf]  ;;  %v239_v19 = vld [vmem:[%s3914_s6 + $0x130] sm:$0xf]  ;;  %236 = vst [vmem:[%s3921_s7 + $0x44] sm:$0xf] %v235_v17 }
  0x1e   : > { %238 = vst [vmem:[%s3921_s7 + $0x48] sm:$0xf] %v237_v18  ;;  %240 = vst [vmem:[%s3921_s7 + $0x4c] sm:$0xf] %v239_v19  ;;  %v241_v20 = vld [vmem:[%s3914_s6 + $0x140] sm:$0xf] }
  0x1f   : > { %v243_v21 = vld [vmem:[%s3914_s6 + $0x150] sm:$0xf]  ;;  %v245_v22 = vld [vmem:[%s3914_s6 + $0x160] sm:$0xf]  ;;  %242 = vst [vmem:[%s3921_s7 + $0x50] sm:$0xf] %v241_v20 }
  0x20   : > { %244 = vst [vmem:[%s3921_s7 + $0x54] sm:$0xf] %v243_v21  ;;  %246 = vst [vmem:[%s3921_s7 + $0x58] sm:$0xf] %v245_v22  ;;  %v247_v23 = vld [vmem:[%s3914_s6 + $0x170] sm:$0xf] }
  0x21   : > { %v249_v24 = vld [vmem:[%s3914_s6 + $0x180] sm:$0xf]  ;;  %v251_v25 = vld [vmem:[%s3914_s6 + $0x190] sm:$0xf]  ;;  %248 = vst [vmem:[%s3921_s7 + $0x5c] sm:$0xf] %v247_v23 }
  0x22   : > { %250 = vst [vmem:[%s3921_s7 + $0x60] sm:$0xf] %v249_v24  ;;  %252 = vst [vmem:[%s3921_s7 + $0x64] sm:$0xf] %v251_v25  ;;  %v253_v26 = vld [vmem:[%s3914_s6 + $0x1a0] sm:$0xf] }
  0x23   : > { %v255_v27 = vld [vmem:[%s3914_s6 + $0x1b0] sm:$0xf]  ;;  %v257_v28 = vld [vmem:[%s3914_s6 + $0x1c0] sm:$0xf]  ;;  %254 = vst [vmem:[%s3921_s7 + $0x68] sm:$0xf] %v253_v26 }
  0x24   : > { %256 = vst [vmem:[%s3921_s7 + $0x6c] sm:$0xf] %v255_v27  ;;  %258 = vst [vmem:[%s3921_s7 + $0x70] sm:$0xf] %v257_v28  ;;  %v259_v29 = vld [vmem:[%s3914_s6 + $0x1d0] sm:$0xf] }
  0x25   : > { %v261_v30 = vld [vmem:[%s3914_s6 + $0x1e0] sm:$0xf]  ;;  %v263_v31 = vld [vmem:[%s3914_s6 + $0x1f0] sm:$0xf]  ;;  %260 = vst [vmem:[%s3921_s7 + $0x74] sm:$0xf] %v259_v29 }
  0x26   : > { %262 = vst [vmem:[%s3921_s7 + $0x78] sm:$0xf] %v261_v30  ;;  %264 = vst [vmem:[%s3921_s7 + $0x7c] sm:$0xf] %v263_v31  ;;  %v265_v32 = vld [vmem:[%s3914_s6 + $0x200] sm:$0xf] }
  0x27   : > { %v267_v33 = vld [vmem:[%s3914_s6 + $0x210] sm:$0xf]  ;;  %v269_v34 = vld [vmem:[%s3914_s6 + $0x220] sm:$0xf]  ;;  %266 = vst [vmem:[%s3921_s7 + $0x80] sm:$0xf] %v265_v32 }
  0x28   : > { %268 = vst [vmem:[%s3921_s7 + $0x84] sm:$0xf] %v267_v33  ;;  %270 = vst [vmem:[%s3921_s7 + $0x88] sm:$0xf] %v269_v34  ;;  %v271_v35 = vld [vmem:[%s3914_s6 + $0x230] sm:$0xf] }
  0x29   : > { %v273_v36 = vld [vmem:[%s3914_s6 + $0x240] sm:$0xf]  ;;  %v275_v37 = vld [vmem:[%s3914_s6 + $0x250] sm:$0xf]  ;;  %272 = vst [vmem:[%s3921_s7 + $0x8c] sm:$0xf] %v271_v35 }
  0x2a   : > { %274 = vst [vmem:[%s3921_s7 + $0x90] sm:$0xf] %v273_v36  ;;  %276 = vst [vmem:[%s3921_s7 + $0x94] sm:$0xf] %v275_v37  ;;  %v277_v38 = vld [vmem:[%s3914_s6 + $0x260] sm:$0xf] }
  0x2b   : > { %v279_v39 = vld [vmem:[%s3914_s6 + $0x270] sm:$0xf]  ;;  %v281_v40 = vld [vmem:[%s3914_s6 + $0x280] sm:$0xf]  ;;  %278 = vst [vmem:[%s3921_s7 + $0x98] sm:$0xf] %v277_v38 }
  0x2c   : > { %280 = vst [vmem:[%s3921_s7 + $0x9c] sm:$0xf] %v279_v39  ;;  %282 = vst [vmem:[%s3921_s7 + $0xa0] sm:$0xf] %v281_v40  ;;  %v283_v41 = vld [vmem:[%s3914_s6 + $0x290] sm:$0xf] }
  0x2d   : > { %v285_v42 = vld [vmem:[%s3914_s6 + $0x2a0] sm:$0xf]  ;;  %v287_v43 = vld [vmem:[%s3914_s6 + $0x2b0] sm:$0xf]  ;;  %284 = vst [vmem:[%s3921_s7 + $0xa4] sm:$0xf] %v283_v41 }
  0x2e   : > { %286 = vst [vmem:[%s3921_s7 + $0xa8] sm:$0xf] %v285_v42  ;;  %288 = vst [vmem:[%s3921_s7 + $0xac] sm:$0xf] %v287_v43  ;;  %v289_v44 = vld [vmem:[%s3914_s6 + $0x2c0] sm:$0xf] }
  0x2f   : > { %v291_v45 = vld [vmem:[%s3914_s6 + $0x2d0] sm:$0xf]  ;;  %v293_v46 = vld [vmem:[%s3914_s6 + $0x2e0] sm:$0xf]  ;;  %290 = vst [vmem:[%s3921_s7 + $0xb0] sm:$0xf] %v289_v44 }
  0x30   : > { %292 = vst [vmem:[%s3921_s7 + $0xb4] sm:$0xf] %v291_v45  ;;  %294 = vst [vmem:[%s3921_s7 + $0xb8] sm:$0xf] %v293_v46  ;;  %v295_v47 = vld [vmem:[%s3914_s6 + $0x2f0] sm:$0xf] }
  0x31   : > { %v297_v48 = vld [vmem:[%s3914_s6 + $0x300] sm:$0xf]  ;;  %v299_v49 = vld [vmem:[%s3914_s6 + $0x310] sm:$0xf]  ;;  %296 = vst [vmem:[%s3921_s7 + $0xbc] sm:$0xf] %v295_v47 }
  0x32   : > { %298 = vst [vmem:[%s3921_s7 + $0xc0] sm:$0xf] %v297_v48  ;;  %300 = vst [vmem:[%s3921_s7 + $0xc4] sm:$0xf] %v299_v49  ;;  %v301_v50 = vld [vmem:[%s3914_s6 + $0x320] sm:$0xf] }
  0x33   : > { %v303_v51 = vld [vmem:[%s3914_s6 + $0x330] sm:$0xf]  ;;  %v305_v52 = vld [vmem:[%s3914_s6 + $0x340] sm:$0xf]  ;;  %302 = vst [vmem:[%s3921_s7 + $0xc8] sm:$0xf] %v301_v50 }
  0x34   : > { %304 = vst [vmem:[%s3921_s7 + $0xcc] sm:$0xf] %v303_v51  ;;  %306 = vst [vmem:[%s3921_s7 + $0xd0] sm:$0xf] %v305_v52  ;;  %v307_v53 = vld [vmem:[%s3914_s6 + $0x350] sm:$0xf] }
  0x35   : > { %v309_v54 = vld [vmem:[%s3914_s6 + $0x360] sm:$0xf]  ;;  %v311_v55 = vld [vmem:[%s3914_s6 + $0x370] sm:$0xf]  ;;  %308 = vst [vmem:[%s3921_s7 + $0xd4] sm:$0xf] %v307_v53 }
  0x36   : > { %310 = vst [vmem:[%s3921_s7 + $0xd8] sm:$0xf] %v309_v54  ;;  %312 = vst [vmem:[%s3921_s7 + $0xdc] sm:$0xf] %v311_v55  ;;  %v313_v56 = vld [vmem:[%s3914_s6 + $0x380] sm:$0xf] }
  0x37   : > { %v315_v57 = vld [vmem:[%s3914_s6 + $0x390] sm:$0xf]  ;;  %v317_v58 = vld [vmem:[%s3914_s6 + $0x3a0] sm:$0xf]  ;;  %314 = vst [vmem:[%s3921_s7 + $0xe0] sm:$0xf] %v313_v56 }
  0x38   : > { %316 = vst [vmem:[%s3921_s7 + $0xe4] sm:$0xf] %v315_v57  ;;  %318 = vst [vmem:[%s3921_s7 + $0xe8] sm:$0xf] %v317_v58  ;;  %v319_v59 = vld [vmem:[%s3914_s6 + $0x3b0] sm:$0xf] }
  0x39   : > { %v321_v60 = vld [vmem:[%s3914_s6 + $0x3c0] sm:$0xf]  ;;  %v323_v61 = vld [vmem:[%s3914_s6 + $0x3d0] sm:$0xf]  ;;  %320 = vst [vmem:[%s3921_s7 + $0xec] sm:$0xf] %v319_v59 }
  0x3a   : > { %322 = vst [vmem:[%s3921_s7 + $0xf0] sm:$0xf] %v321_v60  ;;  %324 = vst [vmem:[%s3921_s7 + $0xf4] sm:$0xf] %v323_v61  ;;  %v325_v62 = vld [vmem:[%s3914_s6 + $0x3e0] sm:$0xf] }
  0x3b   : > { %v327_v63 = vld [vmem:[%s3914_s6 + $0x3f0] sm:$0xf]  ;;  %v329_v0 = vld [vmem:[%s3914_s6 + $0x400] sm:$0xf]  ;;  %326 = vst [vmem:[%s3921_s7 + $0xf8] sm:$0xf] %v325_v62 }
  0x3c   : > { %328 = vst [vmem:[%s3921_s7 + $0xfc] sm:$0xf] %v327_v63  ;;  %330 = vst [vmem:[%s3921_s7 + $0x100] sm:$0xf] %v329_v0  ;;  %v331_v1 = vld [vmem:[%s3914_s6 + $0x410] sm:$0xf] }
  0x3d   : > { %v333_v2 = vld [vmem:[%s3914_s6 + $0x420] sm:$0xf]  ;;  %v335_v3 = vld [vmem:[%s3914_s6 + $0x430] sm:$0xf]  ;;  %332 = vst [vmem:[%s3921_s7 + $0x104] sm:$0xf] %v331_v1 }
  0x3e   : > { %334 = vst [vmem:[%s3921_s7 + $0x108] sm:$0xf] %v333_v2  ;;  %336 = vst [vmem:[%s3921_s7 + $0x10c] sm:$0xf] %v335_v3  ;;  %v337_v4 = vld [vmem:[%s3914_s6 + $0x440] sm:$0xf] }
  0x3f   : > { %v339_v5 = vld [vmem:[%s3914_s6 + $0x450] sm:$0xf]  ;;  %v341_v6 = vld [vmem:[%s3914_s6 + $0x460] sm:$0xf]  ;;  %338 = vst [vmem:[%s3921_s7 + $0x110] sm:$0xf] %v337_v4 }
  0x40   : > { %340 = vst [vmem:[%s3921_s7 + $0x114] sm:$0xf] %v339_v5  ;;  %342 = vst [vmem:[%s3921_s7 + $0x118] sm:$0xf] %v341_v6  ;;  %v343_v7 = vld [vmem:[%s3914_s6 + $0x470] sm:$0xf] }
  0x41   : > { %v345_v8 = vld [vmem:[%s3914_s6 + $0x480] sm:$0xf]  ;;  %v347_v9 = vld [vmem:[%s3914_s6 + $0x490] sm:$0xf]  ;;  %344 = vst [vmem:[%s3921_s7 + $0x11c] sm:$0xf] %v343_v7 }
  0x42   : > { %346 = vst [vmem:[%s3921_s7 + $0x120] sm:$0xf] %v345_v8  ;;  %348 = vst [vmem:[%s3921_s7 + $0x124] sm:$0xf] %v347_v9  ;;  %v349_v10 = vld [vmem:[%s3914_s6 + $0x4a0] sm:$0xf] }
  0x43   : > { %v351_v11 = vld [vmem:[%s3914_s6 + $0x4b0] sm:$0xf]  ;;  %v353_v12 = vld [vmem:[%s3914_s6 + $0x4c0] sm:$0xf]  ;;  %350 = vst [vmem:[%s3921_s7 + $0x128] sm:$0xf] %v349_v10 }
  0x44   : > { %352 = vst [vmem:[%s3921_s7 + $0x12c] sm:$0xf] %v351_v11  ;;  %354 = vst [vmem:[%s3921_s7 + $0x130] sm:$0xf] %v353_v12  ;;  %v355_v13 = vld [vmem:[%s3914_s6 + $0x4d0] sm:$0xf] }
  0x45   : > { %v357_v14 = vld [vmem:[%s3914_s6 + $0x4e0] sm:$0xf]  ;;  %v359_v15 = vld [vmem:[%s3914_s6 + $0x4f0] sm:$0xf]  ;;  %356 = vst [vmem:[%s3921_s7 + $0x134] sm:$0xf] %v355_v13 }
  0x46   : > { %358 = vst [vmem:[%s3921_s7 + $0x138] sm:$0xf] %v357_v14  ;;  %360 = vst [vmem:[%s3921_s7 + $0x13c] sm:$0xf] %v359_v15  ;;  %v361_v16 = vld [vmem:[%s3914_s6 + $0x500] sm:$0xf] }
  0x47   : > { %v363_v17 = vld [vmem:[%s3914_s6 + $0x510] sm:$0xf]  ;;  %v365_v18 = vld [vmem:[%s3914_s6 + $0x520] sm:$0xf]  ;;  %362 = vst [vmem:[%s3921_s7 + $0x140] sm:$0xf] %v361_v16 }
  0x48   : > { %364 = vst [vmem:[%s3921_s7 + $0x144] sm:$0xf] %v363_v17  ;;  %366 = vst [vmem:[%s3921_s7 + $0x148] sm:$0xf] %v365_v18  ;;  %v367_v19 = vld [vmem:[%s3914_s6 + $0x530] sm:$0xf] }
  0x49   : > { %v369_v20 = vld [vmem:[%s3914_s6 + $0x540] sm:$0xf]  ;;  %v371_v21 = vld [vmem:[%s3914_s6 + $0x550] sm:$0xf]  ;;  %368 = vst [vmem:[%s3921_s7 + $0x14c] sm:$0xf] %v367_v19 }
  0x4a   : > { %370 = vst [vmem:[%s3921_s7 + $0x150] sm:$0xf] %v369_v20  ;;  %372 = vst [vmem:[%s3921_s7 + $0x154] sm:$0xf] %v371_v21  ;;  %v373_v22 = vld [vmem:[%s3914_s6 + $0x560] sm:$0xf] }
  0x4b   : > { %v375_v23 = vld [vmem:[%s3914_s6 + $0x570] sm:$0xf]  ;;  %v377_v24 = vld [vmem:[%s3914_s6 + $0x580] sm:$0xf]  ;;  %374 = vst [vmem:[%s3921_s7 + $0x158] sm:$0xf] %v373_v22 }
  0x4c   : > { %376 = vst [vmem:[%s3921_s7 + $0x15c] sm:$0xf] %v375_v23  ;;  %378 = vst [vmem:[%s3921_s7 + $0x160] sm:$0xf] %v377_v24  ;;  %v379_v25 = vld [vmem:[%s3914_s6 + $0x590] sm:$0xf] }
  0x4d   : > { %v381_v26 = vld [vmem:[%s3914_s6 + $0x5a0] sm:$0xf]  ;;  %v383_v27 = vld [vmem:[%s3914_s6 + $0x5b0] sm:$0xf]  ;;  %380 = vst [vmem:[%s3921_s7 + $0x164] sm:$0xf] %v379_v25 }
  0x4e   : > { %382 = vst [vmem:[%s3921_s7 + $0x168] sm:$0xf] %v381_v26  ;;  %384 = vst [vmem:[%s3921_s7 + $0x16c] sm:$0xf] %v383_v27  ;;  %v385_v28 = vld [vmem:[%s3914_s6 + $0x5c0] sm:$0xf] }
  0x4f   : > { %v387_v29 = vld [vmem:[%s3914_s6 + $0x5d0] sm:$0xf]  ;;  %v389_v30 = vld [vmem:[%s3914_s6 + $0x5e0] sm:$0xf]  ;;  %386 = vst [vmem:[%s3921_s7 + $0x170] sm:$0xf] %v385_v28 }
  0x50   : > { %388 = vst [vmem:[%s3921_s7 + $0x174] sm:$0xf] %v387_v29  ;;  %390 = vst [vmem:[%s3921_s7 + $0x178] sm:$0xf] %v389_v30  ;;  %v391_v31 = vld [vmem:[%s3914_s6 + $0x5f0] sm:$0xf] }
  0x51   : > { %v393_v32 = vld [vmem:[%s3914_s6 + $0x600] sm:$0xf]  ;;  %v395_v33 = vld [vmem:[%s3914_s6 + $0x610] sm:$0xf]  ;;  %392 = vst [vmem:[%s3921_s7 + $0x17c] sm:$0xf] %v391_v31 }
  0x52   : > { %394 = vst [vmem:[%s3921_s7 + $0x180] sm:$0xf] %v393_v32  ;;  %396 = vst [vmem:[%s3921_s7 + $0x184] sm:$0xf] %v395_v33  ;;  %v397_v34 = vld [vmem:[%s3914_s6 + $0x620] sm:$0xf] }
  0x53   : > { %v399_v35 = vld [vmem:[%s3914_s6 + $0x630] sm:$0xf]  ;;  %v401_v36 = vld [vmem:[%s3914_s6 + $0x640] sm:$0xf]  ;;  %398 = vst [vmem:[%s3921_s7 + $0x188] sm:$0xf] %v397_v34 }
  0x54   : > { %400 = vst [vmem:[%s3921_s7 + $0x18c] sm:$0xf] %v399_v35  ;;  %402 = vst [vmem:[%s3921_s7 + $0x190] sm:$0xf] %v401_v36  ;;  %v403_v37 = vld [vmem:[%s3914_s6 + $0x650] sm:$0xf] }
  0x55   : > { %v405_v38 = vld [vmem:[%s3914_s6 + $0x660] sm:$0xf]  ;;  %v407_v39 = vld [vmem:[%s3914_s6 + $0x670] sm:$0xf]  ;;  %404 = vst [vmem:[%s3921_s7 + $0x194] sm:$0xf] %v403_v37 }
  0x56   : > { %406 = vst [vmem:[%s3921_s7 + $0x198] sm:$0xf] %v405_v38  ;;  %408 = vst [vmem:[%s3921_s7 + $0x19c] sm:$0xf] %v407_v39  ;;  %v409_v40 = vld [vmem:[%s3914_s6 + $0x680] sm:$0xf] }
  0x57   : > { %v411_v41 = vld [vmem:[%s3914_s6 + $0x690] sm:$0xf]  ;;  %v413_v42 = vld [vmem:[%s3914_s6 + $0x6a0] sm:$0xf]  ;;  %410 = vst [vmem:[%s3921_s7 + $0x1a0] sm:$0xf] %v409_v40 }
  0x58   : > { %412 = vst [vmem:[%s3921_s7 + $0x1a4] sm:$0xf] %v411_v41  ;;  %414 = vst [vmem:[%s3921_s7 + $0x1a8] sm:$0xf] %v413_v42  ;;  %v415_v43 = vld [vmem:[%s3914_s6 + $0x6b0] sm:$0xf] }
  0x59   : > { %v417_v44 = vld [vmem:[%s3914_s6 + $0x6c0] sm:$0xf]  ;;  %v419_v45 = vld [vmem:[%s3914_s6 + $0x6d0] sm:$0xf]  ;;  %416 = vst [vmem:[%s3921_s7 + $0x1ac] sm:$0xf] %v415_v43 }
  0x5a   : > { %418 = vst [vmem:[%s3921_s7 + $0x1b0] sm:$0xf] %v417_v44  ;;  %420 = vst [vmem:[%s3921_s7 + $0x1b4] sm:$0xf] %v419_v45  ;;  %v421_v46 = vld [vmem:[%s3914_s6 + $0x6e0] sm:$0xf] }
  0x5b   : > { %v423_v47 = vld [vmem:[%s3914_s6 + $0x6f0] sm:$0xf]  ;;  %v425_v48 = vld [vmem:[%s3914_s6 + $0x700] sm:$0xf]  ;;  %422 = vst [vmem:[%s3921_s7 + $0x1b8] sm:$0xf] %v421_v46 }
  0x5c   : > { %424 = vst [vmem:[%s3921_s7 + $0x1bc] sm:$0xf] %v423_v47  ;;  %426 = vst [vmem:[%s3921_s7 + $0x1c0] sm:$0xf] %v425_v48  ;;  %v427_v49 = vld [vmem:[%s3914_s6 + $0x710] sm:$0xf] }
  0x5d   : > { %v429_v50 = vld [vmem:[%s3914_s6 + $0x720] sm:$0xf]  ;;  %v431_v51 = vld [vmem:[%s3914_s6 + $0x730] sm:$0xf]  ;;  %428 = vst [vmem:[%s3921_s7 + $0x1c4] sm:$0xf] %v427_v49 }
  0x5e   : > { %430 = vst [vmem:[%s3921_s7 + $0x1c8] sm:$0xf] %v429_v50  ;;  %432 = vst [vmem:[%s3921_s7 + $0x1cc] sm:$0xf] %v431_v51  ;;  %v433_v52 = vld [vmem:[%s3914_s6 + $0x740] sm:$0xf] }
  0x5f   : > { %v435_v53 = vld [vmem:[%s3914_s6 + $0x750] sm:$0xf]  ;;  %v437_v54 = vld [vmem:[%s3914_s6 + $0x760] sm:$0xf]  ;;  %434 = vst [vmem:[%s3921_s7 + $0x1d0] sm:$0xf] %v433_v52 }
  0x60   : > { %436 = vst [vmem:[%s3921_s7 + $0x1d4] sm:$0xf] %v435_v53  ;;  %438 = vst [vmem:[%s3921_s7 + $0x1d8] sm:$0xf] %v437_v54  ;;  %v439_v55 = vld [vmem:[%s3914_s6 + $0x770] sm:$0xf] }
  0x61   : > { %v441_v56 = vld [vmem:[%s3914_s6 + $0x780] sm:$0xf]  ;;  %v443_v57 = vld [vmem:[%s3914_s6 + $0x790] sm:$0xf]  ;;  %440 = vst [vmem:[%s3921_s7 + $0x1dc] sm:$0xf] %v439_v55 }
  0x62   : > { %442 = vst [vmem:[%s3921_s7 + $0x1e0] sm:$0xf] %v441_v56  ;;  %444 = vst [vmem:[%s3921_s7 + $0x1e4] sm:$0xf] %v443_v57  ;;  %v445_v58 = vld [vmem:[%s3914_s6 + $0x7a0] sm:$0xf] }
  0x63   : > { %v447_v59 = vld [vmem:[%s3914_s6 + $0x7b0] sm:$0xf]  ;;  %v449_v60 = vld [vmem:[%s3914_s6 + $0x7c0] sm:$0xf]  ;;  %446 = vst [vmem:[%s3921_s7 + $0x1e8] sm:$0xf] %v445_v58 }
  0x64   : > { %448 = vst [vmem:[%s3921_s7 + $0x1ec] sm:$0xf] %v447_v59  ;;  %450 = vst [vmem:[%s3921_s7 + $0x1f0] sm:$0xf] %v449_v60  ;;  %v451_v61 = vld [vmem:[%s3914_s6 + $0x7d0] sm:$0xf] }
  0x65   : > { %v453_v62 = vld [vmem:[%s3914_s6 + $0x7e0] sm:$0xf]  ;;  %v455_v63 = vld [vmem:[%s3914_s6 + $0x7f0] sm:$0xf]  ;;  %452 = vst [vmem:[%s3921_s7 + $0x1f4] sm:$0xf] %v451_v61 }
  0x66   : > { %454 = vst [vmem:[%s3921_s7 + $0x1f8] sm:$0xf] %v453_v62  ;;  %456 = vst [vmem:[%s3921_s7 + $0x1fc] sm:$0xf] %v455_v63  ;;  %v457_v0 = vld [vmem:[%s3914_s6 + $0x800] sm:$0xf] }
  0x67   : > { %v459_v1 = vld [vmem:[%s3914_s6 + $0x810] sm:$0xf]  ;;  %v461_v2 = vld [vmem:[%s3914_s6 + $0x820] sm:$0xf]  ;;  %458 = vst [vmem:[%s3921_s7 + $0x200] sm:$0xf] %v457_v0 }
  0x68   : > { %460 = vst [vmem:[%s3921_s7 + $0x204] sm:$0xf] %v459_v1  ;;  %462 = vst [vmem:[%s3921_s7 + $0x208] sm:$0xf] %v461_v2  ;;  %v463_v3 = vld [vmem:[%s3914_s6 + $0x830] sm:$0xf] }
  0x69   : > { %v465_v4 = vld [vmem:[%s3914_s6 + $0x840] sm:$0xf]  ;;  %v467_v5 = vld [vmem:[%s3914_s6 + $0x850] sm:$0xf]  ;;  %464 = vst [vmem:[%s3921_s7 + $0x20c] sm:$0xf] %v463_v3 }
  0x6a   : > { %466 = vst [vmem:[%s3921_s7 + $0x210] sm:$0xf] %v465_v4  ;;  %468 = vst [vmem:[%s3921_s7 + $0x214] sm:$0xf] %v467_v5  ;;  %v469_v6 = vld [vmem:[%s3914_s6 + $0x860] sm:$0xf] }
  0x6b   : > { %v471_v7 = vld [vmem:[%s3914_s6 + $0x870] sm:$0xf]  ;;  %v473_v8 = vld [vmem:[%s3914_s6 + $0x880] sm:$0xf]  ;;  %470 = vst [vmem:[%s3921_s7 + $0x218] sm:$0xf] %v469_v6 }
  0x6c   : > { %472 = vst [vmem:[%s3921_s7 + $0x21c] sm:$0xf] %v471_v7  ;;  %474 = vst [vmem:[%s3921_s7 + $0x220] sm:$0xf] %v473_v8  ;;  %v475_v9 = vld [vmem:[%s3914_s6 + $0x890] sm:$0xf] }
  0x6d   : > { %v477_v10 = vld [vmem:[%s3914_s6 + $0x8a0] sm:$0xf]  ;;  %v479_v11 = vld [vmem:[%s3914_s6 + $0x8b0] sm:$0xf]  ;;  %476 = vst [vmem:[%s3921_s7 + $0x224] sm:$0xf] %v475_v9 }
  0x6e   : > { %478 = vst [vmem:[%s3921_s7 + $0x228] sm:$0xf] %v477_v10  ;;  %480 = vst [vmem:[%s3921_s7 + $0x22c] sm:$0xf] %v479_v11  ;;  %v481_v12 = vld [vmem:[%s3914_s6 + $0x8c0] sm:$0xf] }
  0x6f   : > { %v483_v13 = vld [vmem:[%s3914_s6 + $0x8d0] sm:$0xf]  ;;  %v485_v14 = vld [vmem:[%s3914_s6 + $0x8e0] sm:$0xf]  ;;  %482 = vst [vmem:[%s3921_s7 + $0x230] sm:$0xf] %v481_v12 }
  0x70   : > { %484 = vst [vmem:[%s3921_s7 + $0x234] sm:$0xf] %v483_v13  ;;  %486 = vst [vmem:[%s3921_s7 + $0x238] sm:$0xf] %v485_v14  ;;  %v487_v15 = vld [vmem:[%s3914_s6 + $0x8f0] sm:$0xf] }
  0x71   : > { %v489_v16 = vld [vmem:[%s3914_s6 + $0x900] sm:$0xf]  ;;  %v491_v17 = vld [vmem:[%s3914_s6 + $0x910] sm:$0xf]  ;;  %488 = vst [vmem:[%s3921_s7 + $0x23c] sm:$0xf] %v487_v15 }
  0x72   : > { %490 = vst [vmem:[%s3921_s7 + $0x240] sm:$0xf] %v489_v16  ;;  %492 = vst [vmem:[%s3921_s7 + $0x244] sm:$0xf] %v491_v17  ;;  %v493_v18 = vld [vmem:[%s3914_s6 + $0x920] sm:$0xf] }
  0x73   : > { %v495_v19 = vld [vmem:[%s3914_s6 + $0x930] sm:$0xf]  ;;  %v497_v20 = vld [vmem:[%s3914_s6 + $0x940] sm:$0xf]  ;;  %494 = vst [vmem:[%s3921_s7 + $0x248] sm:$0xf] %v493_v18 }
  0x74   : > { %496 = vst [vmem:[%s3921_s7 + $0x24c] sm:$0xf] %v495_v19  ;;  %498 = vst [vmem:[%s3921_s7 + $0x250] sm:$0xf] %v497_v20  ;;  %v499_v21 = vld [vmem:[%s3914_s6 + $0x950] sm:$0xf] }
  0x75   : > { %v501_v22 = vld [vmem:[%s3914_s6 + $0x960] sm:$0xf]  ;;  %v503_v23 = vld [vmem:[%s3914_s6 + $0x970] sm:$0xf]  ;;  %500 = vst [vmem:[%s3921_s7 + $0x254] sm:$0xf] %v499_v21 }
  0x76   : > { %502 = vst [vmem:[%s3921_s7 + $0x258] sm:$0xf] %v501_v22  ;;  %504 = vst [vmem:[%s3921_s7 + $0x25c] sm:$0xf] %v503_v23  ;;  %v505_v24 = vld [vmem:[%s3914_s6 + $0x980] sm:$0xf] }
  0x77   : > { %v507_v25 = vld [vmem:[%s3914_s6 + $0x990] sm:$0xf]  ;;  %v509_v26 = vld [vmem:[%s3914_s6 + $0x9a0] sm:$0xf]  ;;  %506 = vst [vmem:[%s3921_s7 + $0x260] sm:$0xf] %v505_v24 }
  0x78   : > { %508 = vst [vmem:[%s3921_s7 + $0x264] sm:$0xf] %v507_v25  ;;  %510 = vst [vmem:[%s3921_s7 + $0x268] sm:$0xf] %v509_v26  ;;  %v511_v27 = vld [vmem:[%s3914_s6 + $0x9b0] sm:$0xf] }
  0x79   : > { %v513_v28 = vld [vmem:[%s3914_s6 + $0x9c0] sm:$0xf]  ;;  %v515_v29 = vld [vmem:[%s3914_s6 + $0x9d0] sm:$0xf]  ;;  %512 = vst [vmem:[%s3921_s7 + $0x26c] sm:$0xf] %v511_v27 }
  0x7a   : > { %514 = vst [vmem:[%s3921_s7 + $0x270] sm:$0xf] %v513_v28  ;;  %516 = vst [vmem:[%s3921_s7 + $0x274] sm:$0xf] %v515_v29  ;;  %v517_v30 = vld [vmem:[%s3914_s6 + $0x9e0] sm:$0xf] }
  0x7b   : > { %v519_v31 = vld [vmem:[%s3914_s6 + $0x9f0] sm:$0xf]  ;;  %v521_v32 = vld [vmem:[%s3914_s6 + $0xa00] sm:$0xf]  ;;  %518 = vst [vmem:[%s3921_s7 + $0x278] sm:$0xf] %v517_v30 }
  0x7c   : > { %520 = vst [vmem:[%s3921_s7 + $0x27c] sm:$0xf] %v519_v31  ;;  %522 = vst [vmem:[%s3921_s7 + $0x280] sm:$0xf] %v521_v32  ;;  %v523_v33 = vld [vmem:[%s3914_s6 + $0xa10] sm:$0xf] }
  0x7d   : > { %v525_v34 = vld [vmem:[%s3914_s6 + $0xa20] sm:$0xf]  ;;  %v527_v35 = vld [vmem:[%s3914_s6 + $0xa30] sm:$0xf]  ;;  %524 = vst [vmem:[%s3921_s7 + $0x284] sm:$0xf] %v523_v33 }
  0x7e   : > { %526 = vst [vmem:[%s3921_s7 + $0x288] sm:$0xf] %v525_v34  ;;  %528 = vst [vmem:[%s3921_s7 + $0x28c] sm:$0xf] %v527_v35  ;;  %v529_v36 = vld [vmem:[%s3914_s6 + $0xa40] sm:$0xf] }
  0x7f   : > { %v531_v37 = vld [vmem:[%s3914_s6 + $0xa50] sm:$0xf]  ;;  %v533_v38 = vld [vmem:[%s3914_s6 + $0xa60] sm:$0xf]  ;;  %530 = vst [vmem:[%s3921_s7 + $0x290] sm:$0xf] %v529_v36 }
  0x80   : > { %532 = vst [vmem:[%s3921_s7 + $0x294] sm:$0xf] %v531_v37  ;;  %534 = vst [vmem:[%s3921_s7 + $0x298] sm:$0xf] %v533_v38  ;;  %v535_v39 = vld [vmem:[%s3914_s6 + $0xa70] sm:$0xf] }
  0x81   : > { %v537_v40 = vld [vmem:[%s3914_s6 + $0xa80] sm:$0xf]  ;;  %v539_v41 = vld [vmem:[%s3914_s6 + $0xa90] sm:$0xf]  ;;  %536 = vst [vmem:[%s3921_s7 + $0x29c] sm:$0xf] %v535_v39 }
  0x82   : > { %538 = vst [vmem:[%s3921_s7 + $0x2a0] sm:$0xf] %v537_v40  ;;  %540 = vst [vmem:[%s3921_s7 + $0x2a4] sm:$0xf] %v539_v41  ;;  %v541_v42 = vld [vmem:[%s3914_s6 + $0xaa0] sm:$0xf] }
  0x83   : > { %v543_v43 = vld [vmem:[%s3914_s6 + $0xab0] sm:$0xf]  ;;  %v545_v44 = vld [vmem:[%s3914_s6 + $0xac0] sm:$0xf]  ;;  %542 = vst [vmem:[%s3921_s7 + $0x2a8] sm:$0xf] %v541_v42 }
  0x84   : > { %544 = vst [vmem:[%s3921_s7 + $0x2ac] sm:$0xf] %v543_v43  ;;  %546 = vst [vmem:[%s3921_s7 + $0x2b0] sm:$0xf] %v545_v44  ;;  %v547_v45 = vld [vmem:[%s3914_s6 + $0xad0] sm:$0xf] }
  0x85   : > { %v549_v46 = vld [vmem:[%s3914_s6 + $0xae0] sm:$0xf]  ;;  %v551_v47 = vld [vmem:[%s3914_s6 + $0xaf0] sm:$0xf]  ;;  %548 = vst [vmem:[%s3921_s7 + $0x2b4] sm:$0xf] %v547_v45 }
  0x86   : > { %550 = vst [vmem:[%s3921_s7 + $0x2b8] sm:$0xf] %v549_v46  ;;  %552 = vst [vmem:[%s3921_s7 + $0x2bc] sm:$0xf] %v551_v47  ;;  %v553_v48 = vld [vmem:[%s3914_s6 + $0xb00] sm:$0xf] }
  0x87   : > { %v555_v49 = vld [vmem:[%s3914_s6 + $0xb10] sm:$0xf]  ;;  %v557_v50 = vld [vmem:[%s3914_s6 + $0xb20] sm:$0xf]  ;;  %554 = vst [vmem:[%s3921_s7 + $0x2c0] sm:$0xf] %v553_v48 }
  0x88   : > { %556 = vst [vmem:[%s3921_s7 + $0x2c4] sm:$0xf] %v555_v49  ;;  %558 = vst [vmem:[%s3921_s7 + $0x2c8] sm:$0xf] %v557_v50  ;;  %v559_v51 = vld [vmem:[%s3914_s6 + $0xb30] sm:$0xf] }
  0x89   : > { %v561_v52 = vld [vmem:[%s3914_s6 + $0xb40] sm:$0xf]  ;;  %v563_v53 = vld [vmem:[%s3914_s6 + $0xb50] sm:$0xf]  ;;  %560 = vst [vmem:[%s3921_s7 + $0x2cc] sm:$0xf] %v559_v51 }
  0x8a   : > { %562 = vst [vmem:[%s3921_s7 + $0x2d0] sm:$0xf] %v561_v52  ;;  %564 = vst [vmem:[%s3921_s7 + $0x2d4] sm:$0xf] %v563_v53  ;;  %v565_v54 = vld [vmem:[%s3914_s6 + $0xb60] sm:$0xf] }
  0x8b   : > { %v567_v55 = vld [vmem:[%s3914_s6 + $0xb70] sm:$0xf]  ;;  %v569_v56 = vld [vmem:[%s3914_s6 + $0xb80] sm:$0xf]  ;;  %566 = vst [vmem:[%s3921_s7 + $0x2d8] sm:$0xf] %v565_v54 }
  0x8c   : > { %568 = vst [vmem:[%s3921_s7 + $0x2dc] sm:$0xf] %v567_v55  ;;  %570 = vst [vmem:[%s3921_s7 + $0x2e0] sm:$0xf] %v569_v56  ;;  %v571_v57 = vld [vmem:[%s3914_s6 + $0xb90] sm:$0xf] }
  0x8d   : > { %v573_v58 = vld [vmem:[%s3914_s6 + $0xba0] sm:$0xf]  ;;  %v575_v59 = vld [vmem:[%s3914_s6 + $0xbb0] sm:$0xf]  ;;  %572 = vst [vmem:[%s3921_s7 + $0x2e4] sm:$0xf] %v571_v57 }
  0x8e   : > { %574 = vst [vmem:[%s3921_s7 + $0x2e8] sm:$0xf] %v573_v58  ;;  %576 = vst [vmem:[%s3921_s7 + $0x2ec] sm:$0xf] %v575_v59  ;;  %v577_v60 = vld [vmem:[%s3914_s6 + $0xbc0] sm:$0xf] }
  0x8f   : > { %v579_v61 = vld [vmem:[%s3914_s6 + $0xbd0] sm:$0xf]  ;;  %v581_v62 = vld [vmem:[%s3914_s6 + $0xbe0] sm:$0xf]  ;;  %578 = vst [vmem:[%s3921_s7 + $0x2f0] sm:$0xf] %v577_v60 }
  0x90   : > { %580 = vst [vmem:[%s3921_s7 + $0x2f4] sm:$0xf] %v579_v61  ;;  %582 = vst [vmem:[%s3921_s7 + $0x2f8] sm:$0xf] %v581_v62  ;;  %v583_v63 = vld [vmem:[%s3914_s6 + $0xbf0] sm:$0xf] }
  0x91   : > { %v585_v0 = vld [vmem:[%s3914_s6 + $0xc00] sm:$0xf]  ;;  %v587_v1 = vld [vmem:[%s3914_s6 + $0xc10] sm:$0xf]  ;;  %584 = vst [vmem:[%s3921_s7 + $0x2fc] sm:$0xf] %v583_v63 }
  0x92   : > { %586 = vst [vmem:[%s3921_s7 + $0x300] sm:$0xf] %v585_v0  ;;  %588 = vst [vmem:[%s3921_s7 + $0x304] sm:$0xf] %v587_v1  ;;  %v589_v2 = vld [vmem:[%s3914_s6 + $0xc20] sm:$0xf] }
  0x93   : > { %v591_v3 = vld [vmem:[%s3914_s6 + $0xc30] sm:$0xf]  ;;  %v593_v4 = vld [vmem:[%s3914_s6 + $0xc40] sm:$0xf]  ;;  %590 = vst [vmem:[%s3921_s7 + $0x308] sm:$0xf] %v589_v2 }
  0x94   : > { %592 = vst [vmem:[%s3921_s7 + $0x30c] sm:$0xf] %v591_v3  ;;  %594 = vst [vmem:[%s3921_s7 + $0x310] sm:$0xf] %v593_v4  ;;  %v595_v5 = vld [vmem:[%s3914_s6 + $0xc50] sm:$0xf] }
  0x95   : > { %v597_v6 = vld [vmem:[%s3914_s6 + $0xc60] sm:$0xf]  ;;  %v599_v7 = vld [vmem:[%s3914_s6 + $0xc70] sm:$0xf]  ;;  %596 = vst [vmem:[%s3921_s7 + $0x314] sm:$0xf] %v595_v5 }
  0x96   : > { %598 = vst [vmem:[%s3921_s7 + $0x318] sm:$0xf] %v597_v6  ;;  %600 = vst [vmem:[%s3921_s7 + $0x31c] sm:$0xf] %v599_v7  ;;  %v601_v8 = vld [vmem:[%s3914_s6 + $0xc80] sm:$0xf] }
  0x97   : > { %v603_v9 = vld [vmem:[%s3914_s6 + $0xc90] sm:$0xf]  ;;  %v605_v10 = vld [vmem:[%s3914_s6 + $0xca0] sm:$0xf]  ;;  %602 = vst [vmem:[%s3921_s7 + $0x320] sm:$0xf] %v601_v8 }
  0x98   : > { %604 = vst [vmem:[%s3921_s7 + $0x324] sm:$0xf] %v603_v9  ;;  %606 = vst [vmem:[%s3921_s7 + $0x328] sm:$0xf] %v605_v10  ;;  %v607_v11 = vld [vmem:[%s3914_s6 + $0xcb0] sm:$0xf] }
  0x99   : > { %v609_v12 = vld [vmem:[%s3914_s6 + $0xcc0] sm:$0xf]  ;;  %v611_v13 = vld [vmem:[%s3914_s6 + $0xcd0] sm:$0xf]  ;;  %608 = vst [vmem:[%s3921_s7 + $0x32c] sm:$0xf] %v607_v11 }
  0x9a   : > { %610 = vst [vmem:[%s3921_s7 + $0x330] sm:$0xf] %v609_v12  ;;  %612 = vst [vmem:[%s3921_s7 + $0x334] sm:$0xf] %v611_v13  ;;  %v613_v14 = vld [vmem:[%s3914_s6 + $0xce0] sm:$0xf] }
  0x9b   : > { %v615_v15 = vld [vmem:[%s3914_s6 + $0xcf0] sm:$0xf]  ;;  %v617_v16 = vld [vmem:[%s3914_s6 + $0xd00] sm:$0xf]  ;;  %614 = vst [vmem:[%s3921_s7 + $0x338] sm:$0xf] %v613_v14 }
  0x9c   : > { %616 = vst [vmem:[%s3921_s7 + $0x33c] sm:$0xf] %v615_v15  ;;  %618 = vst [vmem:[%s3921_s7 + $0x340] sm:$0xf] %v617_v16  ;;  %v619_v17 = vld [vmem:[%s3914_s6 + $0xd10] sm:$0xf] }
  0x9d   : > { %v621_v18 = vld [vmem:[%s3914_s6 + $0xd20] sm:$0xf]  ;;  %v623_v19 = vld [vmem:[%s3914_s6 + $0xd30] sm:$0xf]  ;;  %620 = vst [vmem:[%s3921_s7 + $0x344] sm:$0xf] %v619_v17 }
  0x9e   : > { %622 = vst [vmem:[%s3921_s7 + $0x348] sm:$0xf] %v621_v18  ;;  %624 = vst [vmem:[%s3921_s7 + $0x34c] sm:$0xf] %v623_v19  ;;  %v625_v20 = vld [vmem:[%s3914_s6 + $0xd40] sm:$0xf] }
  0x9f   : > { %v627_v21 = vld [vmem:[%s3914_s6 + $0xd50] sm:$0xf]  ;;  %v629_v22 = vld [vmem:[%s3914_s6 + $0xd60] sm:$0xf]  ;;  %626 = vst [vmem:[%s3921_s7 + $0x350] sm:$0xf] %v625_v20 }
  0xa0   : > { %628 = vst [vmem:[%s3921_s7 + $0x354] sm:$0xf] %v627_v21  ;;  %630 = vst [vmem:[%s3921_s7 + $0x358] sm:$0xf] %v629_v22  ;;  %v631_v23 = vld [vmem:[%s3914_s6 + $0xd70] sm:$0xf] }
  0xa1   : > { %v633_v24 = vld [vmem:[%s3914_s6 + $0xd80] sm:$0xf]  ;;  %v635_v25 = vld [vmem:[%s3914_s6 + $0xd90] sm:$0xf]  ;;  %632 = vst [vmem:[%s3921_s7 + $0x35c] sm:$0xf] %v631_v23 }
  0xa2   : > { %634 = vst [vmem:[%s3921_s7 + $0x360] sm:$0xf] %v633_v24  ;;  %636 = vst [vmem:[%s3921_s7 + $0x364] sm:$0xf] %v635_v25  ;;  %v637_v26 = vld [vmem:[%s3914_s6 + $0xda0] sm:$0xf] }
  0xa3   : > { %v639_v27 = vld [vmem:[%s3914_s6 + $0xdb0] sm:$0xf]  ;;  %v641_v28 = vld [vmem:[%s3914_s6 + $0xdc0] sm:$0xf]  ;;  %638 = vst [vmem:[%s3921_s7 + $0x368] sm:$0xf] %v637_v26 }
  0xa4   : > { %640 = vst [vmem:[%s3921_s7 + $0x36c] sm:$0xf] %v639_v27  ;;  %642 = vst [vmem:[%s3921_s7 + $0x370] sm:$0xf] %v641_v28  ;;  %v643_v29 = vld [vmem:[%s3914_s6 + $0xdd0] sm:$0xf] }
  0xa5   : > { %v645_v30 = vld [vmem:[%s3914_s6 + $0xde0] sm:$0xf]  ;;  %v647_v31 = vld [vmem:[%s3914_s6 + $0xdf0] sm:$0xf]  ;;  %644 = vst [vmem:[%s3921_s7 + $0x374] sm:$0xf] %v643_v29 }
  0xa6   : > { %646 = vst [vmem:[%s3921_s7 + $0x378] sm:$0xf] %v645_v30  ;;  %648 = vst [vmem:[%s3921_s7 + $0x37c] sm:$0xf] %v647_v31  ;;  %v649_v32 = vld [vmem:[%s3914_s6 + $0xe00] sm:$0xf] }
  0xa7   : > { %v651_v33 = vld [vmem:[%s3914_s6 + $0xe10] sm:$0xf]  ;;  %v653_v34 = vld [vmem:[%s3914_s6 + $0xe20] sm:$0xf]  ;;  %650 = vst [vmem:[%s3921_s7 + $0x380] sm:$0xf] %v649_v32 }
  0xa8   : > { %652 = vst [vmem:[%s3921_s7 + $0x384] sm:$0xf] %v651_v33  ;;  %654 = vst [vmem:[%s3921_s7 + $0x388] sm:$0xf] %v653_v34  ;;  %v655_v35 = vld [vmem:[%s3914_s6 + $0xe30] sm:$0xf] }
  0xa9   : > { %v657_v36 = vld [vmem:[%s3914_s6 + $0xe40] sm:$0xf]  ;;  %v659_v37 = vld [vmem:[%s3914_s6 + $0xe50] sm:$0xf]  ;;  %656 = vst [vmem:[%s3921_s7 + $0x38c] sm:$0xf] %v655_v35 }
  0xaa   : > { %658 = vst [vmem:[%s3921_s7 + $0x390] sm:$0xf] %v657_v36  ;;  %660 = vst [vmem:[%s3921_s7 + $0x394] sm:$0xf] %v659_v37  ;;  %v661_v38 = vld [vmem:[%s3914_s6 + $0xe60] sm:$0xf] }
  0xab   : > { %v663_v39 = vld [vmem:[%s3914_s6 + $0xe70] sm:$0xf]  ;;  %v665_v40 = vld [vmem:[%s3914_s6 + $0xe80] sm:$0xf]  ;;  %662 = vst [vmem:[%s3921_s7 + $0x398] sm:$0xf] %v661_v38 }
  0xac   : > { %664 = vst [vmem:[%s3921_s7 + $0x39c] sm:$0xf] %v663_v39  ;;  %666 = vst [vmem:[%s3921_s7 + $0x3a0] sm:$0xf] %v665_v40  ;;  %v667_v41 = vld [vmem:[%s3914_s6 + $0xe90] sm:$0xf] }
  0xad   : > { %v669_v42 = vld [vmem:[%s3914_s6 + $0xea0] sm:$0xf]  ;;  %v671_v43 = vld [vmem:[%s3914_s6 + $0xeb0] sm:$0xf]  ;;  %668 = vst [vmem:[%s3921_s7 + $0x3a4] sm:$0xf] %v667_v41 }
  0xae   : > { %670 = vst [vmem:[%s3921_s7 + $0x3a8] sm:$0xf] %v669_v42  ;;  %672 = vst [vmem:[%s3921_s7 + $0x3ac] sm:$0xf] %v671_v43  ;;  %v673_v44 = vld [vmem:[%s3914_s6 + $0xec0] sm:$0xf] }
  0xaf   : > { %v675_v45 = vld [vmem:[%s3914_s6 + $0xed0] sm:$0xf]  ;;  %v677_v46 = vld [vmem:[%s3914_s6 + $0xee0] sm:$0xf]  ;;  %674 = vst [vmem:[%s3921_s7 + $0x3b0] sm:$0xf] %v673_v44 }
  0xb0   : > { %676 = vst [vmem:[%s3921_s7 + $0x3b4] sm:$0xf] %v675_v45  ;;  %678 = vst [vmem:[%s3921_s7 + $0x3b8] sm:$0xf] %v677_v46  ;;  %v679_v47 = vld [vmem:[%s3914_s6 + $0xef0] sm:$0xf] }
  0xb1   : > { %v681_v48 = vld [vmem:[%s3914_s6 + $0xf00] sm:$0xf]  ;;  %v683_v49 = vld [vmem:[%s3914_s6 + $0xf10] sm:$0xf]  ;;  %680 = vst [vmem:[%s3921_s7 + $0x3bc] sm:$0xf] %v679_v47 }
  0xb2   : > { %682 = vst [vmem:[%s3921_s7 + $0x3c0] sm:$0xf] %v681_v48  ;;  %684 = vst [vmem:[%s3921_s7 + $0x3c4] sm:$0xf] %v683_v49  ;;  %v685_v50 = vld [vmem:[%s3914_s6 + $0xf20] sm:$0xf] }
  0xb3   : > { %v687_v51 = vld [vmem:[%s3914_s6 + $0xf30] sm:$0xf]  ;;  %v689_v52 = vld [vmem:[%s3914_s6 + $0xf40] sm:$0xf]  ;;  %686 = vst [vmem:[%s3921_s7 + $0x3c8] sm:$0xf] %v685_v50 }
  0xb4   : > { %688 = vst [vmem:[%s3921_s7 + $0x3cc] sm:$0xf] %v687_v51  ;;  %690 = vst [vmem:[%s3921_s7 + $0x3d0] sm:$0xf] %v689_v52  ;;  %v691_v53 = vld [vmem:[%s3914_s6 + $0xf50] sm:$0xf] }
  0xb5   : > { %v693_v54 = vld [vmem:[%s3914_s6 + $0xf60] sm:$0xf]  ;;  %v695_v55 = vld [vmem:[%s3914_s6 + $0xf70] sm:$0xf]  ;;  %692 = vst [vmem:[%s3921_s7 + $0x3d4] sm:$0xf] %v691_v53 }
  0xb6   : > { %694 = vst [vmem:[%s3921_s7 + $0x3d8] sm:$0xf] %v693_v54  ;;  %696 = vst [vmem:[%s3921_s7 + $0x3dc] sm:$0xf] %v695_v55  ;;  %v697_v56 = vld [vmem:[%s3914_s6 + $0xf80] sm:$0xf] }
  0xb7   : > { %v699_v57 = vld [vmem:[%s3914_s6 + $0xf90] sm:$0xf]  ;;  %v701_v58 = vld [vmem:[%s3914_s6 + $0xfa0] sm:$0xf]  ;;  %698 = vst [vmem:[%s3921_s7 + $0x3e0] sm:$0xf] %v697_v56 }
  0xb8   : > { %700 = vst [vmem:[%s3921_s7 + $0x3e4] sm:$0xf] %v699_v57  ;;  %702 = vst [vmem:[%s3921_s7 + $0x3e8] sm:$0xf] %v701_v58  ;;  %v703_v59 = vld [vmem:[%s3914_s6 + $0xfb0] sm:$0xf] }
  0xb9   : > { %v705_v60 = vld [vmem:[%s3914_s6 + $0xfc0] sm:$0xf]  ;;  %v707_v61 = vld [vmem:[%s3914_s6 + $0xfd0] sm:$0xf]  ;;  %704 = vst [vmem:[%s3921_s7 + $0x3ec] sm:$0xf] %v703_v59 }
  0xba   : > { %706 = vst [vmem:[%s3921_s7 + $0x3f0] sm:$0xf] %v705_v60  ;;  %708 = vst [vmem:[%s3921_s7 + $0x3f4] sm:$0xf] %v707_v61  ;;  %v709_v62 = vld [vmem:[%s3914_s6 + $0xfe0] sm:$0xf] }
  0xbb   : > { %v711_v63 = vld [vmem:[%s3914_s6 + $0xff0] sm:$0xf]  ;;  %v713_v0 = vld [vmem:[%s3914_s6 + $0x1000] sm:$0xf]  ;;  %710 = vst [vmem:[%s3921_s7 + $0x3f8] sm:$0xf] %v709_v62 }
  0xbc   : > { %712 = vst [vmem:[%s3921_s7 + $0x3fc] sm:$0xf] %v711_v63  ;;  %714 = vst [vmem:[%s3921_s7 + $0x400] sm:$0xf] %v713_v0  ;;  %v715_v1 = vld [vmem:[%s3914_s6 + $0x1010] sm:$0xf] }
  0xbd   : > { %v717_v2 = vld [vmem:[%s3914_s6 + $0x1020] sm:$0xf]  ;;  %v719_v3 = vld [vmem:[%s3914_s6 + $0x1030] sm:$0xf]  ;;  %716 = vst [vmem:[%s3921_s7 + $0x404] sm:$0xf] %v715_v1 }
  0xbe   : > { %718 = vst [vmem:[%s3921_s7 + $0x408] sm:$0xf] %v717_v2  ;;  %720 = vst [vmem:[%s3921_s7 + $0x40c] sm:$0xf] %v719_v3  ;;  %v721_v4 = vld [vmem:[%s3914_s6 + $0x1040] sm:$0xf] }
  0xbf   : > { %v723_v5 = vld [vmem:[%s3914_s6 + $0x1050] sm:$0xf]  ;;  %v725_v6 = vld [vmem:[%s3914_s6 + $0x1060] sm:$0xf]  ;;  %722 = vst [vmem:[%s3921_s7 + $0x410] sm:$0xf] %v721_v4 }
  0xc0   : > { %724 = vst [vmem:[%s3921_s7 + $0x414] sm:$0xf] %v723_v5  ;;  %726 = vst [vmem:[%s3921_s7 + $0x418] sm:$0xf] %v725_v6  ;;  %v727_v7 = vld [vmem:[%s3914_s6 + $0x1070] sm:$0xf] }
  0xc1   : > { %v729_v8 = vld [vmem:[%s3914_s6 + $0x1080] sm:$0xf]  ;;  %v731_v9 = vld [vmem:[%s3914_s6 + $0x1090] sm:$0xf]  ;;  %728 = vst [vmem:[%s3921_s7 + $0x41c] sm:$0xf] %v727_v7 }
  0xc2   : > { %730 = vst [vmem:[%s3921_s7 + $0x420] sm:$0xf] %v729_v8  ;;  %732 = vst [vmem:[%s3921_s7 + $0x424] sm:$0xf] %v731_v9  ;;  %v733_v10 = vld [vmem:[%s3914_s6 + $0x10a0] sm:$0xf] }
  0xc3   : > { %v735_v11 = vld [vmem:[%s3914_s6 + $0x10b0] sm:$0xf]  ;;  %v737_v12 = vld [vmem:[%s3914_s6 + $0x10c0] sm:$0xf]  ;;  %734 = vst [vmem:[%s3921_s7 + $0x428] sm:$0xf] %v733_v10 }
  0xc4   : > { %736 = vst [vmem:[%s3921_s7 + $0x42c] sm:$0xf] %v735_v11  ;;  %738 = vst [vmem:[%s3921_s7 + $0x430] sm:$0xf] %v737_v12  ;;  %v739_v13 = vld [vmem:[%s3914_s6 + $0x10d0] sm:$0xf] }
  0xc5   : > { %v741_v14 = vld [vmem:[%s3914_s6 + $0x10e0] sm:$0xf]  ;;  %v743_v15 = vld [vmem:[%s3914_s6 + $0x10f0] sm:$0xf]  ;;  %740 = vst [vmem:[%s3921_s7 + $0x434] sm:$0xf] %v739_v13 }
  0xc6   : > { %742 = vst [vmem:[%s3921_s7 + $0x438] sm:$0xf] %v741_v14  ;;  %744 = vst [vmem:[%s3921_s7 + $0x43c] sm:$0xf] %v743_v15  ;;  %v745_v16 = vld [vmem:[%s3914_s6 + $0x1100] sm:$0xf] }
  0xc7   : > { %v747_v17 = vld [vmem:[%s3914_s6 + $0x1110] sm:$0xf]  ;;  %v749_v18 = vld [vmem:[%s3914_s6 + $0x1120] sm:$0xf]  ;;  %746 = vst [vmem:[%s3921_s7 + $0x440] sm:$0xf] %v745_v16 }
  0xc8   : > { %748 = vst [vmem:[%s3921_s7 + $0x444] sm:$0xf] %v747_v17  ;;  %750 = vst [vmem:[%s3921_s7 + $0x448] sm:$0xf] %v749_v18  ;;  %v751_v19 = vld [vmem:[%s3914_s6 + $0x1130] sm:$0xf] }
  0xc9   : > { %v753_v20 = vld [vmem:[%s3914_s6 + $0x1140] sm:$0xf]  ;;  %v755_v21 = vld [vmem:[%s3914_s6 + $0x1150] sm:$0xf]  ;;  %752 = vst [vmem:[%s3921_s7 + $0x44c] sm:$0xf] %v751_v19 }
  0xca   : > { %754 = vst [vmem:[%s3921_s7 + $0x450] sm:$0xf] %v753_v20  ;;  %756 = vst [vmem:[%s3921_s7 + $0x454] sm:$0xf] %v755_v21  ;;  %v757_v22 = vld [vmem:[%s3914_s6 + $0x1160] sm:$0xf] }
  0xcb   : > { %v759_v23 = vld [vmem:[%s3914_s6 + $0x1170] sm:$0xf]  ;;  %v761_v24 = vld [vmem:[%s3914_s6 + $0x1180] sm:$0xf]  ;;  %758 = vst [vmem:[%s3921_s7 + $0x458] sm:$0xf] %v757_v22 }
  0xcc   : > { %760 = vst [vmem:[%s3921_s7 + $0x45c] sm:$0xf] %v759_v23  ;;  %762 = vst [vmem:[%s3921_s7 + $0x460] sm:$0xf] %v761_v24  ;;  %v763_v25 = vld [vmem:[%s3914_s6 + $0x1190] sm:$0xf] }
  0xcd   : > { %v765_v26 = vld [vmem:[%s3914_s6 + $0x11a0] sm:$0xf]  ;;  %v767_v27 = vld [vmem:[%s3914_s6 + $0x11b0] sm:$0xf]  ;;  %764 = vst [vmem:[%s3921_s7 + $0x464] sm:$0xf] %v763_v25 }
  0xce   : > { %766 = vst [vmem:[%s3921_s7 + $0x468] sm:$0xf] %v765_v26  ;;  %768 = vst [vmem:[%s3921_s7 + $0x46c] sm:$0xf] %v767_v27  ;;  %v769_v28 = vld [vmem:[%s3914_s6 + $0x11c0] sm:$0xf] }
  0xcf   : > { %v771_v29 = vld [vmem:[%s3914_s6 + $0x11d0] sm:$0xf]  ;;  %v773_v30 = vld [vmem:[%s3914_s6 + $0x11e0] sm:$0xf]  ;;  %770 = vst [vmem:[%s3921_s7 + $0x470] sm:$0xf] %v769_v28 }
  0xd0   : > { %772 = vst [vmem:[%s3921_s7 + $0x474] sm:$0xf] %v771_v29  ;;  %774 = vst [vmem:[%s3921_s7 + $0x478] sm:$0xf] %v773_v30  ;;  %v775_v31 = vld [vmem:[%s3914_s6 + $0x11f0] sm:$0xf] }
  0xd1   : > { %776 = vst [vmem:[%s3921_s7 + $0x47c] sm:$0xf] %v775_v31 }
  0xd2 PF: > { %p3216_p5 = scmp.ge.s32.totalorder %s3843_s20, 1  ;;  %p1389_p6 = scmp.lt.s32.totalorder %s3843_s20, 5 }
  0xd4   : > { %p1390_p7 = pnand %p3216_p5, %p1389_p6 }
  0xd5   : > { %s1396_s8 = sand.u32 (!%p1390_p7), 1, %s3835_s18   ;;  %p1426_p8 = scmp.lt.s32.totalorder (!%p1390_p7), %s3894_s21, 3 }
  0xd6   : > { %1393 = sbr.rel (%p1390_p7) target bundleno = 836 (0x344), region = 77  ;;  %s3217_s10 = sshll.u32 (!%p1390_p7), %s3894_s21, 4 }
  0xd7   : > { %s3623_s9 = smul.u32 (!%p1390_p7), 1152, %s1396_s8  ;;  %p1430_p9 = scmp.lt.s32.totalorder (!%p1390_p7), %s3217_s10, 63 }
  0xd8   : > { %p3219_p10 = scmp.ne.s32.totalorder (!%p1390_p7), %s3894_s21, 0 }
  0xd9   : > { %s4511_s23 = scalar_lea.vmem (!%p1390_p7), [#allocation3], %s3623_s9 }
  0xdd   : > { %s4500_s11 = scalar_select %p1426_p8, %s3894_s21, 3 }
  0xde   : > { %s4725_s10 = smov (!%p1430_p9, %s3217_s10), 63  ;;  %1439 = sbr.rel (%p3219_p10) target bundleno = 229 (0xe5), region = 85 }
  0xdf   : > { %s1428_s14 = scalar_lea.vmem %s4717_s2, %s4500_s11  ;;  %s3218_s15 = sshll.u32 %s4725_s10, 2  ;;  %vm1440_vm0 = vcmask (!%p3219_p10), 48128   ;;  %v3845_v32 = vmov (!%p3219_p10), 0.0  }
  0xe0   : > { %s4509_s20 = scalar_lea.vmem %s4718_s3, %s3218_s15  ;;  %1441 = vst.msk [vmem:[#allocation2] sm:$0xff] (!%p3219_p10), %vm1440_vm0, %v3845_v32 }
  0xe5 PF: > { %v3651_v33 = vld [vmem:[%s4511_s23 + $0x40] sm:$0xff]   ;;  %v3655_v37 = vld [vmem:[%s4511_s23 + $0x48] sm:$0xff]   ;;  %v3659_v41 = vld [vmem:[%s4511_s23 + $0x50] sm:$0xff]   ;;  %vm3847_vm1 = vmmov 0   ;;  %vm3141_vm2 = vcmask 48128   ;;  %p3391_p11 = scmp.ne.s32.totalorder %s3894_s21, 3 }
  0xe6   : > { %v3652_v34 = vld [vmem:[%s4511_s23] sm:$0xff]   ;;  %3395 = vmatprep.subr.bf16.mxu0 %v3651_v33  ;;  %v3656_v38 = vld [vmem:[%s4511_s23 + $0x8] sm:$0xff]   ;;  %v3660_v42 = vld [vmem:[%s4511_s23 + $0x10] sm:$0xff]  }
  0xe7   : > { %v3653_v35 = vld [vmem:[%s4511_s23 + $0xc0] sm:$0xff]   ;;  %3396 = vmatpush3.bf16.msra.mxu0 %v3652_v34  ;;  %v3657_v39 = vld [vmem:[%s4511_s23 + $0xc8] sm:$0xff]   ;;  %v3661_v43 = vld [vmem:[%s4511_s23 + $0xd0] sm:$0xff]  }
  0xe8   : > { %v3654_v36 = vld [vmem:[%s4511_s23 + $0x80] sm:$0xff]   ;;  %3417 = vmatprep.subr.bf16.mxu1 %v3653_v35  ;;  %3397 = vmatprep.subr.bf16.mxu0 %v3655_v37  ;;  %v3658_v40 = vld [vmem:[%s4511_s23 + $0x88] sm:$0xff]   ;;  %v3662_v44 = vld [vmem:[%s4511_s23 + $0x90] sm:$0xff]  }
  0xe9   : > { %3418 = vmatpush3.bf16.msra.mxu1 %v3654_v36  ;;  %v3663_v45 = vld [vmem:[%s4511_s23 + $0x58] sm:$0xff]   ;;  %v3667_v49 = vld [vmem:[%s4511_s23 + $0x60] sm:$0xff]   ;;  %v3671_v53 = vld [vmem:[%s4511_s23 + $0x68] sm:$0xff]  }
  0xea   : > { %3419 = vmatprep.subr.bf16.mxu1 %v3657_v39  ;;  %v3664_v46 = vld [vmem:[%s4511_s23 + $0x18] sm:$0xff]   ;;  %v3668_v50 = vld [vmem:[%s4511_s23 + $0x20] sm:$0xff]   ;;  %v3672_v54 = vld [vmem:[%s4511_s23 + $0x28] sm:$0xff]  }
  0xeb   : > { %3398 = vmatpush3.bf16.msra.mxu0 %v3656_v38  ;;  %v3665_v47 = vld [vmem:[%s4511_s23 + $0xd8] sm:$0xff]   ;;  %v3669_v51 = vld [vmem:[%s4511_s23 + $0xe0] sm:$0xff]   ;;  %v3673_v55 = vld [vmem:[%s4511_s23 + $0xe8] sm:$0xff]  }
  0xec   : > { %3399 = vmatprep.subr.bf16.mxu0 %v3659_v41  ;;  %v3666_v48 = vld [vmem:[%s4511_s23 + $0x98] sm:$0xff]   ;;  %v3670_v52 = vld [vmem:[%s4511_s23 + $0xa0] sm:$0xff]   ;;  %v3674_v56 = vld [vmem:[%s4511_s23 + $0xa8] sm:$0xff]  }
  0xed   : > { %3420 = vmatpush3.bf16.msra.mxu1 %v3658_v40  ;;  %v3675_v57 = vld [vmem:[%s4511_s23 + $0x70] sm:$0xff]   ;;  %v3679_v61 = vld [vmem:[%s4511_s23 + $0x78] sm:$0xff]   ;;  %v3685_v4 = vld [vmem:[%s4511_s23 + $0x140] sm:$0xff]  }
  0xee   : > { %3421 = vmatprep.subr.bf16.mxu1 %v3661_v43  ;;  %v3676_v58 = vld [vmem:[%s4511_s23 + $0x30] sm:$0xff]   ;;  %v3680_v62 = vld [vmem:[%s4511_s23 + $0x38] sm:$0xff]   ;;  %v1443_v5 = vld [vmem:[%s4715_s0 + $0x8] sm:$0xff] }
  0xef   : > { %3400 = vmatpush3.bf16.msra.mxu0 %v3660_v42  ;;  %v3677_v59 = vld [vmem:[%s4511_s23 + $0xf0] sm:$0xff]   ;;  %v3681_v63 = vld [vmem:[%s4511_s23 + $0xf8] sm:$0xff]   ;;  %v3223_v6 = vcombine.low %v1443_v5, %v1443_v5  ;;  %v3224_v7 = vcombine.high %v1443_v5, %v1443_v5  ;;  %v3688_v8 = vld [vmem:[%s4511_s23 + $0x100] sm:$0xff]  }
  0xf0   : > { %3401 = vmatprep.subr.bf16.mxu0 %v3663_v45  ;;  %v3678_v60 = vld [vmem:[%s4511_s23 + $0xb0] sm:$0xff]   ;;  %v1442_v0 = vld [vmem:[%s4715_s0] sm:$0xff]  ;;  %v3689_v9 = vld [vmem:[%s4511_s23 + $0x1c0] sm:$0xff]  }
  0xf1   : > { %3422 = vmatpush3.bf16.msra.mxu1 %v3662_v44  ;;  %v3221_v1 = vcombine.low %v1442_v0, %v1442_v0  ;;  %v3222_v2 = vcombine.high %v1442_v0, %v1442_v0  ;;  %v3684_v3 = vld [vmem:[%s4511_s23 + $0xb8] sm:$0xff]   ;;  %2745 = vmatprep.mubr.bf16.mxu1 %v3224_v7  ;;  %v3690_v10 = vld [vmem:[%s4511_s23 + $0x180] sm:$0xff]   ;;  %v3691_v11 = vld [vmem:[%s4511_s23 + $0x148] sm:$0xff]  }
  0xf2   : > { %3423 = vmatprep.subr.bf16.mxu1 %v3665_v47  ;;  %v3692_v12 = vld [vmem:[%s4511_s23 + $0x108] sm:$0xff]   ;;  %v3695_v15 = vld [vmem:[%s4511_s23 + $0x150] sm:$0xff]   ;;  %v3699_v19 = vld [vmem:[%s4511_s23 + $0x158] sm:$0xff]  }
  0xf3   : > { %3402 = vmatpush3.bf16.msra.mxu0 %v3664_v46  ;;  %2705 = vmatprep.mubr.bf16.mxu0 %v3222_v2  ;;  %v3693_v13 = vld [vmem:[%s4511_s23 + $0x1c8] sm:$0xff]   ;;  %v3696_v16 = vld [vmem:[%s4511_s23 + $0x110] sm:$0xff]   ;;  %v3700_v20 = vld [vmem:[%s4511_s23 + $0x118] sm:$0xff]  }
  0xf4   : > { %3403 = vmatprep.subr.bf16.mxu0 %v3667_v49  ;;  %v3694_v14 = vld [vmem:[%s4511_s23 + $0x188] sm:$0xff]   ;;  %v3697_v17 = vld [vmem:[%s4511_s23 + $0x1d0] sm:$0xff]   ;;  %v3701_v21 = vld [vmem:[%s4511_s23 + $0x1d8] sm:$0xff]  }
  0xf5   : > { %3424 = vmatpush3.bf16.msra.mxu1 %v3666_v48  ;;  %v3698_v18 = vld [vmem:[%s4511_s23 + $0x190] sm:$0xff]   ;;  %v3702_v22 = vld [vmem:[%s4511_s23 + $0x198] sm:$0xff]   ;;  %v3703_v23 = vld [vmem:[%s4511_s23 + $0x160] sm:$0xff]  }
  0xf6   : > { %3425 = vmatprep.subr.bf16.mxu1 %v3669_v51  ;;  %v3704_v24 = vld [vmem:[%s4511_s23 + $0x120] sm:$0xff]   ;;  %v3707_v27 = vld [vmem:[%s4511_s23 + $0x168] sm:$0xff]   ;;  %v3711_v31 = vld [vmem:[%s4511_s23 + $0x170] sm:$0xff]  }
  0xf7   : > { %3404 = vmatpush3.bf16.msra.mxu0 %v3668_v50  ;;  %v3705_v25 = vld [vmem:[%s4511_s23 + $0x1e0] sm:$0xff]   ;;  %v3708_v28 = vld [vmem:[%s4511_s23 + $0x128] sm:$0xff]   ;;  %v3712_v32 = vld [vmem:[%s4511_s23 + $0x130] sm:$0xff]  }
  0xf8   : > { %3405 = vmatprep.subr.bf16.mxu0 %v3671_v53  ;;  %v3706_v26 = vld [vmem:[%s4511_s23 + $0x1a0] sm:$0xff]   ;;  %v3709_v29 = vld [vmem:[%s4511_s23 + $0x1e8] sm:$0xff]   ;;  %v3713_v33 = vld [vmem:[%s4511_s23 + $0x1f0] sm:$0xff]  }
  0xf9   : > { %3426 = vmatpush3.bf16.msra.mxu1 %v3670_v52  ;;  %v3710_v30 = vld [vmem:[%s4511_s23 + $0x1a8] sm:$0xff]   ;;  %v3714_v34 = vld [vmem:[%s4511_s23 + $0x1b0] sm:$0xff]   ;;  %v3715_v35 = vld [vmem:[%s4511_s23 + $0x178] sm:$0xff]  }
  0xfa   : > { %3427 = vmatprep.subr.bf16.mxu1 %v3673_v55  ;;  %v3716_v36 = vld [vmem:[%s4511_s23 + $0x138] sm:$0xff]   ;;  %v1444_v38 = vld [vmem:[%s4715_s0 + $0x10] sm:$0xff]  ;;  %v3721_v42 = vld [vmem:[%s4511_s23 + $0x240] sm:$0xff]  }
  0xfb   : > { %3406 = vmatpush3.bf16.msra.mxu0 %v3672_v54  ;;  %v3717_v37 = vld [vmem:[%s4511_s23 + $0x1f8] sm:$0xff]   ;;  %v3225_v39 = vcombine.low %v1444_v38, %v1444_v38  ;;  %v3226_v40 = vcombine.high %v1444_v38, %v1444_v38  ;;  %v1445_v43 = vld [vmem:[%s4715_s0 + $0x18] sm:$0xff]  ;;  %v3724_v46 = vld [vmem:[%s4511_s23 + $0x200] sm:$0xff]  }
  0xfc   : > { %3407 = vmatprep.subr.bf16.mxu0 %v3675_v57  ;;  %v3720_v41 = vld [vmem:[%s4511_s23 + $0x1b8] sm:$0xff]   ;;  %v3227_v44 = vcombine.low %v1445_v43, %v1445_v43  ;;  %v3228_v45 = vcombine.high %v1445_v43, %v1445_v43  ;;  %v3725_v47 = vld [vmem:[%s4511_s23 + $0x2c0] sm:$0xff]   ;;  %v3727_v49 = vld [vmem:[%s4511_s23 + $0x248] sm:$0xff]  }
  0xfd   : > { %3428 = vmatpush3.bf16.msra.mxu1 %v3674_v56  ;;  %v3726_v48 = vld [vmem:[%s4511_s23 + $0x280] sm:$0xff]   ;;  %v3728_v50 = vld [vmem:[%s4511_s23 + $0x208] sm:$0xff]   ;;  %v3731_v53 = vld [vmem:[%s4511_s23 + $0x250] sm:$0xff]  }
  0xfe   : > { %3429 = vmatprep.subr.bf16.mxu1 %v3677_v59  ;;  %v3729_v51 = vld [vmem:[%s4511_s23 + $0x2c8] sm:$0xff]   ;;  %v3732_v54 = vld [vmem:[%s4511_s23 + $0x210] sm:$0xff]   ;;  %v3735_v57 = vld [vmem:[%s4511_s23 + $0x258] sm:$0xff]  }
  0xff   : > { %3408 = vmatpush3.bf16.msra.mxu0 %v3676_v58  ;;  %v3730_v52 = vld [vmem:[%s4511_s23 + $0x288] sm:$0xff]   ;;  %v3733_v55 = vld [vmem:[%s4511_s23 + $0x2d0] sm:$0xff]   ;;  %v3736_v58 = vld [vmem:[%s4511_s23 + $0x218] sm:$0xff]  }
 0x100   : > { %3409 = vmatprep.subr.bf16.mxu0 %v3679_v61  ;;  %v3734_v56 = vld [vmem:[%s4511_s23 + $0x290] sm:$0xff]   ;;  %v3737_v59 = vld [vmem:[%s4511_s23 + $0x2d8] sm:$0xff]   ;;  %v3739_v61 = vld [vmem:[%s4511_s23 + $0x260] sm:$0xff]  }
 0x101   : > { %3430 = vmatpush3.bf16.msra.mxu1 %v3678_v60  ;;  %v3738_v60 = vld [vmem:[%s4511_s23 + $0x298] sm:$0xff]   ;;  %v3742_v0 = vld [vmem:[%s4511_s23 + $0x2a0] sm:$0xff]   ;;  %v3744_v2 = vld [vmem:[%s4511_s23 + $0x228] sm:$0xff]  }
 0x102   : > { %3431 = vmatprep.subr.bf16.mxu1 %v3681_v63  ;;  %v3741_v63 = vld [vmem:[%s4511_s23 + $0x2e0] sm:$0xff]   ;;  %v3747_v5 = vld [vmem:[%s4511_s23 + $0x270] sm:$0xff]  }
 0x103   : > { %3410 = vmatpush3.bf16.msra.mxu0 %v3680_v62  ;;  %v3740_v62 = vld [vmem:[%s4511_s23 + $0x220] sm:$0xff]   ;;  %v3749_v7 = vld [vmem:[%s4511_s23 + $0x2f0] sm:$0xff]  }
 0x104   : > { %3439 = vmatprep.subr.bf16.mxu0 %v3685_v4  ;;  %v3746_v4 = vld [vmem:[%s4511_s23 + $0x2a8] sm:$0xff]   ;;  %v3778_v38 = vld [vmem:[%s4511_s23 + $0x3a0] sm:$0xff]   ;;  %v3783_v43 = vld [vmem:[%s4511_s23 + $0x370] sm:$0xff]  }
 0x105   : > { %3432 = vmatpush3.bf16.msra.mxu1 %v3684_v3  ;;  %v3745_v3 = vld [vmem:[%s4511_s23 + $0x2e8] sm:$0xff]  }
 0x106   : > { %2706 = vmatmul.mubr.bf16.vlgmr.msra.gmra.mrb[0].mxu0 %v3221_v1  ;;  %3461 = vmatprep.subr.bf16.mxu1 %v3689_v9  ;;  %v3743_v1 = vld [vmem:[%s4511_s23 + $0x268] sm:$0xff]   ;;  %v3751_v9 = vld [vmem:[%s4511_s23 + $0x278] sm:$0xff]  }
 0x107   : > { %3440 = vmatpush3.bf16.msra.mxu0 %v3688_v8  ;;  %2785 = vmatprep.mubr.bf16.mxu0 %v3226_v40  ;;  %v3750_v8 = vld [vmem:[%s4511_s23 + $0x2b0] sm:$0xff]   ;;  %v3780_v40 = vld [vmem:[%s4511_s23 + $0x328] sm:$0xff]  }
 0x108   : > { %2746 = vmatmul.mubr.bf16.vlgmr.msra.gmra.mrb[0].mxu1 %v3223_v6  ;;  %3441 = vmatprep.subr.bf16.mxu0 %v3691_v11  ;;  %v3748_v6 = vld [vmem:[%s4511_s23 + $0x230] sm:$0xff]   ;;  %v3753_v11 = vld [vmem:[%s4511_s23 + $0x2f8] sm:$0xff]  }
 0x109   : > { %3462 = vmatpush3.bf16.msra.mxu1 %v3690_v10  ;;  %2825 = vmatprep.mubr.bf16.mxu1 %v3228_v45  ;;  %v3752_v10 = vld [vmem:[%s4511_s23 + $0x238] sm:$0xff]   ;;  %v3785_v45 = vld [vmem:[%s4511_s23 + $0x3f0] sm:$0xff]  }
 0x10a   : > { %3463 = vmatprep.subr.bf16.mxu1 %v3693_v13 }
 0x10b   : > { %3442 = vmatpush3.bf16.msra.mxu0 %v3692_v12  ;;  %v1446_v12 = vld [vmem:[%s4715_s0 + $0x20] sm:$0xff] }
 0x10c   : > { %3443 = vmatprep.subr.bf16.mxu0 %v3695_v15  ;;  %v3229_v13 = vcombine.low %v1446_v12, %v1446_v12  ;;  %v3756_v15 = vld [vmem:[%s4511_s23 + $0x2b8] sm:$0xff]  }
 0x10d   : > { %3464 = vmatpush3.bf16.msra.mxu1 %v3694_v14  ;;  %v3230_v14 = vcombine.high %v1446_v12, %v1446_v12  ;;  %v3813_v12 = vld [vmem:[%s4509_s20] sm:$0xff]  }
 0x10e   : > { %3465 = vmatprep.subr.bf16.mxu1 %v3697_v17  ;;  %v1447_v17 = vld [vmem:[%s4715_s0 + $0x28] sm:$0xff] }
 0x10f   : > { %3444 = vmatpush3.bf16.msra.mxu0 %v3696_v16  ;;  %v3757_v16 = vld [vmem:[%s4511_s23 + $0x340] sm:$0xff]  }
 0x110   : > { %3445 = vmatprep.subr.bf16.mxu0 %v3699_v19  ;;  %v3232_v19 = vcombine.high %v1447_v17, %v1447_v17 }
 0x111   : > { %3466 = vmatpush3.bf16.msra.mxu1 %v3698_v18  ;;  %v3231_v18 = vcombine.low %v1447_v17, %v1447_v17  ;;  %v3817_v17 = vld [vmem:[%s4509_s20 + $0x20] sm:$0xff]  }
 0x112   : > { %3467 = vmatprep.subr.bf16.mxu1 %v3701_v21  ;;  %v3761_v21 = vld [vmem:[%s4511_s23 + $0x3c0] sm:$0xff]  }
 0x113   : > { %3446 = vmatpush3.bf16.msra.mxu0 %v3700_v20  ;;  %v3760_v20 = vld [vmem:[%s4511_s23 + $0x300] sm:$0xff]  }
 0x114   : > { %3447 = vmatprep.subr.bf16.mxu0 %v3703_v23  ;;  %v3763_v23 = vld [vmem:[%s4511_s23 + $0x348] sm:$0xff]  }
 0x115   : > { %3468 = vmatpush3.bf16.msra.mxu1 %v3702_v22  ;;  %v3762_v22 = vld [vmem:[%s4511_s23 + $0x380] sm:$0xff]  }
 0x116   : > { %3469 = vmatprep.subr.bf16.mxu1 %v3705_v25  ;;  %v3765_v25 = vld [vmem:[%s4511_s23 + $0x3c8] sm:$0xff]  }
 0x117   : > { %3448 = vmatpush3.bf16.msra.mxu0 %v3704_v24  ;;  %v3764_v24 = vld [vmem:[%s4511_s23 + $0x308] sm:$0xff]  }
 0x118   : > { %3449 = vmatprep.subr.bf16.mxu0 %v3707_v27  ;;  %v3767_v27 = vld [vmem:[%s4511_s23 + $0x350] sm:$0xff]  }
 0x119   : > { %3470 = vmatpush3.bf16.msra.mxu1 %v3706_v26  ;;  %v3766_v26 = vld [vmem:[%s4511_s23 + $0x388] sm:$0xff]  }
 0x11a   : > { %3471 = vmatprep.subr.bf16.mxu1 %v3709_v29  ;;  %v3769_v29 = vld [vmem:[%s4511_s23 + $0x3d0] sm:$0xff]  }
 0x11b   : > { %3450 = vmatpush3.bf16.msra.mxu0 %v3708_v28  ;;  %v3768_v28 = vld [vmem:[%s4511_s23 + $0x310] sm:$0xff]  }
 0x11c   : > { %3451 = vmatprep.subr.bf16.mxu0 %v3711_v31  ;;  %v3771_v31 = vld [vmem:[%s4511_s23 + $0x358] sm:$0xff]  }
 0x11d   : > { %3472 = vmatpush3.bf16.msra.mxu1 %v3710_v30  ;;  %v3770_v30 = vld [vmem:[%s4511_s23 + $0x390] sm:$0xff]  }
 0x11e   : > { %3473 = vmatprep.subr.bf16.mxu1 %v3713_v33  ;;  %v3773_v33 = vld [vmem:[%s4511_s23 + $0x3d8] sm:$0xff]  }
 0x11f   : > { %3452 = vmatpush3.bf16.msra.mxu0 %v3712_v32  ;;  %v3772_v32 = vld [vmem:[%s4511_s23 + $0x318] sm:$0xff]  }
 0x120   : > { %3453 = vmatprep.subr.bf16.mxu0 %v3715_v35  ;;  %v3775_v35 = vld [vmem:[%s4511_s23 + $0x360] sm:$0xff]  }
 0x121   : > { %3474 = vmatpush3.bf16.msra.mxu1 %v3714_v34  ;;  %v3774_v34 = vld [vmem:[%s4511_s23 + $0x398] sm:$0xff]  }
 0x122   : > { %3475 = vmatprep.subr.bf16.mxu1 %v3717_v37  ;;  %v3777_v37 = vld [vmem:[%s4511_s23 + $0x3e0] sm:$0xff]  }
 0x123   : > { %3454 = vmatpush3.bf16.msra.mxu0 %v3716_v36  ;;  %v3776_v36 = vld [vmem:[%s4511_s23 + $0x320] sm:$0xff]  }
 0x124   : > { %3483 = vmatprep.subr.bf16.mxu0 %v3721_v42  ;;  %v3782_v42 = vld [vmem:[%s4511_s23 + $0x3a8] sm:$0xff]  }
 0x125   : > { %3476 = vmatpush3.bf16.msra.mxu1 %v3720_v41  ;;  %v3781_v41 = vld [vmem:[%s4511_s23 + $0x3e8] sm:$0xff]  }
 0x126   : > { %2786 = vmatmul.mubr.bf16.vlgmr.msra.gmra.mrb[4].mxu0 %v3225_v39  ;;  %3505 = vmatprep.subr.bf16.mxu1 %v3725_v47  ;;  %v3779_v39 = vld [vmem:[%s4511_s23 + $0x368] sm:$0xff]   ;;  %v3787_v47 = vld [vmem:[%s4511_s23 + $0x378] sm:$0xff]  }
 0x127   : > { %3484 = vmatpush3.bf16.msra.mxu0 %v3724_v46  ;;  %2865 = vmatprep.mubr.bf16.mxu0 %v3230_v14  ;;  %v3786_v46 = vld [vmem:[%s4511_s23 + $0x3b0] sm:$0xff]   ;;  %v3814_v14 = vld [vmem:[%s4509_s20 + $0x8] sm:$0xff]  }
 0x128   : > { %2826 = vmatmul.mubr.bf16.vlgmr.msra.gmra.mrb[4].mxu1 %v3227_v44  ;;  %3485 = vmatprep.subr.bf16.mxu0 %v3727_v49  ;;  %v3784_v44 = vld [vmem:[%s4511_s23 + $0x330] sm:$0xff]   ;;  %v3789_v49 = vld [vmem:[%s4511_s23 + $0x3f8] sm:$0xff]  }
 0x129   : > { %3506 = vmatpush3.bf16.msra.mxu1 %v3726_v48  ;;  %2905 = vmatprep.mubr.bf16.mxu1 %v3232_v19  ;;  %v3788_v48 = vld [vmem:[%s4511_s23 + $0x338] sm:$0xff]  }
 0x12a   : > { %3507 = vmatprep.subr.bf16.mxu1 %v3729_v51 }
 0x12b   : > { %3486 = vmatpush3.bf16.msra.mxu0 %v3728_v50  ;;  %v1448_v50 = vld [vmem:[%s4715_s0 + $0x30] sm:$0xff] }
 0x12c   : > { %3487 = vmatprep.subr.bf16.mxu0 %v3731_v53  ;;  %v3233_v51 = vcombine.low %v1448_v50, %v1448_v50  ;;  %v3792_v53 = vld [vmem:[%s4511_s23 + $0x3b8] sm:$0xff]  }
 0x12d   : > { %3508 = vmatpush3.bf16.msra.mxu1 %v3730_v52  ;;  %v3234_v52 = vcombine.high %v1448_v50, %v1448_v50 }
 0x12e   : > { %3509 = vmatprep.subr.bf16.mxu1 %v3733_v55  ;;  %v1449_v55 = vld [vmem:[%s4715_s0 + $0x38] sm:$0xff] }
 0x12f   : > { %3488 = vmatpush3.bf16.msra.mxu0 %v3732_v54  ;;  %v3793_v54 = vld [vmem:[%s4511_s23 + $0x440] sm:$0xff]  }
 0x130   : > { %3489 = vmatprep.subr.bf16.mxu0 %v3735_v57  ;;  %v3236_v57 = vcombine.high %v1449_v55, %v1449_v55 }
 0x131   : > { %3510 = vmatpush3.bf16.msra.mxu1 %v3734_v56  ;;  %v3235_v56 = vcombine.low %v1449_v55, %v1449_v55 }
 0x132   : > { %3511 = vmatprep.subr.bf16.mxu1 %v3737_v59  ;;  %v3797_v59 = vld [vmem:[%s4511_s23 + $0x448] sm:$0xff]  }
 0x133   : > { %3490 = vmatpush3.bf16.msra.mxu0 %v3736_v58  ;;  %v3796_v58 = vld [vmem:[%s4511_s23 + $0x400] sm:$0xff]  }
 0x134   : > { %3491 = vmatprep.subr.bf16.mxu0 %v3739_v61  ;;  %v3799_v61 = vld [vmem:[%s4511_s23 + $0x450] sm:$0xff]  }
 0x135   : > { %3512 = vmatpush3.bf16.msra.mxu1 %v3738_v60  ;;  %v3798_v60 = vld [vmem:[%s4511_s23 + $0x408] sm:$0xff]  }
 0x136   : > { %3513 = vmatprep.subr.bf16.mxu1 %v3741_v63  ;;  %v3801_v63 = vld [vmem:[%s4511_s23 + $0x458] sm:$0xff]  }
 0x137   : > { %3492 = vmatpush3.bf16.msra.mxu0 %v3740_v62  ;;  %v3800_v62 = vld [vmem:[%s4511_s23 + $0x410] sm:$0xff]  }
 0x138   : > { %3493 = vmatprep.subr.bf16.mxu0 %v3743_v1  ;;  %v3803_v1 = vld [vmem:[%s4511_s23 + $0x460] sm:$0xff]  }
 0x139   : > { %3514 = vmatpush3.bf16.msra.mxu1 %v3742_v0  ;;  %v3802_v0 = vld [vmem:[%s4511_s23 + $0x418] sm:$0xff]  }
 0x13a   : > { %3515 = vmatprep.subr.bf16.mxu1 %v3745_v3  ;;  %v1450_v3 = vld [vmem:[%s4715_s0 + $0x40] sm:$0xff] }
 0x13b   : > { %3494 = vmatpush3.bf16.msra.mxu0 %v3744_v2  ;;  %v3804_v2 = vld [vmem:[%s4511_s23 + $0x420] sm:$0xff]  }
 0x13c   : > { %3495 = vmatprep.subr.bf16.mxu0 %v3747_v5  ;;  %v3238_v5 = vcombine.high %v1450_v3, %v1450_v3 }
 0x13d   : > { %3516 = vmatpush3.bf16.msra.mxu1 %v3746_v4  ;;  %v3805_v4 = vld [vmem:[%s4511_s23 + $0x468] sm:$0xff]  }
 0x13e   : > { %3517 = vmatprep.subr.bf16.mxu1 %v3749_v7  ;;  %v3807_v7 = vld [vmem:[%s4511_s23 + $0x470] sm:$0xff]  }
 0x13f   : > { %3496 = vmatpush3.bf16.msra.mxu0 %v3748_v6  ;;  %v3806_v6 = vld [vmem:[%s4511_s23 + $0x428] sm:$0xff]  }
 0x140   : > { %3497 = vmatprep.subr.bf16.mxu0 %v3751_v9  ;;  %v3809_v9 = vld [vmem:[%s4511_s23 + $0x478] sm:$0xff]  }
 0x141   : > { %3518 = vmatpush3.bf16.msra.mxu1 %v3750_v8  ;;  %v3808_v8 = vld [vmem:[%s4511_s23 + $0x430] sm:$0xff]  }
 0x142   : > { %3519 = vmatprep.subr.bf16.mxu1 %v3753_v11  ;;  %v3237_v11 = vcombine.low %v1450_v3, %v1450_v3 }
 0x143   : > { %3498 = vmatpush3.bf16.msra.mxu0 %v3752_v10  ;;  %v3810_v10 = vld [vmem:[%s4511_s23 + $0x438] sm:$0xff]  }
 0x144   : > { %3527 = vmatprep.subr.bf16.mxu0 %v3757_v16  ;;  %v3816_v16 = vld [vmem:[%s4509_s20 + $0x18] sm:$0xff]  }
 0x145   : > { %3520 = vmatpush3.bf16.msra.mxu1 %v3756_v15  ;;  %v3815_v15 = vld [vmem:[%s4509_s20 + $0x10] sm:$0xff]  }
 0x146   : > { %2866 = vmatmul.mubr.bf16.vlgmr.msra.gmra.mrb[8].mxu0 %v3229_v13  ;;  %3549 = vmatprep.subr.bf16.mxu1 %v3761_v21  ;;  %v3846_v13 = vmov 0.0  }
 0x147   : > { %3528 = vmatpush3.bf16.msra.mxu0 %v3760_v20  ;;  %2945 = vmatprep.mubr.bf16.mxu0 %v3234_v52  ;;  %v3220_v20 = vld [vmem:[%s1428_s14] ss:$0 sm:$0xff] }
 0x148   : > { %2906 = vmatmul.mubr.bf16.vlgmr.msra.gmra.mrb[8].mxu1 %v3231_v18  ;;  %3529 = vmatprep.subr.bf16.mxu0 %v3763_v23  ;;  %v3818_v18 = vld [vmem:[%s4509_s20 + $0x28] sm:$0xff]  }
 0x149   : > { %3550 = vmatpush3.bf16.msra.mxu1 %v3762_v22  ;;  %2985 = vmatprep.mubr.bf16.mxu1 %v3236_v57 }
 0x14a   : > { %3551 = vmatprep.subr.bf16.mxu1 %v3765_v25 }
 0x14b   : > { %3530 = vmatpush3.bf16.msra.mxu0 %v3764_v24 }
 0x14c   : > { %3531 = vmatprep.subr.bf16.mxu0 %v3767_v27  ;;  %v3819_v27 = vld [vmem:[%s4509_s20 + $0x30] sm:$0xff]  }
 0x14d   : > { %3552 = vmatpush3.bf16.msra.mxu1 %v3766_v26 }
 0x14e   : > { %3553 = vmatprep.subr.bf16.mxu1 %v3769_v29 }
 0x14f   : > { %3532 = vmatpush3.bf16.msra.mxu0 %v3768_v28 }
 0x150   : > { %3533 = vmatprep.subr.bf16.mxu0 %v3771_v31 }
 0x151   : > { %3554 = vmatpush3.bf16.msra.mxu1 %v3770_v30 }
 0x152   : > { %3555 = vmatprep.subr.bf16.mxu1 %v3773_v33  ;;  %v3820_v33 = vld [vmem:[%s4509_s20 + $0x38] sm:$0xff]  }
 0x153   : > { %3534 = vmatpush3.bf16.msra.mxu0 %v3772_v32 }
 0x154   : > { %3535 = vmatprep.subr.bf16.mxu0 %v3775_v35 }
 0x155   : > { %3556 = vmatpush3.bf16.msra.mxu1 %v3774_v34 }
 0x156   : > { %3557 = vmatprep.subr.bf16.mxu1 %v3777_v37 }
 0x157   : > { %3536 = vmatpush3.bf16.msra.mxu0 %v3776_v36 }
 0x158   : > { %3537 = vmatprep.subr.bf16.mxu0 %v3779_v39 }
 0x159   : > { %3558 = vmatpush3.bf16.msra.mxu1 %v3778_v38 }
 0x15a   : > { %3559 = vmatprep.subr.bf16.mxu1 %v3781_v41 }
 0x15b   : > { %3538 = vmatpush3.bf16.msra.mxu0 %v3780_v40 }
 0x15c   : > { %3539 = vmatprep.subr.bf16.mxu0 %v3783_v43 }
 0x15d   : > { %3560 = vmatpush3.bf16.msra.mxu1 %v3782_v42 }
 0x15e   : > { %3561 = vmatprep.subr.bf16.mxu1 %v3785_v45 }
 0x15f   : > { %3540 = vmatpush3.bf16.msra.mxu0 %v3784_v44 }
 0x160   : > { %3541 = vmatprep.subr.bf16.mxu0 %v3787_v47 }
 0x161   : > { %3562 = vmatpush3.bf16.msra.mxu1 %v3786_v46 }
 0x162   : > { %3563 = vmatprep.subr.bf16.mxu1 %v3789_v49 }
 0x163   : > { %3542 = vmatpush3.bf16.msra.mxu0 %v3788_v48 }
 0x164   : > { %3571 = vmatprep.subr.bf16.mxu0 %v3793_v54 }
 0x165   : > { %3564 = vmatpush3.bf16.msra.mxu1 %v3792_v53 }
 0x166   : > { %2946 = vmatmul.mubr.bf16.vlgmr.msra.gmra.mrb[12].mxu0 %v3233_v51  ;;  %3602 = vmatprep.subr.bf16.mxu1 %v3846_v13 }
 0x167   : > { %3572 = vmatpush3.bf16.msra.mxu0 %v3796_v58  ;;  %3025 = vmatprep.mubr.bf16.mxu0 %v3238_v5 }
 0x168   : > { %2986 = vmatmul.mubr.bf16.vlgmr.msra.gmra.mrb[12].mxu1 %v3235_v56  ;;  %3573 = vmatprep.subr.bf16.mxu0 %v3797_v59 }
 0x169   : > { %3603 = vmatpush3.bf16.msra.mxu1 %v3813_v12  ;;  %3618 = vmatprep.mubr.msk.bf16.mxu1 %vm3847_vm1, %v3846_v13 }
 0x16a   : > { %3604 = vmatprep.subr.bf16.mxu1 %v3846_v13 }
 0x16b   : > { %3574 = vmatpush3.bf16.msra.mxu0 %v3798_v60 }
 0x16c   : > { %3575 = vmatprep.subr.bf16.mxu0 %v3799_v61 }
 0x16d   : > { %3605 = vmatpush3.bf16.msra.mxu1 %v3814_v14  ;;  %v3034_v14 = vld [vmem:[#allocation2] sm:$0xff] }
 0x16e   : > { %3606 = vmatprep.subr.bf16.mxu1 %v3846_v13 }
 0x16f   : > { %3576 = vmatpush3.bf16.msra.mxu0 %v3800_v62 }
 0x170   : > { %3577 = vmatprep.subr.bf16.mxu0 %v3801_v63 }
 0x171   : > { %3607 = vmatpush3.bf16.msra.mxu1 %v3815_v15 }
 0x172   : > { %3608 = vmatprep.subr.bf16.mxu1 %v3846_v13 }
 0x173   : > { %3578 = vmatpush3.bf16.msra.mxu0 %v3802_v0 }
 0x174   : > { %3579 = vmatprep.subr.bf16.mxu0 %v3803_v1 }
 0x175   : > { %3609 = vmatpush3.bf16.msra.mxu1 %v3816_v16 }
 0x176   : > { %3610 = vmatprep.subr.bf16.mxu1 %v3846_v13 }
 0x177   : > { %3580 = vmatpush3.bf16.msra.mxu0 %v3804_v2 }
 0x178   : > { %3581 = vmatprep.subr.bf16.mxu0 %v3805_v4 }
 0x179   : > { %3611 = vmatpush3.bf16.msra.mxu1 %v3817_v17 }
 0x17a   : > { %3612 = vmatprep.subr.bf16.mxu1 %v3846_v13 }
 0x17b   : > { %3582 = vmatpush3.bf16.msra.mxu0 %v3806_v6 }
 0x17c   : > { %3583 = vmatprep.subr.bf16.mxu0 %v3807_v7 }
 0x17d   : > { %3613 = vmatpush3.bf16.msra.mxu1 %v3818_v18 }
 0x17e   : > { %3614 = vmatprep.subr.bf16.mxu1 %v3846_v13 }
 0x17f   : > { %3584 = vmatpush3.bf16.msra.mxu0 %v3808_v8 }
 0x180   : > { %3585 = vmatprep.subr.bf16.mxu0 %v3809_v9 }
 0x181   : > { %3615 = vmatpush3.bf16.msra.mxu1 %v3819_v27 }
 0x182   : > { %3616 = vmatprep.subr.bf16.mxu1 %v3846_v13 }
 0x183   : > { %3586 = vmatpush3.bf16.msra.mxu0 %v3810_v10 }
 0x185   : > { %3617 = vmatpush3.bf16.msra.mxu1 %v3820_v33 }
 0x186   : > { %3026 = vmatmul.mubr.bf16.vlgmr.msra.gmra.mrb[16].mxu0 %v3237_v11 }
 0x1d9   : > { %v3411_v19 = vpop.f32.mrb[0].mxu0 }
 0x1da   : > { %v3412_v21 = vpop.f32.mrb[1].mxu0 }
 0x1db   : > { %v3413_v22 = vadd.f32 %v3412_v21, %v3411_v19  ;;  %v3414_v23 = vpop.f32.mrb[2].mxu0  ;;  %v3433_v24 = vpop.f32.mrb[0].mxu1  ;;  %v3392_v21 = vld [vmem:[%s4719_s4] ss:$0 sm:$0xff] (!%p3391_p11) }
 0x1dc   : > { %v3415_v25 = vpop.f32.mrb[3].mxu0  ;;  %v3434_v26 = vpop.f32.mrb[1].mxu1 }
 0x1dd   : > { %v2708_v28 = vadd.f32 %v3413_v22, %v3220_v20  ;;  %v3435_v29 = vadd.f32 %v3434_v26, %v3433_v24  ;;  %v3436_v30 = vpop.f32.mrb[2].mxu1 }
 0x1de   : > { %v3437_v31 = vpop.f32.mrb[3].mxu1 }
 0x1df   : > { %v2748_v32 = vadd.f32 %v3435_v29, %v2708_v28 }
 0x1f9   : > { %v3455_v34 = vpop.f32.mrb[4].mxu0 }
 0x1fa   : > { %v3456_v35 = vpop.f32.mrb[5].mxu0 }
 0x1fb   : > { %v3457_v36 = vadd.f32 %v3456_v35, %v3455_v34  ;;  %v3458_v37 = vpop.f32.mrb[6].mxu0  ;;  %v3477_v38 = vpop.f32.mrb[4].mxu1 }
 0x1fc   : > { %v3459_v39 = vpop.f32.mrb[7].mxu0  ;;  %v3478_v41 = vpop.f32.mrb[5].mxu1 }
 0x1fd   : > { %v2788_v40 = vadd.f32 %v3457_v36, %v2748_v32  ;;  %v3479_v42 = vadd.f32 %v3478_v41, %v3477_v38  ;;  %v3480_v43 = vpop.f32.mrb[6].mxu1 }
 0x1fe   : > { %v3481_v44 = vpop.f32.mrb[7].mxu1 }
 0x1ff   : > { %v2828_v45 = vadd.f32 %v3479_v42, %v2788_v40 }
 0x219   : > { %v3499_v46 = vpop.f32.mrb[8].mxu0 }
 0x21a   : > { %v3500_v47 = vpop.f32.mrb[9].mxu0 }
 0x21b   : > { %v3501_v48 = vadd.f32 %v3500_v47, %v3499_v46  ;;  %v3502_v49 = vpop.f32.mrb[10].mxu0  ;;  %v3521_v50 = vpop.f32.mrb[8].mxu1 }
 0x21c   : > { %v3503_v51 = vpop.f32.mrb[11].mxu0  ;;  %v3522_v52 = vpop.f32.mrb[9].mxu1 }
 0x21d   : > { %v2868_v53 = vadd.f32 %v3501_v48, %v2828_v45  ;;  %v3523_v54 = vadd.f32 %v3522_v52, %v3521_v50  ;;  %v3524_v55 = vpop.f32.mrb[10].mxu1 }
 0x21e   : > { %v3525_v56 = vpop.f32.mrb[11].mxu1 }
 0x21f   : > { %v2908_v57 = vadd.f32 %v3523_v54, %v2868_v53 }
 0x239   : > { %v3543_v58 = vpop.f32.mrb[12].mxu0 }
 0x23a   : > { %v3544_v59 = vpop.f32.mrb[13].mxu0 }
 0x23b   : > { %v3545_v60 = vadd.f32 %v3544_v59, %v3543_v58  ;;  %v3546_v61 = vpop.f32.mrb[14].mxu0  ;;  %v3565_v62 = vpop.f32.mrb[12].mxu1 }
 0x23c   : > { %v3547_v63 = vpop.f32.mrb[15].mxu0  ;;  %v3566_v0 = vpop.f32.mrb[13].mxu1 }
 0x23d   : > { %v2948_v1 = vadd.f32 %v3545_v60, %v2908_v57  ;;  %v3567_v2 = vadd.f32 %v3566_v0, %v3565_v62  ;;  %v3568_v3 = vpop.f32.mrb[14].mxu1 }
 0x23e   : > { %v3569_v4 = vpop.f32.mrb[15].mxu1 }
 0x23f   : > { %v2988_v5 = vadd.f32 %v3567_v2, %v2948_v1 }
 0x259   : > { %v3587_v6 = vpop.f32.mrb[16].mxu0 }
 0x25a   : > { %v3588_v7 = vpop.f32.mrb[17].mxu0 }
 0x25b   : > { %v3589_v8 = vadd.f32 %v3588_v7, %v3587_v6  ;;  %v3590_v9 = vpop.f32.mrb[18].mxu0 }
 0x25c   : > { %v3591_v10 = vpop.f32.mrb[19].mxu0 }
 0x25d   : > { %v3028_v11 = vadd.f32 %v3589_v8, %v2988_v5 }
 0x25f   : > { %v3033_v12 = vmax.f32 %v3028_v11, 0.0 }
 0x261   : > { %v3035_v13 = vpack.c.bf16 %v3033_v12, %v3033_v12 }
 0x263   : > { %3619 = vmatmul.mubr.bf16.vlgmr.msra.gmra.mrb[16].mxu1 %v3035_v13 }
 0x333   : > { %3146 = sbr.rel (%p3391_p11) target bundleno = 836 (0x344), region = 89 }
 0x336   : > { %v3134_v15 = vpop.f32.mrb[16].mxu1 }
 0x337   : > { %v3140_v16 = vadd.f32 %v3134_v15, %v3034_v14  ;;  %v3620_v17 = vpop.f32.mrb[17].mxu1 }
 0x338   : > { %v3137_v18 = vpop.f32.mrb[18].mxu1 }
 0x339   : > { %3142 = vst.msk [vmem:[#allocation2] sm:$0xff] %vm3141_vm2, %v3140_v16  ;;  %v3621_v19 = vpop.f32.mrb[19].mxu1 }
 0x340   : > { %v3147_v20 = vld [vmem:[#allocation2] sm:$0xff] }
 0x341   : > { %v3155_v22 = vadd.f32 %v3392_v21, %v3147_v20 }
 0x343   : > { %3156 = vst.msk [vmem:[%s4720_s5] sm:$0xff] %vm3141_vm2, %v3155_v22 }
 0x344 PF: > { %p12_p12 = scmp.ge.s32.totalorder %s3897_s22, 6   ;;  %s4721_s18 = smov %s3839_s19 }
 0x345   : > { %s4722_s19 = smov %s3906_s25  ;;  %s4723_s20 = smov %s3897_s22 }
 0x346   :  { %14 = sbr.rel (!%p12_p12) target bundleno = 2 (0x2), region = 126 }

</bundles_post_ra>
